<compile_context>
chip_gen: v5e
topology: v5e:2x2
jax: 0.10.0
libtpu: 0.0.40
codegen_flags: <defaults>
</compile_context>

<pallas_src>
import numpy as np
import jax
import jax.numpy as jnp
from jax.experimental import pallas as pl
from jax.experimental.pallas import tpu as pltpu

# ----------------------------------------------------------------------------
# Model dimensions.  The module's forward() implicitly requires:
#   arch_input_size == arch_output_size == V_a
#   arch_hp_output_size == V_hp
#   arch_hp_input_size == V_a + V_hp
#   arch_hidden_size + arch_hp_hidden_size // 2 == arch_hp_hidden_size
#   seq_len == 1  (thought vectors double as LSTM hidden states)
# ----------------------------------------------------------------------------
V_A = 8            # len(architecture_vocab) == arch_input_size == arch_output_size
V_HP = 8           # len(hparms_vocab)       == arch_hp_output_size
H_A = 16           # arch_hidden_size
H_HP = 32          # arch_hp_hidden_size  (H_A + H_HP//2 == H_HP)
H_SUM = H_HP // 2  # hp_summarizer output size
MAX_DEPTH = 12     # max_arch_depth
TB = 8             # batch tile (sublane group) per grid step

# TODO(synk): data_processor / vocab objects are replaced by the fixed vocab
# sizes above (only len(vocab) is used by the forward pass).

# -------- packed-weight-slab layout (rows x 256 lanes); section starts are
# multiples of 8 so in-kernel slices stay sublane-aligned. --------------------
SLAB_LANES = 256
COL_A = 0          # fused-matmul output cols 0..63   : arch LSTM gates (+b_a)
COL_HP = 128       # fused-matmul output cols 128..255: hp prev-state gates (+b_hp)

FUSE_ROWS = V_A + H_A + V_HP + H_HP + 8       # [a|h_a|a_hp|c_hp|ones] = 72
ROW_FUSE = 0                                  # (72, 256) block-diag + bias row
ROW_BLK = ROW_FUSE + FUSE_ROWS                # (48, 24) block-diag(arch_out,summ)
ROW_BBLK = ROW_BLK + (H_A + H_HP)             # (1, 24)    row 120
ROW_HPA = 128                                 # (8, 128)  a-dependent hp rows
ROW_OHP = ROW_HPA + V_A                       # (32, 8)   arch_hp_out   row 136
ROW_BOHP = ROW_OHP + H_HP                     # (1, 8)                  row 168
SLAB_ROWS = ROW_BOHP + 8                      # 176


def _recip(s):
    """EUP approx reciprocal + one Newton step (~f32-exact).

    Keeps the softmax feedback loop numerically close to the reference while
    avoiding a VPU divide on the critical path."""
    r = pl.reciprocal(s, approx=True)
    return r * (2.0 - s * r)


def _gates(g, c, H):
    """Fused LSTM gate nonlinearity, ONE tanh push per cell.

    Gate columns are pre-permuted offline to [i|f|o|g] and the g columns
    pre-scaled by 2, so tanh(0.5*g) gives the sigmoid argument for i/f/o and
    the tanh for g simultaneously.  `g` already includes the bias."""
    t = jnp.tanh(0.5 * g)
    sig = 0.5 * (t[:, :3 * H] + 1.0)
    i_g = sig[:, 0 * H:1 * H]
    f_g = sig[:, 1 * H:2 * H]
    o_g = sig[:, 2 * H:3 * H]
    g_g = t[:, 3 * H:]
    c_new = f_g * c + i_g * g_g
    h_new = o_g * jnp.tanh(c_new)
    return h_new, c_new


def arch_decoder_kernel(x_ref, w_ref, out_ref):
    # ---- static, sublane-aligned slices of the packed weight slab ----------
    w_fuse = w_ref[ROW_FUSE:ROW_FUSE + FUSE_ROWS, :]                 # (72, 256)
    w_blk = w_ref[ROW_BLK:ROW_BLK + H_A + H_HP, :V_A + H_SUM]        # (48, 24)
    b_blk = w_ref[ROW_BBLK:ROW_BBLK + 1, :V_A + H_SUM]               # (1, 24)
    w_hpa = w_ref[ROW_HPA:ROW_HPA + V_A, :4 * H_HP]                  # (8, 128)
    w_ohp = w_ref[ROW_OHP:ROW_OHP + H_HP, :V_HP]                     # (32, 8)
    b_ohp = w_ref[ROW_BOHP:ROW_BOHP + 1, :V_HP]                      # (1, 8)

    # ---- state init (get_init_hidden: c's zero, h's are the thought vecs) --
    B = x_ref.shape[0]
    h_a = x_ref[:, :H_A]
    h_hp = x_ref[:, H_A:]
    c_a = jnp.zeros((B, H_A), jnp.float32)
    c_hp = jnp.zeros((B, H_HP), jnp.float32)
    a = jnp.full((B, V_A), 1.0 / V_A, jnp.float32)        # SOS_a
    a_hp = jnp.full((B, V_HP), 1.0 / V_HP, jnp.float32)   # SOS_a_hp
    ones = jnp.ones((B, 8), jnp.float32)                  # folded-bias lanes

    # ---- static unroll of the 12-step autoregressive decode (kept unrolled
    # so the LLO scheduler can overlap step i's hp tail with step i+1's head).
    for i in range(MAX_DEPTH):
        # One step-start block-diagonal matmul: arch-cell gates (cols 0..63)
        # and the previous-state share of the hp-cell gates (cols 128..255),
        # both with their biases folded in via the constant-one LHS lanes.
        state = jnp.concatenate([a, h_a, a_hp, c_hp, ones], axis=-1)  # (B, 72)
        fused = jnp.dot(state, w_fuse,
                        preferred_element_type=jnp.float32)           # (B, 256)
        g_a = fused[:, COL_A:COL_A + 4 * H_A]                         # (B, 64)
        g_hp_prev = fused[:, COL_HP:COL_HP + 4 * H_HP]                # (B, 128)

        # forward_arch: LSTM cell nonlinearity.
        h_a, c_a = _gates(g_a, c_a, H_A)

        # arch_out + hp_summarizer fused as a block-diagonal matmul.
        blk = jnp.dot(jnp.concatenate([h_a, h_hp], axis=-1), w_blk,
                      preferred_element_type=jnp.float32) + b_blk     # (B, 24)
        # No max-subtraction: |logits| <~ 4.3 (tanh-bounded h_a, U(+-1/sqrt(H))
        # weights) so exp is safe in f32.  Re-enable max-sub for arbitrary /
        # trained weights with large norms.
        e_a = jnp.exp(blk[:, :V_A])
        h_hp_s = jnp.maximum(blk[:, V_A:], 0.0)                       # ReLU

        # forward_arch_hp.  Deferred softmax normalization: push the
        # unnormalized exp through the (linear) a-dependent hp matmul so the
        # lane-reduce + reciprocal overlap with the MXU push, rescale after.
        g_hp_a = jnp.dot(e_a, w_hpa,
                         preferred_element_type=jnp.float32)          # (B, 128)
        r_a = _recip(jnp.sum(e_a, axis=-1, keepdims=True))
        a = e_a * r_a                                                 # softmax(arch_out)
        g_hp = g_hp_prev + r_a * g_hp_a                               # full hp gates

        # Note the (intentional, per the PyTorch code) swapped hx: the hp LSTM
        # gets h_0 = c_hp, c_0 = cat(h_a, h_hp_s); returned (h_n, c_n) become
        # (h_hp, c_hp).
        c_in = jnp.concatenate([h_a, h_hp_s], axis=-1)                # (B, 32)
        h_hp, c_hp = _gates(g_hp, c_in, H_HP)

        e_hp = jnp.exp(jnp.dot(h_hp, w_ohp,
                               preferred_element_type=jnp.float32) + b_ohp)
        a_hp = e_hp * _recip(jnp.sum(e_hp, axis=-1, keepdims=True))

        # one combined store per step: [a | a_hp]  (off the dependency chain)
        out_ref[i] = jnp.concatenate([a, a_hp], axis=-1)


# ----------------------------------------------------------------------------
# Parameter construction / packing (wrapper side, plain JAX).
# ----------------------------------------------------------------------------
def init_params(key):
    """Deterministic PyTorch-style uniform init (U(-1/sqrt(fan), 1/sqrt(fan)))."""
    ks = jax.random.split(key, 16)

    def u(k, shape, bound):
        return jax.random.uniform(k, shape, jnp.float32, -bound, bound)

    ka, khp = 1.0 / np.sqrt(H_A), 1.0 / np.sqrt(H_HP)
    # arch LSTM: weight_ih (4H,V_A), weight_hh (4H,H_A) -- stored transposed.
    w_ih_a = u(ks[0], (V_A, 4 * H_A), ka)
    w_hh_a = u(ks[1], (H_A, 4 * H_A), ka)
    b_a = u(ks[2], (1, 4 * H_A), ka) + u(ks[3], (1, 4 * H_A), ka)   # b_ih + b_hh
    # arch_out Linear(H_A, V_A)
    w_out_a = u(ks[4], (H_A, V_A), ka)
    b_out_a = u(ks[5], (1, V_A), ka)
    # arch_hp LSTM: input V_A+V_HP, hidden H_HP
    w_ih_hp = u(ks[6], (V_A + V_HP, 4 * H_HP), khp)
    w_hh_hp = u(ks[7], (H_HP, 4 * H_HP), khp)
    b_hp = u(ks[8], (1, 4 * H_HP), khp) + u(ks[9], (1, 4 * H_HP), khp)
    # hp_summarizer Linear(H_HP, H_HP//2)
    w_sum = u(ks[10], (H_HP, H_SUM), khp)
    b_sum = u(ks[11], (1, H_SUM), khp)
    # arch_hp_out Linear(H_HP, V_HP)
    w_out_hp = u(ks[12], (H_HP, V_HP), khp)
    b_out_hp = u(ks[13], (1, V_HP), khp)
    return (w_ih_a, w_hh_a, b_a, w_out_a, b_out_a,
            w_ih_hp, w_hh_hp, b_hp, w_sum, b_sum, w_out_hp, b_out_hp)


def _permute_scale_gates(w, H):
    """[i|f|g|o] -> [i|f|o|2*g] (offline): lets one tanh(0.5*x) in-kernel serve
    as both the sigmoid (first 3H cols) and the tanh (last H cols)."""
    return jnp.concatenate(
        [w[..., :2 * H], w[..., 3 * H:4 * H], 2.0 * w[..., 2 * H:3 * H]], axis=-1)


def pack_params(params):
    """Fuse + pad + pack all weights/biases into one (SLAB_ROWS, 256) f32 slab."""
    (w_ih_a, w_hh_a, b_a, w_out_a, b_out_a,
     w_ih_hp, w_hh_hp, b_hp, w_sum, b_sum, w_out_hp, b_out_hp) = params

    # fused arch LSTM: concat [W_ih; W_hh] on contraction axis, permute/scale.
    w_a = _permute_scale_gates(jnp.concatenate([w_ih_a, w_hh_a], axis=0), H_A)
    b_a_p = _permute_scale_gates(b_a, H_A)
    # fused hp LSTM, then split by LHS source:
    #   rows 0..7   -> this-step a (on the post-softmax critical path)
    #   rows 8..47  -> [a_hp_prev, c_hp_prev] (available at step start)
    w_hp = _permute_scale_gates(jnp.concatenate([w_ih_hp, w_hh_hp], axis=0), H_HP)
    b_hp_p = _permute_scale_gates(b_hp, H_HP)
    w_hp_a = w_hp[:V_A]            # (8, 128)
    w_hp_prev = w_hp[V_A:]         # (40, 128)

    slab = jnp.zeros((SLAB_ROWS, SLAB_LANES), jnp.float32)

    # --- step-start fused block-diagonal matmul (LHS = [a|h_a|a_hp|c_hp|1]) --
    r0 = ROW_FUSE
    slab = slab.at[r0:r0 + V_A + H_A, COL_A:COL_A + 4 * H_A].set(w_a)
    slab = slab.at[r0 + V_A + H_A:r0 + V_A + H_A + V_HP + H_HP,
                   COL_HP:COL_HP + 4 * H_HP].set(w_hp_prev)
    r_bias = r0 + V_A + H_A + V_HP + H_HP          # first of the 8 "ones" rows
    slab = slab.at[r_bias, COL_A:COL_A + 4 * H_A].set(b_a_p[0])
    slab = slab.at[r_bias, COL_HP:COL_HP + 4 * H_HP].set(b_hp_p[0])

    # --- block-diag(arch_out (16x8), hp_summarizer (32x16)) -> (48, 24) ------
    slab = slab.at[ROW_BLK:ROW_BLK + H_A, :V_A].set(w_out_a)
    slab = slab.at[ROW_BLK + H_A:ROW_BLK + H_A + H_HP, V_A:V_A + H_SUM].set(w_sum)
    slab = slab.at[ROW_BBLK, :V_A].set(b_out_a[0])
    slab = slab.at[ROW_BBLK, V_A:V_A + H_SUM].set(b_sum[0])

    # --- remaining sections ---------------------------------------------------
    slab = slab.at[ROW_HPA:ROW_HPA + V_A, :4 * H_HP].set(w_hp_a)
    slab = slab.at[ROW_OHP:ROW_OHP + H_HP, :V_HP].set(w_out_hp)
    slab = slab.at[ROW_BOHP, :V_HP].set(b_out_hp[0])
    return slab


def arch_decoder_forward(x_thought_vec_arch, x_thought_vec_arch_hp, w_slab):
    """Returns (arch, arch_hp): (B, MAX_DEPTH, V_A) / (B, MAX_DEPTH, V_HP)."""
    B = x_thought_vec_arch.shape[0]
    xa = x_thought_vec_arch.reshape(B, H_A).astype(jnp.float32)
    xhp = x_thought_vec_arch_hp.reshape(B, H_HP).astype(jnp.float32)
    x_packed = jnp.concatenate([xa, xhp], axis=-1)                # (B, 48)

    b_pad = ((B + TB - 1) // TB) * TB
    if b_pad != B:
        x_packed = jnp.pad(x_packed, ((0, b_pad - B), (0, 0)))

    out = pl.pallas_call(
        arch_decoder_kernel,
        out_shape=jax.ShapeDtypeStruct((MAX_DEPTH, b_pad, V_A + V_HP), jnp.float32),
        grid=(b_pad // TB,),
        in_specs=[
            pl.BlockSpec((TB, H_A + H_HP), lambda i: (i, 0)),
            pl.BlockSpec((SLAB_ROWS, SLAB_LANES), lambda i: (0, 0)),  # resident
        ],
        out_specs=pl.BlockSpec((MAX_DEPTH, TB, V_A + V_HP), lambda i: (0, i, 0)),
        compiler_params=pltpu.CompilerParams(
            dimension_semantics=("parallel",)),   # v7x: batch tiles across both TCs
    )(x_packed, w_slab)

    out = out[:, :B, :]
    # PyTorch returns cat over dim=1 of MAX_DEPTH x (batch, seq=1, V).
    arch = jnp.transpose(out[:, :, :V_A], (1, 0, 2))
    arch_hp = jnp.transpose(out[:, :, V_A:], (1, 0, 2))
    return arch, arch_hp


def reference_forward(x_thought_vec_arch, x_thought_vec_arch_hp, params):
    """Pure-JAX replica of the PyTorch forward (unfused weights), for checking."""
    (w_ih_a, w_hh_a, b_a, w_out_a, b_out_a,
     w_ih_hp, w_hh_hp, b_hp, w_sum, b_sum, w_out_hp, b_out_hp) = params

    def cell(x, h, c, wi, wh, b):
        g = x @ wi + h @ wh + b
        H = h.shape[-1]
        i_g = jax.nn.sigmoid(g[:, :H])
        f_g = jax.nn.sigmoid(g[:, H:2 * H])
        g_g = jnp.tanh(g[:, 2 * H:3 * H])
        o_g = jax.nn.sigmoid(g[:, 3 * H:])
        c2 = f_g * c + i_g * g_g
        return o_g * jnp.tanh(c2), c2

    B = x_thought_vec_arch.shape[0]
    h_a = x_thought_vec_arch.reshape(B, H_A)
    c_a = jnp.zeros((B, H_A))
    h_hp = x_thought_vec_arch_hp.reshape(B, H_HP)
    c_hp = jnp.zeros((B, H_HP))
    a = jnp.full((B, V_A), 1.0 / V_A)
    a_hp = jnp.full((B, V_HP), 1.0 / V_HP)
    arch, arch_hp = [], []
    for _ in range(MAX_DEPTH):
        h_a, c_a = cell(a, h_a, c_a, w_ih_a, w_hh_a, b_a)
        a = jax.nn.softmax(h_a @ w_out_a + b_out_a, axis=-1)
        h_hp_s = jnp.maximum(h_hp @ w_sum + b_sum, 0.0)
        prev_h_hp = jnp.concatenate([h_a, h_hp_s], axis=-1)
        inp = jnp.concatenate([a, a_hp], axis=-1)
        h_hp, c_hp = cell(inp, c_hp, prev_h_hp, w_ih_hp, w_hh_hp, b_hp)
        a_hp = jax.nn.softmax(h_hp @ w_out_hp + b_out_hp, axis=-1)
        arch.append(a)
        arch_hp.append(a_hp)
    return jnp.stack(arch, axis=1), jnp.stack(arch_hp, axis=1)


if __name__ == "__main__":
    B = 16  # two batch tiles -> exercises the (parallel) grid
    key = jax.random.PRNGKey(0)
    k_p, k_xa, k_xhp = jax.random.split(key, 3)
    params = init_params(k_p)
    w_slab = pack_params(params)

    # Thought vectors: (batch, seq=1, hidden) as the PyTorch forward expects.
    x_thought_vec_arch = jax.random.normal(k_xa, (B, 1, H_A), jnp.float32)
    x_thought_vec_arch_hp = jax.random.normal(k_xhp, (B, 1, H_HP), jnp.float32)

    arch, arch_hp = arch_decoder_forward(
        x_thought_vec_arch, x_thought_vec_arch_hp, w_slab)
    jax.block_until_ready((arch, arch_hp))

    ref_arch, ref_arch_hp = reference_forward(
        x_thought_vec_arch, x_thought_vec_arch_hp, params)
    assert arch.shape == (B, MAX_DEPTH, V_A)
    assert arch_hp.shape == (B, MAX_DEPTH, V_HP)
    np.testing.assert_allclose(np.asarray(arch), np.asarray(ref_arch),
                               rtol=2e-3, atol=2e-3)
    np.testing.assert_allclose(np.asarray(arch_hp), np.asarray(ref_arch_hp),
                               rtol=2e-3, atol=2e-3)

    print("KERNEL_OK")
</pallas_src>

<mosaic_0001>
module attributes {stable_mosaic.version = 11 : i64} {
  func.func @arch_decoder_kernel(%arg0: i32, %arg1: memref<8x48xf32, #tpu.memory_space<vmem>>, %arg2: memref<176x256xf32, #tpu.memory_space<vmem>>, %arg3: memref<12x8x16xf32, #tpu.memory_space<vmem>>) attributes {dimension_semantics = [#tpu.dimension_semantics<parallel>], iteration_bounds = array<i64: 2>, scalar_prefetch = 0 : i64, scratch_operands = 0 : i64, tpu.core_type = #tpu.core_type<tc>, window_params = [{transform_indices = @transform_0, window_bounds = array<i64: 8, 48>}, {pipeline_mode = #tpu.pipeline_mode<synchronous>, transform_indices = @transform_1, window_bounds = array<i64: 176, 256>}, {transform_indices = @transform_2, window_bounds = array<i64: 12, 8, 16>}]} {
    %c0 = arith.constant 0 : index
    %c0_0 = arith.constant 0 : index
    %0 = vector.load %arg2[%c0, %c0_0] : memref<176x256xf32, #tpu.memory_space<vmem>>, vector<72x256xf32>
    %c72 = arith.constant 72 : index
    %c0_1 = arith.constant 0 : index
    %1 = vector.load %arg2[%c72, %c0_1] : memref<176x256xf32, #tpu.memory_space<vmem>>, vector<48x24xf32>
    %c120 = arith.constant 120 : index
    %c0_2 = arith.constant 0 : index
    %2 = vector.load %arg2[%c120, %c0_2] : memref<176x256xf32, #tpu.memory_space<vmem>>, vector<1x24xf32>
    %c128 = arith.constant 128 : index
    %c0_3 = arith.constant 0 : index
    %3 = vector.load %arg2[%c128, %c0_3] : memref<176x256xf32, #tpu.memory_space<vmem>>, vector<8x128xf32>
    %c136 = arith.constant 136 : index
    %c0_4 = arith.constant 0 : index
    %4 = vector.load %arg2[%c136, %c0_4] : memref<176x256xf32, #tpu.memory_space<vmem>>, vector<32x8xf32>
    %c168 = arith.constant 168 : index
    %c0_5 = arith.constant 0 : index
    %5 = vector.load %arg2[%c168, %c0_5] : memref<176x256xf32, #tpu.memory_space<vmem>>, vector<1x8xf32>
    %c0_6 = arith.constant 0 : index
    %c0_7 = arith.constant 0 : index
    %6 = vector.load %arg1[%c0_6, %c0_7] : memref<8x48xf32, #tpu.memory_space<vmem>>, vector<8x16xf32>
    %c0_8 = arith.constant 0 : index
    %c16 = arith.constant 16 : index
    %7 = vector.load %arg1[%c0_8, %c16] : memref<8x48xf32, #tpu.memory_space<vmem>>, vector<8x32xf32>
    %cst = arith.constant 0.000000e+00 : f32
    %8 = vector.broadcast %cst : f32 to vector<8x16xf32>
    %cst_9 = arith.constant 0.000000e+00 : f32
    %9 = vector.broadcast %cst_9 : f32 to vector<8x32xf32>
    %cst_10 = arith.constant 1.250000e-01 : f32
    %10 = vector.broadcast %cst_10 : f32 to vector<8x8xf32>
    %cst_11 = arith.constant 1.250000e-01 : f32
    %11 = vector.broadcast %cst_11 : f32 to vector<8x8xf32>
    %cst_12 = arith.constant 1.000000e+00 : f32
    %12 = vector.broadcast %cst_12 : f32 to vector<8x8xf32>
    %13 = tpu.concatenate %10, %6, %11, %9, %12 in 1 : vector<8x8xf32>, vector<8x16xf32>, vector<8x8xf32>, vector<8x32xf32>, vector<8x8xf32> -> vector<8x72xf32>
    %cst_13 = arith.constant dense<0.000000e+00> : vector<8x256xf32>
    %14 = tpu.matmul %13, %0, %cst_13 {dimension_numbers = #tpu.dot_dimension_numbers<[1], [0], [0], [1], [0, 0, 1, 1], [], []>} : vector<8x72xf32>, vector<72x256xf32>, vector<8x256xf32> -> vector<8x256xf32>
    %15 = vector.extract_strided_slice %14 {offsets = [0, 0], sizes = [8, 64], strides = [1, 1]} : vector<8x256xf32> to vector<8x64xf32>
    %16 = vector.extract_strided_slice %14 {offsets = [0, 128], sizes = [8, 128], strides = [1, 1]} : vector<8x256xf32> to vector<8x128xf32>
    %cst_14 = arith.constant 5.000000e-01 : f32
    %17 = vector.broadcast %cst_14 : f32 to vector<8x64xf32>
    %18 = arith.mulf %17, %15 : vector<8x64xf32>
    %19 = math.tanh %18 : vector<8x64xf32>
    %20 = vector.extract_strided_slice %19 {offsets = [0, 0], sizes = [8, 48], strides = [1, 1]} : vector<8x64xf32> to vector<8x48xf32>
    %cst_15 = arith.constant 1.000000e+00 : f32
    %21 = vector.broadcast %cst_15 : f32 to vector<8x48xf32>
    %22 = arith.addf %20, %21 : vector<8x48xf32>
    %cst_16 = arith.constant 5.000000e-01 : f32
    %23 = vector.broadcast %cst_16 : f32 to vector<8x48xf32>
    %24 = arith.mulf %23, %22 : vector<8x48xf32>
    %25 = vector.extract_strided_slice %24 {offsets = [0, 0], sizes = [8, 16], strides = [1, 1]} : vector<8x48xf32> to vector<8x16xf32>
    %26 = vector.extract_strided_slice %24 {offsets = [0, 16], sizes = [8, 16], strides = [1, 1]} : vector<8x48xf32> to vector<8x16xf32>
    %27 = vector.extract_strided_slice %24 {offsets = [0, 32], sizes = [8, 16], strides = [1, 1]} : vector<8x48xf32> to vector<8x16xf32>
    %28 = vector.extract_strided_slice %19 {offsets = [0, 48], sizes = [8, 16], strides = [1, 1]} : vector<8x64xf32> to vector<8x16xf32>
    %29 = arith.mulf %26, %8 : vector<8x16xf32>
    %30 = arith.mulf %25, %28 : vector<8x16xf32>
    %31 = arith.addf %29, %30 : vector<8x16xf32>
    %32 = math.tanh %31 : vector<8x16xf32>
    %33 = arith.mulf %27, %32 : vector<8x16xf32>
    %34 = tpu.concatenate %33, %7 in 1 : vector<8x16xf32>, vector<8x32xf32> -> vector<8x48xf32>
    %cst_17 = arith.constant dense<0.000000e+00> : vector<8x24xf32>
    %35 = tpu.matmul %34, %1, %cst_17 {dimension_numbers = #tpu.dot_dimension_numbers<[1], [0], [0], [1], [0, 0, 1, 1], [], []>} : vector<8x48xf32>, vector<48x24xf32>, vector<8x24xf32> -> vector<8x24xf32>
    %36 = vector.broadcast %2 : vector<1x24xf32> to vector<8x24xf32>
    %37 = arith.addf %35, %36 : vector<8x24xf32>
    %38 = vector.extract_strided_slice %37 {offsets = [0, 0], sizes = [8, 8], strides = [1, 1]} : vector<8x24xf32> to vector<8x8xf32>
    %39 = math.exp %38 : vector<8x8xf32>
    %40 = vector.extract_strided_slice %37 {offsets = [0, 8], sizes = [8, 16], strides = [1, 1]} : vector<8x24xf32> to vector<8x16xf32>
    %cst_18 = arith.constant 0.000000e+00 : f32
    %41 = vector.broadcast %cst_18 : f32 to vector<8x16xf32>
    %42 = arith.maximumf %40, %41 : vector<8x16xf32>
    %cst_19 = arith.constant dense<0.000000e+00> : vector<8x128xf32>
    %43 = tpu.matmul %39, %3, %cst_19 {dimension_numbers = #tpu.dot_dimension_numbers<[1], [0], [0], [1], [0, 0, 1, 1], [], []>} : vector<8x8xf32>, vector<8x128xf32>, vector<8x128xf32> -> vector<8x128xf32>
    %cst_20 = arith.constant dense<0.000000e+00> : vector<8xf32>
    %44 = vector.multi_reduction <add>, %39, %cst_20 [1] : vector<8x8xf32> to vector<8xf32>
    %45 = vector.shape_cast %44 : vector<8xf32> to vector<8x1xf32>
    %46 = tpu.reciprocal %45 {approx = true} : vector<8x1xf32> -> vector<8x1xf32>
    %47 = arith.mulf %45, %46 : vector<8x1xf32>
    %cst_21 = arith.constant 2.000000e+00 : f32
    %48 = vector.broadcast %cst_21 : f32 to vector<8x1xf32>
    %49 = arith.subf %48, %47 : vector<8x1xf32>
    %50 = arith.mulf %46, %49 : vector<8x1xf32>
    %51 = vector.broadcast %50 : vector<8x1xf32> to vector<8x8xf32>
    %52 = arith.mulf %39, %51 : vector<8x8xf32>
    %53 = vector.broadcast %50 : vector<8x1xf32> to vector<8x128xf32>
    %54 = arith.mulf %53, %43 : vector<8x128xf32>
    %55 = arith.addf %16, %54 : vector<8x128xf32>
    %56 = tpu.concatenate %33, %42 in 1 : vector<8x16xf32>, vector<8x16xf32> -> vector<8x32xf32>
    %cst_22 = arith.constant 5.000000e-01 : f32
    %57 = vector.broadcast %cst_22 : f32 to vector<8x128xf32>
    %58 = arith.mulf %57, %55 : vector<8x128xf32>
    %59 = math.tanh %58 : vector<8x128xf32>
    %60 = vector.extract_strided_slice %59 {offsets = [0, 0], sizes = [8, 96], strides = [1, 1]} : vector<8x128xf32> to vector<8x96xf32>
    %cst_23 = arith.constant 1.000000e+00 : f32
    %61 = vector.broadcast %cst_23 : f32 to vector<8x96xf32>
    %62 = arith.addf %60, %61 : vector<8x96xf32>
    %cst_24 = arith.constant 5.000000e-01 : f32
    %63 = vector.broadcast %cst_24 : f32 to vector<8x96xf32>
    %64 = arith.mulf %63, %62 : vector<8x96xf32>
    %65 = vector.extract_strided_slice %64 {offsets = [0, 0], sizes = [8, 32], strides = [1, 1]} : vector<8x96xf32> to vector<8x32xf32>
    %66 = vector.extract_strided_slice %64 {offsets = [0, 32], sizes = [8, 32], strides = [1, 1]} : vector<8x96xf32> to vector<8x32xf32>
    %67 = vector.extract_strided_slice %64 {offsets = [0, 64], sizes = [8, 32], strides = [1, 1]} : vector<8x96xf32> to vector<8x32xf32>
    %68 = vector.extract_strided_slice %59 {offsets = [0, 96], sizes = [8, 32], strides = [1, 1]} : vector<8x128xf32> to vector<8x32xf32>
    %69 = arith.mulf %66, %56 : vector<8x32xf32>
    %70 = arith.mulf %65, %68 : vector<8x32xf32>
    %71 = arith.addf %69, %70 : vector<8x32xf32>
    %72 = math.tanh %71 : vector<8x32xf32>
    %73 = arith.mulf %67, %72 : vector<8x32xf32>
    %cst_25 = arith.constant dense<0.000000e+00> : vector<8x8xf32>
    %74 = tpu.matmul %73, %4, %cst_25 {dimension_numbers = #tpu.dot_dimension_numbers<[1], [0], [0], [1], [0, 0, 1, 1], [], []>} : vector<8x32xf32>, vector<32x8xf32>, vector<8x8xf32> -> vector<8x8xf32>
    %75 = vector.broadcast %5 : vector<1x8xf32> to vector<8x8xf32>
    %76 = arith.addf %74, %75 : vector<8x8xf32>
    %77 = math.exp %76 : vector<8x8xf32>
    %cst_26 = arith.constant dense<0.000000e+00> : vector<8xf32>
    %78 = vector.multi_reduction <add>, %77, %cst_26 [1] : vector<8x8xf32> to vector<8xf32>
    %79 = vector.shape_cast %78 : vector<8xf32> to vector<8x1xf32>
    %80 = tpu.reciprocal %79 {approx = true} : vector<8x1xf32> -> vector<8x1xf32>
    %81 = arith.mulf %79, %80 : vector<8x1xf32>
    %cst_27 = arith.constant 2.000000e+00 : f32
    %82 = vector.broadcast %cst_27 : f32 to vector<8x1xf32>
    %83 = arith.subf %82, %81 : vector<8x1xf32>
    %84 = arith.mulf %80, %83 : vector<8x1xf32>
    %85 = vector.broadcast %84 : vector<8x1xf32> to vector<8x8xf32>
    %86 = arith.mulf %77, %85 : vector<8x8xf32>
    %87 = tpu.concatenate %52, %86 in 1 : vector<8x8xf32>, vector<8x8xf32> -> vector<8x16xf32>
    %c0_28 = arith.constant 0 : index
    %c0_29 = arith.constant 0 : index
    %c0_30 = arith.constant 0 : index
    %88 = vector.load %arg3[%c0_28, %c0_29, %c0_30] : memref<12x8x16xf32, #tpu.memory_space<vmem>>, vector<1x8x16xf32>
    %89 = vector.shape_cast %88 : vector<1x8x16xf32> to vector<8x16xf32>
    %90 = vector.shape_cast %87 : vector<8x16xf32> to vector<1x8x16xf32>
    tpu.vector_store %arg3[%c0_28, %c0_29, %c0_30], %90 {strides = array<i32>} : memref<12x8x16xf32, #tpu.memory_space<vmem>>, vector<1x8x16xf32>,
    %91 = tpu.concatenate %52, %33, %86, %71, %12 in 1 : vector<8x8xf32>, vector<8x16xf32>, vector<8x8xf32>, vector<8x32xf32>, vector<8x8xf32> -> vector<8x72xf32>
    %cst_31 = arith.constant dense<0.000000e+00> : vector<8x256xf32>
    %92 = tpu.matmul %91, %0, %cst_31 {dimension_numbers = #tpu.dot_dimension_numbers<[1], [0], [0], [1], [0, 0, 1, 1], [], []>} : vector<8x72xf32>, vector<72x256xf32>, vector<8x256xf32> -> vector<8x256xf32>
    %93 = vector.extract_strided_slice %92 {offsets = [0, 0], sizes = [8, 64], strides = [1, 1]} : vector<8x256xf32> to vector<8x64xf32>
    %94 = vector.extract_strided_slice %92 {offsets = [0, 128], sizes = [8, 128], strides = [1, 1]} : vector<8x256xf32> to vector<8x128xf32>
    %cst_32 = arith.constant 5.000000e-01 : f32
    %95 = vector.broadcast %cst_32 : f32 to vector<8x64xf32>
    %96 = arith.mulf %95, %93 : vector<8x64xf32>
    %97 = math.tanh %96 : vector<8x64xf32>
    %98 = vector.extract_strided_slice %97 {offsets = [0, 0], sizes = [8, 48], strides = [1, 1]} : vector<8x64xf32> to vector<8x48xf32>
    %cst_33 = arith.constant 1.000000e+00 : f32
    %99 = vector.broadcast %cst_33 : f32 to vector<8x48xf32>
    %100 = arith.addf %98, %99 : vector<8x48xf32>
    %cst_34 = arith.constant 5.000000e-01 : f32
    %101 = vector.broadcast %cst_34 : f32 to vector<8x48xf32>
    %102 = arith.mulf %101, %100 : vector<8x48xf32>
    %103 = vector.extract_strided_slice %102 {offsets = [0, 0], sizes = [8, 16], strides = [1, 1]} : vector<8x48xf32> to vector<8x16xf32>
    %104 = vector.extract_strided_slice %102 {offsets = [0, 16], sizes = [8, 16], strides = [1, 1]} : vector<8x48xf32> to vector<8x16xf32>
    %105 = vector.extract_strided_slice %102 {offsets = [0, 32], sizes = [8, 16], strides = [1, 1]} : vector<8x48xf32> to vector<8x16xf32>
    %106 = vector.extract_strided_slice %97 {offsets = [0, 48], sizes = [8, 16], strides = [1, 1]} : vector<8x64xf32> to vector<8x16xf32>
    %107 = arith.mulf %104, %31 : vector<8x16xf32>
    %108 = arith.mulf %103, %106 : vector<8x16xf32>
    %109 = arith.addf %107, %108 : vector<8x16xf32>
    %110 = math.tanh %109 : vector<8x16xf32>
    %111 = arith.mulf %105, %110 : vector<8x16xf32>
    %112 = tpu.concatenate %111, %73 in 1 : vector<8x16xf32>, vector<8x32xf32> -> vector<8x48xf32>
    %cst_35 = arith.constant dense<0.000000e+00> : vector<8x24xf32>
    %113 = tpu.matmul %112, %1, %cst_35 {dimension_numbers = #tpu.dot_dimension_numbers<[1], [0], [0], [1], [0, 0, 1, 1], [], []>} : vector<8x48xf32>, vector<48x24xf32>, vector<8x24xf32> -> vector<8x24xf32>
    %114 = vector.broadcast %2 : vector<1x24xf32> to vector<8x24xf32>
    %115 = arith.addf %113, %114 : vector<8x24xf32>
    %116 = vector.extract_strided_slice %115 {offsets = [0, 0], sizes = [8, 8], strides = [1, 1]} : vector<8x24xf32> to vector<8x8xf32>
    %117 = math.exp %116 : vector<8x8xf32>
    %118 = vector.extract_strided_slice %115 {offsets = [0, 8], sizes = [8, 16], strides = [1, 1]} : vector<8x24xf32> to vector<8x16xf32>
    %cst_36 = arith.constant 0.000000e+00 : f32
    %119 = vector.broadcast %cst_36 : f32 to vector<8x16xf32>
    %120 = arith.maximumf %118, %119 : vector<8x16xf32>
    %cst_37 = arith.constant dense<0.000000e+00> : vector<8x128xf32>
    %121 = tpu.matmul %117, %3, %cst_37 {dimension_numbers = #tpu.dot_dimension_numbers<[1], [0], [0], [1], [0, 0, 1, 1], [], []>} : vector<8x8xf32>, vector<8x128xf32>, vector<8x128xf32> -> vector<8x128xf32>
    %cst_38 = arith.constant dense<0.000000e+00> : vector<8xf32>
    %122 = vector.multi_reduction <add>, %117, %cst_38 [1] : vector<8x8xf32> to vector<8xf32>
    %123 = vector.shape_cast %122 : vector<8xf32> to vector<8x1xf32>
    %124 = tpu.reciprocal %123 {approx = true} : vector<8x1xf32> -> vector<8x1xf32>
    %125 = arith.mulf %123, %124 : vector<8x1xf32>
    %cst_39 = arith.constant 2.000000e+00 : f32
    %126 = vector.broadcast %cst_39 : f32 to vector<8x1xf32>
    %127 = arith.subf %126, %125 : vector<8x1xf32>
    %128 = arith.mulf %124, %127 : vector<8x1xf32>
    %129 = vector.broadcast %128 : vector<8x1xf32> to vector<8x8xf32>
    %130 = arith.mulf %117, %129 : vector<8x8xf32>
    %131 = vector.broadcast %128 : vector<8x1xf32> to vector<8x128xf32>
    %132 = arith.mulf %131, %121 : vector<8x128xf32>
    %133 = arith.addf %94, %132 : vector<8x128xf32>
    %134 = tpu.concatenate %111, %120 in 1 : vector<8x16xf32>, vector<8x16xf32> -> vector<8x32xf32>
    %cst_40 = arith.constant 5.000000e-01 : f32
    %135 = vector.broadcast %cst_40 : f32 to vector<8x128xf32>
    %136 = arith.mulf %135, %133 : vector<8x128xf32>
    %137 = math.tanh %136 : vector<8x128xf32>
    %138 = vector.extract_strided_slice %137 {offsets = [0, 0], sizes = [8, 96], strides = [1, 1]} : vector<8x128xf32> to vector<8x96xf32>
    %cst_41 = arith.constant 1.000000e+00 : f32
    %139 = vector.broadcast %cst_41 : f32 to vector<8x96xf32>
    %140 = arith.addf %138, %139 : vector<8x96xf32>
    %cst_42 = arith.constant 5.000000e-01 : f32
    %141 = vector.broadcast %cst_42 : f32 to vector<8x96xf32>
    %142 = arith.mulf %141, %140 : vector<8x96xf32>
    %143 = vector.extract_strided_slice %142 {offsets = [0, 0], sizes = [8, 32], strides = [1, 1]} : vector<8x96xf32> to vector<8x32xf32>
    %144 = vector.extract_strided_slice %142 {offsets = [0, 32], sizes = [8, 32], strides = [1, 1]} : vector<8x96xf32> to vector<8x32xf32>
    %145 = vector.extract_strided_slice %142 {offsets = [0, 64], sizes = [8, 32], strides = [1, 1]} : vector<8x96xf32> to vector<8x32xf32>
    %146 = vector.extract_strided_slice %137 {offsets = [0, 96], sizes = [8, 32], strides = [1, 1]} : vector<8x128xf32> to vector<8x32xf32>
    %147 = arith.mulf %144, %134 : vector<8x32xf32>
    %148 = arith.mulf %143, %146 : vector<8x32xf32>
    %149 = arith.addf %147, %148 : vector<8x32xf32>
    %150 = math.tanh %149 : vector<8x32xf32>
    %151 = arith.mulf %145, %150 : vector<8x32xf32>
    %cst_43 = arith.constant dense<0.000000e+00> : vector<8x8xf32>
    %152 = tpu.matmul %151, %4, %cst_43 {dimension_numbers = #tpu.dot_dimension_numbers<[1], [0], [0], [1], [0, 0, 1, 1], [], []>} : vector<8x32xf32>, vector<32x8xf32>, vector<8x8xf32> -> vector<8x8xf32>
    %153 = vector.broadcast %5 : vector<1x8xf32> to vector<8x8xf32>
    %154 = arith.addf %152, %153 : vector<8x8xf32>
    %155 = math.exp %154 : vector<8x8xf32>
    %cst_44 = arith.constant dense<0.000000e+00> : vector<8xf32>
    %156 = vector.multi_reduction <add>, %155, %cst_44 [1] : vector<8x8xf32> to vector<8xf32>
    %157 = vector.shape_cast %156 : vector<8xf32> to vector<8x1xf32>
    %158 = tpu.reciprocal %157 {approx = true} : vector<8x1xf32> -> vector<8x1xf32>
    %159 = arith.mulf %157, %158 : vector<8x1xf32>
    %cst_45 = arith.constant 2.000000e+00 : f32
    %160 = vector.broadcast %cst_45 : f32 to vector<8x1xf32>
    %161 = arith.subf %160, %159 : vector<8x1xf32>
    %162 = arith.mulf %158, %161 : vector<8x1xf32>
    %163 = vector.broadcast %162 : vector<8x1xf32> to vector<8x8xf32>
    %164 = arith.mulf %155, %163 : vector<8x8xf32>
    %165 = tpu.concatenate %130, %164 in 1 : vector<8x8xf32>, vector<8x8xf32> -> vector<8x16xf32>
    %c1 = arith.constant 1 : index
    %c0_46 = arith.constant 0 : index
    %c0_47 = arith.constant 0 : index
    %166 = vector.load %arg3[%c1, %c0_46, %c0_47] : memref<12x8x16xf32, #tpu.memory_space<vmem>>, vector<1x8x16xf32>
    %167 = vector.shape_cast %166 : vector<1x8x16xf32> to vector<8x16xf32>
    %168 = vector.shape_cast %165 : vector<8x16xf32> to vector<1x8x16xf32>
    tpu.vector_store %arg3[%c1, %c0_46, %c0_47], %168 {strides = array<i32>} : memref<12x8x16xf32, #tpu.memory_space<vmem>>, vector<1x8x16xf32>,
    %169 = tpu.concatenate %130, %111, %164, %149, %12 in 1 : vector<8x8xf32>, vector<8x16xf32>, vector<8x8xf32>, vector<8x32xf32>, vector<8x8xf32> -> vector<8x72xf32>
    %cst_48 = arith.constant dense<0.000000e+00> : vector<8x256xf32>
    %170 = tpu.matmul %169, %0, %cst_48 {dimension_numbers = #tpu.dot_dimension_numbers<[1], [0], [0], [1], [0, 0, 1, 1], [], []>} : vector<8x72xf32>, vector<72x256xf32>, vector<8x256xf32> -> vector<8x256xf32>
    %171 = vector.extract_strided_slice %170 {offsets = [0, 0], sizes = [8, 64], strides = [1, 1]} : vector<8x256xf32> to vector<8x64xf32>
    %172 = vector.extract_strided_slice %170 {offsets = [0, 128], sizes = [8, 128], strides = [1, 1]} : vector<8x256xf32> to vector<8x128xf32>
    %cst_49 = arith.constant 5.000000e-01 : f32
    %173 = vector.broadcast %cst_49 : f32 to vector<8x64xf32>
    %174 = arith.mulf %173, %171 : vector<8x64xf32>
    %175 = math.tanh %174 : vector<8x64xf32>
    %176 = vector.extract_strided_slice %175 {offsets = [0, 0], sizes = [8, 48], strides = [1, 1]} : vector<8x64xf32> to vector<8x48xf32>
    %cst_50 = arith.constant 1.000000e+00 : f32
    %177 = vector.broadcast %cst_50 : f32 to vector<8x48xf32>
    %178 = arith.addf %176, %177 : vector<8x48xf32>
    %cst_51 = arith.constant 5.000000e-01 : f32
    %179 = vector.broadcast %cst_51 : f32 to vector<8x48xf32>
    %180 = arith.mulf %179, %178 : vector<8x48xf32>
    %181 = vector.extract_strided_slice %180 {offsets = [0, 0], sizes = [8, 16], strides = [1, 1]} : vector<8x48xf32> to vector<8x16xf32>
    %182 = vector.extract_strided_slice %180 {offsets = [0, 16], sizes = [8, 16], strides = [1, 1]} : vector<8x48xf32> to vector<8x16xf32>
    %183 = vector.extract_strided_slice %180 {offsets = [0, 32], sizes = [8, 16], strides = [1, 1]} : vector<8x48xf32> to vector<8x16xf32>
    %184 = vector.extract_strided_slice %175 {offsets = [0, 48], sizes = [8, 16], strides = [1, 1]} : vector<8x64xf32> to vector<8x16xf32>
    %185 = arith.mulf %182, %109 : vector<8x16xf32>
    %186 = arith.mulf %181, %184 : vector<8x16xf32>
    %187 = arith.addf %185, %186 : vector<8x16xf32>
    %188 = math.tanh %187 : vector<8x16xf32>
    %189 = arith.mulf %183, %188 : vector<8x16xf32>
    %190 = tpu.concatenate %189, %151 in 1 : vector<8x16xf32>, vector<8x32xf32> -> vector<8x48xf32>
    %cst_52 = arith.constant dense<0.000000e+00> : vector<8x24xf32>
    %191 = tpu.matmul %190, %1, %cst_52 {dimension_numbers = #tpu.dot_dimension_numbers<[1], [0], [0], [1], [0, 0, 1, 1], [], []>} : vector<8x48xf32>, vector<48x24xf32>, vector<8x24xf32> -> vector<8x24xf32>
    %192 = vector.broadcast %2 : vector<1x24xf32> to vector<8x24xf32>
    %193 = arith.addf %191, %192 : vector<8x24xf32>
    %194 = vector.extract_strided_slice %193 {offsets = [0, 0], sizes = [8, 8], strides = [1, 1]} : vector<8x24xf32> to vector<8x8xf32>
    %195 = math.exp %194 : vector<8x8xf32>
    %196 = vector.extract_strided_slice %193 {offsets = [0, 8], sizes = [8, 16], strides = [1, 1]} : vector<8x24xf32> to vector<8x16xf32>
    %cst_53 = arith.constant 0.000000e+00 : f32
    %197 = vector.broadcast %cst_53 : f32 to vector<8x16xf32>
    %198 = arith.maximumf %196, %197 : vector<8x16xf32>
    %cst_54 = arith.constant dense<0.000000e+00> : vector<8x128xf32>
    %199 = tpu.matmul %195, %3, %cst_54 {dimension_numbers = #tpu.dot_dimension_numbers<[1], [0], [0], [1], [0, 0, 1, 1], [], []>} : vector<8x8xf32>, vector<8x128xf32>, vector<8x128xf32> -> vector<8x128xf32>
    %cst_55 = arith.constant dense<0.000000e+00> : vector<8xf32>
    %200 = vector.multi_reduction <add>, %195, %cst_55 [1] : vector<8x8xf32> to vector<8xf32>
    %201 = vector.shape_cast %200 : vector<8xf32> to vector<8x1xf32>
    %202 = tpu.reciprocal %201 {approx = true} : vector<8x1xf32> -> vector<8x1xf32>
    %203 = arith.mulf %201, %202 : vector<8x1xf32>
    %cst_56 = arith.constant 2.000000e+00 : f32
    %204 = vector.broadcast %cst_56 : f32 to vector<8x1xf32>
    %205 = arith.subf %204, %203 : vector<8x1xf32>
    %206 = arith.mulf %202, %205 : vector<8x1xf32>
    %207 = vector.broadcast %206 : vector<8x1xf32> to vector<8x8xf32>
    %208 = arith.mulf %195, %207 : vector<8x8xf32>
    %209 = vector.broadcast %206 : vector<8x1xf32> to vector<8x128xf32>
    %210 = arith.mulf %209, %199 : vector<8x128xf32>
    %211 = arith.addf %172, %210 : vector<8x128xf32>
    %212 = tpu.concatenate %189, %198 in 1 : vector<8x16xf32>, vector<8x16xf32> -> vector<8x32xf32>
    %cst_57 = arith.constant 5.000000e-01 : f32
    %213 = vector.broadcast %cst_57 : f32 to vector<8x128xf32>
    %214 = arith.mulf %213, %211 : vector<8x128xf32>
    %215 = math.tanh %214 : vector<8x128xf32>
    %216 = vector.extract_strided_slice %215 {offsets = [0, 0], sizes = [8, 96], strides = [1, 1]} : vector<8x128xf32> to vector<8x96xf32>
    %cst_58 = arith.constant 1.000000e+00 : f32
    %217 = vector.broadcast %cst_58 : f32 to vector<8x96xf32>
    %218 = arith.addf %216, %217 : vector<8x96xf32>
    %cst_59 = arith.constant 5.000000e-01 : f32
    %219 = vector.broadcast %cst_59 : f32 to vector<8x96xf32>
    %220 = arith.mulf %219, %218 : vector<8x96xf32>
    %221 = vector.extract_strided_slice %220 {offsets = [0, 0], sizes = [8, 32], strides = [1, 1]} : vector<8x96xf32> to vector<8x32xf32>
    %222 = vector.extract_strided_slice %220 {offsets = [0, 32], sizes = [8, 32], strides = [1, 1]} : vector<8x96xf32> to vector<8x32xf32>
    %223 = vector.extract_strided_slice %220 {offsets = [0, 64], sizes = [8, 32], strides = [1, 1]} : vector<8x96xf32> to vector<8x32xf32>
    %224 = vector.extract_strided_slice %215 {offsets = [0, 96], sizes = [8, 32], strides = [1, 1]} : vector<8x128xf32> to vector<8x32xf32>
    %225 = arith.mulf %222, %212 : vector<8x32xf32>
    %226 = arith.mulf %221, %224 : vector<8x32xf32>
    %227 = arith.addf %225, %226 : vector<8x32xf32>
    %228 = math.tanh %227 : vector<8x32xf32>
    %229 = arith.mulf %223, %228 : vector<8x32xf32>
    %cst_60 = arith.constant dense<0.000000e+00> : vector<8x8xf32>
    %230 = tpu.matmul %229, %4, %cst_60 {dimension_numbers = #tpu.dot_dimension_numbers<[1], [0], [0], [1], [0, 0, 1, 1], [], []>} : vector<8x32xf32>, vector<32x8xf32>, vector<8x8xf32> -> vector<8x8xf32>
    %231 = vector.broadcast %5 : vector<1x8xf32> to vector<8x8xf32>
    %232 = arith.addf %230, %231 : vector<8x8xf32>
    %233 = math.exp %232 : vector<8x8xf32>
    %cst_61 = arith.constant dense<0.000000e+00> : vector<8xf32>
    %234 = vector.multi_reduction <add>, %233, %cst_61 [1] : vector<8x8xf32> to vector<8xf32>
    %235 = vector.shape_cast %234 : vector<8xf32> to vector<8x1xf32>
    %236 = tpu.reciprocal %235 {approx = true} : vector<8x1xf32> -> vector<8x1xf32>
    %237 = arith.mulf %235, %236 : vector<8x1xf32>
    %cst_62 = arith.constant 2.000000e+00 : f32
    %238 = vector.broadcast %cst_62 : f32 to vector<8x1xf32>
    %239 = arith.subf %238, %237 : vector<8x1xf32>
    %240 = arith.mulf %236, %239 : vector<8x1xf32>
    %241 = vector.broadcast %240 : vector<8x1xf32> to vector<8x8xf32>
    %242 = arith.mulf %233, %241 : vector<8x8xf32>
    %243 = tpu.concatenate %208, %242 in 1 : vector<8x8xf32>, vector<8x8xf32> -> vector<8x16xf32>
    %c2 = arith.constant 2 : index
    %c0_63 = arith.constant 0 : index
    %c0_64 = arith.constant 0 : index
    %244 = vector.load %arg3[%c2, %c0_63, %c0_64] : memref<12x8x16xf32, #tpu.memory_space<vmem>>, vector<1x8x16xf32>
    %245 = vector.shape_cast %244 : vector<1x8x16xf32> to vector<8x16xf32>
    %246 = vector.shape_cast %243 : vector<8x16xf32> to vector<1x8x16xf32>
    tpu.vector_store %arg3[%c2, %c0_63, %c0_64], %246 {strides = array<i32>} : memref<12x8x16xf32, #tpu.memory_space<vmem>>, vector<1x8x16xf32>,
    %247 = tpu.concatenate %208, %189, %242, %227, %12 in 1 : vector<8x8xf32>, vector<8x16xf32>, vector<8x8xf32>, vector<8x32xf32>, vector<8x8xf32> -> vector<8x72xf32>
    %cst_65 = arith.constant dense<0.000000e+00> : vector<8x256xf32>
    %248 = tpu.matmul %247, %0, %cst_65 {dimension_numbers = #tpu.dot_dimension_numbers<[1], [0], [0], [1], [0, 0, 1, 1], [], []>} : vector<8x72xf32>, vector<72x256xf32>, vector<8x256xf32> -> vector<8x256xf32>
    %249 = vector.extract_strided_slice %248 {offsets = [0, 0], sizes = [8, 64], strides = [1, 1]} : vector<8x256xf32> to vector<8x64xf32>
    %250 = vector.extract_strided_slice %248 {offsets = [0, 128], sizes = [8, 128], strides = [1, 1]} : vector<8x256xf32> to vector<8x128xf32>
    %cst_66 = arith.constant 5.000000e-01 : f32
    %251 = vector.broadcast %cst_66 : f32 to vector<8x64xf32>
    %252 = arith.mulf %251, %249 : vector<8x64xf32>
    %253 = math.tanh %252 : vector<8x64xf32>
    %254 = vector.extract_strided_slice %253 {offsets = [0, 0], sizes = [8, 48], strides = [1, 1]} : vector<8x64xf32> to vector<8x48xf32>
    %cst_67 = arith.constant 1.000000e+00 : f32
    %255 = vector.broadcast %cst_67 : f32 to vector<8x48xf32>
    %256 = arith.addf %254, %255 : vector<8x48xf32>
    %cst_68 = arith.constant 5.000000e-01 : f32
    %257 = vector.broadcast %cst_68 : f32 to vector<8x48xf32>
    %258 = arith.mulf %257, %256 : vector<8x48xf32>
    %259 = vector.extract_strided_slice %258 {offsets = [0, 0], sizes = [8, 16], strides = [1, 1]} : vector<8x48xf32> to vector<8x16xf32>
    %260 = vector.extract_strided_slice %258 {offsets = [0, 16], sizes = [8, 16], strides = [1, 1]} : vector<8x48xf32> to vector<8x16xf32>
    %261 = vector.extract_strided_slice %258 {offsets = [0, 32], sizes = [8, 16], strides = [1, 1]} : vector<8x48xf32> to vector<8x16xf32>
    %262 = vector.extract_strided_slice %253 {offsets = [0, 48], sizes = [8, 16], strides = [1, 1]} : vector<8x64xf32> to vector<8x16xf32>
    %263 = arith.mulf %260, %187 : vector<8x16xf32>
    %264 = arith.mulf %259, %262 : vector<8x16xf32>
    %265 = arith.addf %263, %264 : vector<8x16xf32>
    %266 = math.tanh %265 : vector<8x16xf32>
    %267 = arith.mulf %261, %266 : vector<8x16xf32>
    %268 = tpu.concatenate %267, %229 in 1 : vector<8x16xf32>, vector<8x32xf32> -> vector<8x48xf32>
    %cst_69 = arith.constant dense<0.000000e+00> : vector<8x24xf32>
    %269 = tpu.matmul %268, %1, %cst_69 {dimension_numbers = #tpu.dot_dimension_numbers<[1], [0], [0], [1], [0, 0, 1, 1], [], []>} : vector<8x48xf32>, vector<48x24xf32>, vector<8x24xf32> -> vector<8x24xf32>
    %270 = vector.broadcast %2 : vector<1x24xf32> to vector<8x24xf32>
    %271 = arith.addf %269, %270 : vector<8x24xf32>
    %272 = vector.extract_strided_slice %271 {offsets = [0, 0], sizes = [8, 8], strides = [1, 1]} : vector<8x24xf32> to vector<8x8xf32>
    %273 = math.exp %272 : vector<8x8xf32>
    %274 = vector.extract_strided_slice %271 {offsets = [0, 8], sizes = [8, 16], strides = [1, 1]} : vector<8x24xf32> to vector<8x16xf32>
    %cst_70 = arith.constant 0.000000e+00 : f32
    %275 = vector.broadcast %cst_70 : f32 to vector<8x16xf32>
    %276 = arith.maximumf %274, %275 : vector<8x16xf32>
    %cst_71 = arith.constant dense<0.000000e+00> : vector<8x128xf32>
    %277 = tpu.matmul %273, %3, %cst_71 {dimension_numbers = #tpu.dot_dimension_numbers<[1], [0], [0], [1], [0, 0, 1, 1], [], []>} : vector<8x8xf32>, vector<8x128xf32>, vector<8x128xf32> -> vector<8x128xf32>
    %cst_72 = arith.constant dense<0.000000e+00> : vector<8xf32>
    %278 = vector.multi_reduction <add>, %273, %cst_72 [1] : vector<8x8xf32> to vector<8xf32>
    %279 = vector.shape_cast %278 : vector<8xf32> to vector<8x1xf32>
    %280 = tpu.reciprocal %279 {approx = true} : vector<8x1xf32> -> vector<8x1xf32>
    %281 = arith.mulf %279, %280 : vector<8x1xf32>
    %cst_73 = arith.constant 2.000000e+00 : f32
    %282 = vector.broadcast %cst_73 : f32 to vector<8x1xf32>
    %283 = arith.subf %282, %281 : vector<8x1xf32>
    %284 = arith.mulf %280, %283 : vector<8x1xf32>
    %285 = vector.broadcast %284 : vector<8x1xf32> to vector<8x8xf32>
    %286 = arith.mulf %273, %285 : vector<8x8xf32>
    %287 = vector.broadcast %284 : vector<8x1xf32> to vector<8x128xf32>
    %288 = arith.mulf %287, %277 : vector<8x128xf32>
    %289 = arith.addf %250, %288 : vector<8x128xf32>
    %290 = tpu.concatenate %267, %276 in 1 : vector<8x16xf32>, vector<8x16xf32> -> vector<8x32xf32>
    %cst_74 = arith.constant 5.000000e-01 : f32
    %291 = vector.broadcast %cst_74 : f32 to vector<8x128xf32>
    %292 = arith.mulf %291, %289 : vector<8x128xf32>
    %293 = math.tanh %292 : vector<8x128xf32>
    %294 = vector.extract_strided_slice %293 {offsets = [0, 0], sizes = [8, 96], strides = [1, 1]} : vector<8x128xf32> to vector<8x96xf32>
    %cst_75 = arith.constant 1.000000e+00 : f32
    %295 = vector.broadcast %cst_75 : f32 to vector<8x96xf32>
    %296 = arith.addf %294, %295 : vector<8x96xf32>
    %cst_76 = arith.constant 5.000000e-01 : f32
    %297 = vector.broadcast %cst_76 : f32 to vector<8x96xf32>
    %298 = arith.mulf %297, %296 : vector<8x96xf32>
    %299 = vector.extract_strided_slice %298 {offsets = [0, 0], sizes = [8, 32], strides = [1, 1]} : vector<8x96xf32> to vector<8x32xf32>
    %300 = vector.extract_strided_slice %298 {offsets = [0, 32], sizes = [8, 32], strides = [1, 1]} : vector<8x96xf32> to vector<8x32xf32>
    %301 = vector.extract_strided_slice %298 {offsets = [0, 64], sizes = [8, 32], strides = [1, 1]} : vector<8x96xf32> to vector<8x32xf32>
    %302 = vector.extract_strided_slice %293 {offsets = [0, 96], sizes = [8, 32], strides = [1, 1]} : vector<8x128xf32> to vector<8x32xf32>
    %303 = arith.mulf %300, %290 : vector<8x32xf32>
    %304 = arith.mulf %299, %302 : vector<8x32xf32>
    %305 = arith.addf %303, %304 : vector<8x32xf32>
    %306 = math.tanh %305 : vector<8x32xf32>
    %307 = arith.mulf %301, %306 : vector<8x32xf32>
    %cst_77 = arith.constant dense<0.000000e+00> : vector<8x8xf32>
    %308 = tpu.matmul %307, %4, %cst_77 {dimension_numbers = #tpu.dot_dimension_numbers<[1], [0], [0], [1], [0, 0, 1, 1], [], []>} : vector<8x32xf32>, vector<32x8xf32>, vector<8x8xf32> -> vector<8x8xf32>
    %309 = vector.broadcast %5 : vector<1x8xf32> to vector<8x8xf32>
    %310 = arith.addf %308, %309 : vector<8x8xf32>
    %311 = math.exp %310 : vector<8x8xf32>
    %cst_78 = arith.constant dense<0.000000e+00> : vector<8xf32>
    %312 = vector.multi_reduction <add>, %311, %cst_78 [1] : vector<8x8xf32> to vector<8xf32>
    %313 = vector.shape_cast %312 : vector<8xf32> to vector<8x1xf32>
    %314 = tpu.reciprocal %313 {approx = true} : vector<8x1xf32> -> vector<8x1xf32>
    %315 = arith.mulf %313, %314 : vector<8x1xf32>
    %cst_79 = arith.constant 2.000000e+00 : f32
    %316 = vector.broadcast %cst_79 : f32 to vector<8x1xf32>
    %317 = arith.subf %316, %315 : vector<8x1xf32>
    %318 = arith.mulf %314, %317 : vector<8x1xf32>
    %319 = vector.broadcast %318 : vector<8x1xf32> to vector<8x8xf32>
    %320 = arith.mulf %311, %319 : vector<8x8xf32>
    %321 = tpu.concatenate %286, %320 in 1 : vector<8x8xf32>, vector<8x8xf32> -> vector<8x16xf32>
    %c3 = arith.constant 3 : index
    %c0_80 = arith.constant 0 : index
    %c0_81 = arith.constant 0 : index
    %322 = vector.load %arg3[%c3, %c0_80, %c0_81] : memref<12x8x16xf32, #tpu.memory_space<vmem>>, vector<1x8x16xf32>
    %323 = vector.shape_cast %322 : vector<1x8x16xf32> to vector<8x16xf32>
    %324 = vector.shape_cast %321 : vector<8x16xf32> to vector<1x8x16xf32>
    tpu.vector_store %arg3[%c3, %c0_80, %c0_81], %324 {strides = array<i32>} : memref<12x8x16xf32, #tpu.memory_space<vmem>>, vector<1x8x16xf32>,
    %325 = tpu.concatenate %286, %267, %320, %305, %12 in 1 : vector<8x8xf32>, vector<8x16xf32>, vector<8x8xf32>, vector<8x32xf32>, vector<8x8xf32> -> vector<8x72xf32>
    %cst_82 = arith.constant dense<0.000000e+00> : vector<8x256xf32>
    %326 = tpu.matmul %325, %0, %cst_82 {dimension_numbers = #tpu.dot_dimension_numbers<[1], [0], [0], [1], [0, 0, 1, 1], [], []>} : vector<8x72xf32>, vector<72x256xf32>, vector<8x256xf32> -> vector<8x256xf32>
    %327 = vector.extract_strided_slice %326 {offsets = [0, 0], sizes = [8, 64], strides = [1, 1]} : vector<8x256xf32> to vector<8x64xf32>
    %328 = vector.extract_strided_slice %326 {offsets = [0, 128], sizes = [8, 128], strides = [1, 1]} : vector<8x256xf32> to vector<8x128xf32>
    %cst_83 = arith.constant 5.000000e-01 : f32
    %329 = vector.broadcast %cst_83 : f32 to vector<8x64xf32>
    %330 = arith.mulf %329, %327 : vector<8x64xf32>
    %331 = math.tanh %330 : vector<8x64xf32>
    %332 = vector.extract_strided_slice %331 {offsets = [0, 0], sizes = [8, 48], strides = [1, 1]} : vector<8x64xf32> to vector<8x48xf32>
    %cst_84 = arith.constant 1.000000e+00 : f32
    %333 = vector.broadcast %cst_84 : f32 to vector<8x48xf32>
    %334 = arith.addf %332, %333 : vector<8x48xf32>
    %cst_85 = arith.constant 5.000000e-01 : f32
    %335 = vector.broadcast %cst_85 : f32 to vector<8x48xf32>
    %336 = arith.mulf %335, %334 : vector<8x48xf32>
    %337 = vector.extract_strided_slice %336 {offsets = [0, 0], sizes = [8, 16], strides = [1, 1]} : vector<8x48xf32> to vector<8x16xf32>
    %338 = vector.extract_strided_slice %336 {offsets = [0, 16], sizes = [8, 16], strides = [1, 1]} : vector<8x48xf32> to vector<8x16xf32>
    %339 = vector.extract_strided_slice %336 {offsets = [0, 32], sizes = [8, 16], strides = [1, 1]} : vector<8x48xf32> to vector<8x16xf32>
    %340 = vector.extract_strided_slice %331 {offsets = [0, 48], sizes = [8, 16], strides = [1, 1]} : vector<8x64xf32> to vector<8x16xf32>
    %341 = arith.mulf %338, %265 : vector<8x16xf32>
    %342 = arith.mulf %337, %340 : vector<8x16xf32>
    %343 = arith.addf %341, %342 : vector<8x16xf32>
    %344 = math.tanh %343 : vector<8x16xf32>
    %345 = arith.mulf %339, %344 : vector<8x16xf32>
    %346 = tpu.concatenate %345, %307 in 1 : vector<8x16xf32>, vector<8x32xf32> -> vector<8x48xf32>
    %cst_86 = arith.constant dense<0.000000e+00> : vector<8x24xf32>
    %347 = tpu.matmul %346, %1, %cst_86 {dimension_numbers = #tpu.dot_dimension_numbers<[1], [0], [0], [1], [0, 0, 1, 1], [], []>} : vector<8x48xf32>, vector<48x24xf32>, vector<8x24xf32> -> vector<8x24xf32>
    %348 = vector.broadcast %2 : vector<1x24xf32> to vector<8x24xf32>
    %349 = arith.addf %347, %348 : vector<8x24xf32>
    %350 = vector.extract_strided_slice %349 {offsets = [0, 0], sizes = [8, 8], strides = [1, 1]} : vector<8x24xf32> to vector<8x8xf32>
    %351 = math.exp %350 : vector<8x8xf32>
    %352 = vector.extract_strided_slice %349 {offsets = [0, 8], sizes = [8, 16], strides = [1, 1]} : vector<8x24xf32> to vector<8x16xf32>
    %cst_87 = arith.constant 0.000000e+00 : f32
    %353 = vector.broadcast %cst_87 : f32 to vector<8x16xf32>
    %354 = arith.maximumf %352, %353 : vector<8x16xf32>
    %cst_88 = arith.constant dense<0.000000e+00> : vector<8x128xf32>
    %355 = tpu.matmul %351, %3, %cst_88 {dimension_numbers = #tpu.dot_dimension_numbers<[1], [0], [0], [1], [0, 0, 1, 1], [], []>} : vector<8x8xf32>, vector<8x128xf32>, vector<8x128xf32> -> vector<8x128xf32>
    %cst_89 = arith.constant dense<0.000000e+00> : vector<8xf32>
    %356 = vector.multi_reduction <add>, %351, %cst_89 [1] : vector<8x8xf32> to vector<8xf32>
    %357 = vector.shape_cast %356 : vector<8xf32> to vector<8x1xf32>
    %358 = tpu.reciprocal %357 {approx = true} : vector<8x1xf32> -> vector<8x1xf32>
    %359 = arith.mulf %357, %358 : vector<8x1xf32>
    %cst_90 = arith.constant 2.000000e+00 : f32
    %360 = vector.broadcast %cst_90 : f32 to vector<8x1xf32>
    %361 = arith.subf %360, %359 : vector<8x1xf32>
    %362 = arith.mulf %358, %361 : vector<8x1xf32>
    %363 = vector.broadcast %362 : vector<8x1xf32> to vector<8x8xf32>
    %364 = arith.mulf %351, %363 : vector<8x8xf32>
    %365 = vector.broadcast %362 : vector<8x1xf32> to vector<8x128xf32>
    %366 = arith.mulf %365, %355 : vector<8x128xf32>
    %367 = arith.addf %328, %366 : vector<8x128xf32>
    %368 = tpu.concatenate %345, %354 in 1 : vector<8x16xf32>, vector<8x16xf32> -> vector<8x32xf32>
    %cst_91 = arith.constant 5.000000e-01 : f32
    %369 = vector.broadcast %cst_91 : f32 to vector<8x128xf32>
    %370 = arith.mulf %369, %367 : vector<8x128xf32>
    %371 = math.tanh %370 : vector<8x128xf32>
    %372 = vector.extract_strided_slice %371 {offsets = [0, 0], sizes = [8, 96], strides = [1, 1]} : vector<8x128xf32> to vector<8x96xf32>
    %cst_92 = arith.constant 1.000000e+00 : f32
    %373 = vector.broadcast %cst_92 : f32 to vector<8x96xf32>
    %374 = arith.addf %372, %373 : vector<8x96xf32>
    %cst_93 = arith.constant 5.000000e-01 : f32
    %375 = vector.broadcast %cst_93 : f32 to vector<8x96xf32>
    %376 = arith.mulf %375, %374 : vector<8x96xf32>
    %377 = vector.extract_strided_slice %376 {offsets = [0, 0], sizes = [8, 32], strides = [1, 1]} : vector<8x96xf32> to vector<8x32xf32>
    %378 = vector.extract_strided_slice %376 {offsets = [0, 32], sizes = [8, 32], strides = [1, 1]} : vector<8x96xf32> to vector<8x32xf32>
    %379 = vector.extract_strided_slice %376 {offsets = [0, 64], sizes = [8, 32], strides = [1, 1]} : vector<8x96xf32> to vector<8x32xf32>
    %380 = vector.extract_strided_slice %371 {offsets = [0, 96], sizes = [8, 32], strides = [1, 1]} : vector<8x128xf32> to vector<8x32xf32>
    %381 = arith.mulf %378, %368 : vector<8x32xf32>
    %382 = arith.mulf %377, %380 : vector<8x32xf32>
    %383 = arith.addf %381, %382 : vector<8x32xf32>
    %384 = math.tanh %383 : vector<8x32xf32>
    %385 = arith.mulf %379, %384 : vector<8x32xf32>
    %cst_94 = arith.constant dense<0.000000e+00> : vector<8x8xf32>
    %386 = tpu.matmul %385, %4, %cst_94 {dimension_numbers = #tpu.dot_dimension_numbers<[1], [0], [0], [1], [0, 0, 1, 1], [], []>} : vector<8x32xf32>, vector<32x8xf32>, vector<8x8xf32> -> vector<8x8xf32>
    %387 = vector.broadcast %5 : vector<1x8xf32> to vector<8x8xf32>
    %388 = arith.addf %386, %387 : vector<8x8xf32>
    %389 = math.exp %388 : vector<8x8xf32>
    %cst_95 = arith.constant dense<0.000000e+00> : vector<8xf32>
    %390 = vector.multi_reduction <add>, %389, %cst_95 [1] : vector<8x8xf32> to vector<8xf32>
    %391 = vector.shape_cast %390 : vector<8xf32> to vector<8x1xf32>
    %392 = tpu.reciprocal %391 {approx = true} : vector<8x1xf32> -> vector<8x1xf32>
    %393 = arith.mulf %391, %392 : vector<8x1xf32>
    %cst_96 = arith.constant 2.000000e+00 : f32
    %394 = vector.broadcast %cst_96 : f32 to vector<8x1xf32>
    %395 = arith.subf %394, %393 : vector<8x1xf32>
    %396 = arith.mulf %392, %395 : vector<8x1xf32>
    %397 = vector.broadcast %396 : vector<8x1xf32> to vector<8x8xf32>
    %398 = arith.mulf %389, %397 : vector<8x8xf32>
    %399 = tpu.concatenate %364, %398 in 1 : vector<8x8xf32>, vector<8x8xf32> -> vector<8x16xf32>
    %c4 = arith.constant 4 : index
    %c0_97 = arith.constant 0 : index
    %c0_98 = arith.constant 0 : index
    %400 = vector.load %arg3[%c4, %c0_97, %c0_98] : memref<12x8x16xf32, #tpu.memory_space<vmem>>, vector<1x8x16xf32>
    %401 = vector.shape_cast %400 : vector<1x8x16xf32> to vector<8x16xf32>
    %402 = vector.shape_cast %399 : vector<8x16xf32> to vector<1x8x16xf32>
    tpu.vector_store %arg3[%c4, %c0_97, %c0_98], %402 {strides = array<i32>} : memref<12x8x16xf32, #tpu.memory_space<vmem>>, vector<1x8x16xf32>,
    %403 = tpu.concatenate %364, %345, %398, %383, %12 in 1 : vector<8x8xf32>, vector<8x16xf32>, vector<8x8xf32>, vector<8x32xf32>, vector<8x8xf32> -> vector<8x72xf32>
    %cst_99 = arith.constant dense<0.000000e+00> : vector<8x256xf32>
    %404 = tpu.matmul %403, %0, %cst_99 {dimension_numbers = #tpu.dot_dimension_numbers<[1], [0], [0], [1], [0, 0, 1, 1], [], []>} : vector<8x72xf32>, vector<72x256xf32>, vector<8x256xf32> -> vector<8x256xf32>
    %405 = vector.extract_strided_slice %404 {offsets = [0, 0], sizes = [8, 64], strides = [1, 1]} : vector<8x256xf32> to vector<8x64xf32>
    %406 = vector.extract_strided_slice %404 {offsets = [0, 128], sizes = [8, 128], strides = [1, 1]} : vector<8x256xf32> to vector<8x128xf32>
    %cst_100 = arith.constant 5.000000e-01 : f32
    %407 = vector.broadcast %cst_100 : f32 to vector<8x64xf32>
    %408 = arith.mulf %407, %405 : vector<8x64xf32>
    %409 = math.tanh %408 : vector<8x64xf32>
    %410 = vector.extract_strided_slice %409 {offsets = [0, 0], sizes = [8, 48], strides = [1, 1]} : vector<8x64xf32> to vector<8x48xf32>
    %cst_101 = arith.constant 1.000000e+00 : f32
    %411 = vector.broadcast %cst_101 : f32 to vector<8x48xf32>
    %412 = arith.addf %410, %411 : vector<8x48xf32>
    %cst_102 = arith.constant 5.000000e-01 : f32
    %413 = vector.broadcast %cst_102 : f32 to vector<8x48xf32>
    %414 = arith.mulf %413, %412 : vector<8x48xf32>
    %415 = vector.extract_strided_slice %414 {offsets = [0, 0], sizes = [8, 16], strides = [1, 1]} : vector<8x48xf32> to vector<8x16xf32>
    %416 = vector.extract_strided_slice %414 {offsets = [0, 16], sizes = [8, 16], strides = [1, 1]} : vector<8x48xf32> to vector<8x16xf32>
    %417 = vector.extract_strided_slice %414 {offsets = [0, 32], sizes = [8, 16], strides = [1, 1]} : vector<8x48xf32> to vector<8x16xf32>
    %418 = vector.extract_strided_slice %409 {offsets = [0, 48], sizes = [8, 16], strides = [1, 1]} : vector<8x64xf32> to vector<8x16xf32>
    %419 = arith.mulf %416, %343 : vector<8x16xf32>
    %420 = arith.mulf %415, %418 : vector<8x16xf32>
    %421 = arith.addf %419, %420 : vector<8x16xf32>
    %422 = math.tanh %421 : vector<8x16xf32>
    %423 = arith.mulf %417, %422 : vector<8x16xf32>
    %424 = tpu.concatenate %423, %385 in 1 : vector<8x16xf32>, vector<8x32xf32> -> vector<8x48xf32>
    %cst_103 = arith.constant dense<0.000000e+00> : vector<8x24xf32>
    %425 = tpu.matmul %424, %1, %cst_103 {dimension_numbers = #tpu.dot_dimension_numbers<[1], [0], [0], [1], [0, 0, 1, 1], [], []>} : vector<8x48xf32>, vector<48x24xf32>, vector<8x24xf32> -> vector<8x24xf32>
    %426 = vector.broadcast %2 : vector<1x24xf32> to vector<8x24xf32>
    %427 = arith.addf %425, %426 : vector<8x24xf32>
    %428 = vector.extract_strided_slice %427 {offsets = [0, 0], sizes = [8, 8], strides = [1, 1]} : vector<8x24xf32> to vector<8x8xf32>
    %429 = math.exp %428 : vector<8x8xf32>
    %430 = vector.extract_strided_slice %427 {offsets = [0, 8], sizes = [8, 16], strides = [1, 1]} : vector<8x24xf32> to vector<8x16xf32>
    %cst_104 = arith.constant 0.000000e+00 : f32
    %431 = vector.broadcast %cst_104 : f32 to vector<8x16xf32>
    %432 = arith.maximumf %430, %431 : vector<8x16xf32>
    %cst_105 = arith.constant dense<0.000000e+00> : vector<8x128xf32>
    %433 = tpu.matmul %429, %3, %cst_105 {dimension_numbers = #tpu.dot_dimension_numbers<[1], [0], [0], [1], [0, 0, 1, 1], [], []>} : vector<8x8xf32>, vector<8x128xf32>, vector<8x128xf32> -> vector<8x128xf32>
    %cst_106 = arith.constant dense<0.000000e+00> : vector<8xf32>
    %434 = vector.multi_reduction <add>, %429, %cst_106 [1] : vector<8x8xf32> to vector<8xf32>
    %435 = vector.shape_cast %434 : vector<8xf32> to vector<8x1xf32>
    %436 = tpu.reciprocal %435 {approx = true} : vector<8x1xf32> -> vector<8x1xf32>
    %437 = arith.mulf %435, %436 : vector<8x1xf32>
    %cst_107 = arith.constant 2.000000e+00 : f32
    %438 = vector.broadcast %cst_107 : f32 to vector<8x1xf32>
    %439 = arith.subf %438, %437 : vector<8x1xf32>
    %440 = arith.mulf %436, %439 : vector<8x1xf32>
    %441 = vector.broadcast %440 : vector<8x1xf32> to vector<8x8xf32>
    %442 = arith.mulf %429, %441 : vector<8x8xf32>
    %443 = vector.broadcast %440 : vector<8x1xf32> to vector<8x128xf32>
    %444 = arith.mulf %443, %433 : vector<8x128xf32>
    %445 = arith.addf %406, %444 : vector<8x128xf32>
    %446 = tpu.concatenate %423, %432 in 1 : vector<8x16xf32>, vector<8x16xf32> -> vector<8x32xf32>
    %cst_108 = arith.constant 5.000000e-01 : f32
    %447 = vector.broadcast %cst_108 : f32 to vector<8x128xf32>
    %448 = arith.mulf %447, %445 : vector<8x128xf32>
    %449 = math.tanh %448 : vector<8x128xf32>
    %450 = vector.extract_strided_slice %449 {offsets = [0, 0], sizes = [8, 96], strides = [1, 1]} : vector<8x128xf32> to vector<8x96xf32>
    %cst_109 = arith.constant 1.000000e+00 : f32
    %451 = vector.broadcast %cst_109 : f32 to vector<8x96xf32>
    %452 = arith.addf %450, %451 : vector<8x96xf32>
    %cst_110 = arith.constant 5.000000e-01 : f32
    %453 = vector.broadcast %cst_110 : f32 to vector<8x96xf32>
    %454 = arith.mulf %453, %452 : vector<8x96xf32>
    %455 = vector.extract_strided_slice %454 {offsets = [0, 0], sizes = [8, 32], strides = [1, 1]} : vector<8x96xf32> to vector<8x32xf32>
    %456 = vector.extract_strided_slice %454 {offsets = [0, 32], sizes = [8, 32], strides = [1, 1]} : vector<8x96xf32> to vector<8x32xf32>
    %457 = vector.extract_strided_slice %454 {offsets = [0, 64], sizes = [8, 32], strides = [1, 1]} : vector<8x96xf32> to vector<8x32xf32>
    %458 = vector.extract_strided_slice %449 {offsets = [0, 96], sizes = [8, 32], strides = [1, 1]} : vector<8x128xf32> to vector<8x32xf32>
    %459 = arith.mulf %456, %446 : vector<8x32xf32>
    %460 = arith.mulf %455, %458 : vector<8x32xf32>
    %461 = arith.addf %459, %460 : vector<8x32xf32>
    %462 = math.tanh %461 : vector<8x32xf32>
    %463 = arith.mulf %457, %462 : vector<8x32xf32>
    %cst_111 = arith.constant dense<0.000000e+00> : vector<8x8xf32>
    %464 = tpu.matmul %463, %4, %cst_111 {dimension_numbers = #tpu.dot_dimension_numbers<[1], [0], [0], [1], [0, 0, 1, 1], [], []>} : vector<8x32xf32>, vector<32x8xf32>, vector<8x8xf32> -> vector<8x8xf32>
    %465 = vector.broadcast %5 : vector<1x8xf32> to vector<8x8xf32>
    %466 = arith.addf %464, %465 : vector<8x8xf32>
    %467 = math.exp %466 : vector<8x8xf32>
    %cst_112 = arith.constant dense<0.000000e+00> : vector<8xf32>
    %468 = vector.multi_reduction <add>, %467, %cst_112 [1] : vector<8x8xf32> to vector<8xf32>
    %469 = vector.shape_cast %468 : vector<8xf32> to vector<8x1xf32>
    %470 = tpu.reciprocal %469 {approx = true} : vector<8x1xf32> -> vector<8x1xf32>
    %471 = arith.mulf %469, %470 : vector<8x1xf32>
    %cst_113 = arith.constant 2.000000e+00 : f32
    %472 = vector.broadcast %cst_113 : f32 to vector<8x1xf32>
    %473 = arith.subf %472, %471 : vector<8x1xf32>
    %474 = arith.mulf %470, %473 : vector<8x1xf32>
    %475 = vector.broadcast %474 : vector<8x1xf32> to vector<8x8xf32>
    %476 = arith.mulf %467, %475 : vector<8x8xf32>
    %477 = tpu.concatenate %442, %476 in 1 : vector<8x8xf32>, vector<8x8xf32> -> vector<8x16xf32>
    %c5 = arith.constant 5 : index
    %c0_114 = arith.constant 0 : index
    %c0_115 = arith.constant 0 : index
    %478 = vector.load %arg3[%c5, %c0_114, %c0_115] : memref<12x8x16xf32, #tpu.memory_space<vmem>>, vector<1x8x16xf32>
    %479 = vector.shape_cast %478 : vector<1x8x16xf32> to vector<8x16xf32>
    %480 = vector.shape_cast %477 : vector<8x16xf32> to vector<1x8x16xf32>
    tpu.vector_store %arg3[%c5, %c0_114, %c0_115], %480 {strides = array<i32>} : memref<12x8x16xf32, #tpu.memory_space<vmem>>, vector<1x8x16xf32>,
    %481 = tpu.concatenate %442, %423, %476, %461, %12 in 1 : vector<8x8xf32>, vector<8x16xf32>, vector<8x8xf32>, vector<8x32xf32>, vector<8x8xf32> -> vector<8x72xf32>
    %cst_116 = arith.constant dense<0.000000e+00> : vector<8x256xf32>
    %482 = tpu.matmul %481, %0, %cst_116 {dimension_numbers = #tpu.dot_dimension_numbers<[1], [0], [0], [1], [0, 0, 1, 1], [], []>} : vector<8x72xf32>, vector<72x256xf32>, vector<8x256xf32> -> vector<8x256xf32>
    %483 = vector.extract_strided_slice %482 {offsets = [0, 0], sizes = [8, 64], strides = [1, 1]} : vector<8x256xf32> to vector<8x64xf32>
    %484 = vector.extract_strided_slice %482 {offsets = [0, 128], sizes = [8, 128], strides = [1, 1]} : vector<8x256xf32> to vector<8x128xf32>
    %cst_117 = arith.constant 5.000000e-01 : f32
    %485 = vector.broadcast %cst_117 : f32 to vector<8x64xf32>
    %486 = arith.mulf %485, %483 : vector<8x64xf32>
    %487 = math.tanh %486 : vector<8x64xf32>
    %488 = vector.extract_strided_slice %487 {offsets = [0, 0], sizes = [8, 48], strides = [1, 1]} : vector<8x64xf32> to vector<8x48xf32>
    %cst_118 = arith.constant 1.000000e+00 : f32
    %489 = vector.broadcast %cst_118 : f32 to vector<8x48xf32>
    %490 = arith.addf %488, %489 : vector<8x48xf32>
    %cst_119 = arith.constant 5.000000e-01 : f32
    %491 = vector.broadcast %cst_119 : f32 to vector<8x48xf32>
    %492 = arith.mulf %491, %490 : vector<8x48xf32>
    %493 = vector.extract_strided_slice %492 {offsets = [0, 0], sizes = [8, 16], strides = [1, 1]} : vector<8x48xf32> to vector<8x16xf32>
    %494 = vector.extract_strided_slice %492 {offsets = [0, 16], sizes = [8, 16], strides = [1, 1]} : vector<8x48xf32> to vector<8x16xf32>
    %495 = vector.extract_strided_slice %492 {offsets = [0, 32], sizes = [8, 16], strides = [1, 1]} : vector<8x48xf32> to vector<8x16xf32>
    %496 = vector.extract_strided_slice %487 {offsets = [0, 48], sizes = [8, 16], strides = [1, 1]} : vector<8x64xf32> to vector<8x16xf32>
    %497 = arith.mulf %494, %421 : vector<8x16xf32>
    %498 = arith.mulf %493, %496 : vector<8x16xf32>
    %499 = arith.addf %497, %498 : vector<8x16xf32>
    %500 = math.tanh %499 : vector<8x16xf32>
    %501 = arith.mulf %495, %500 : vector<8x16xf32>
    %502 = tpu.concatenate %501, %463 in 1 : vector<8x16xf32>, vector<8x32xf32> -> vector<8x48xf32>
    %cst_120 = arith.constant dense<0.000000e+00> : vector<8x24xf32>
    %503 = tpu.matmul %502, %1, %cst_120 {dimension_numbers = #tpu.dot_dimension_numbers<[1], [0], [0], [1], [0, 0, 1, 1], [], []>} : vector<8x48xf32>, vector<48x24xf32>, vector<8x24xf32> -> vector<8x24xf32>
    %504 = vector.broadcast %2 : vector<1x24xf32> to vector<8x24xf32>
    %505 = arith.addf %503, %504 : vector<8x24xf32>
    %506 = vector.extract_strided_slice %505 {offsets = [0, 0], sizes = [8, 8], strides = [1, 1]} : vector<8x24xf32> to vector<8x8xf32>
    %507 = math.exp %506 : vector<8x8xf32>
    %508 = vector.extract_strided_slice %505 {offsets = [0, 8], sizes = [8, 16], strides = [1, 1]} : vector<8x24xf32> to vector<8x16xf32>
    %cst_121 = arith.constant 0.000000e+00 : f32
    %509 = vector.broadcast %cst_121 : f32 to vector<8x16xf32>
    %510 = arith.maximumf %508, %509 : vector<8x16xf32>
    %cst_122 = arith.constant dense<0.000000e+00> : vector<8x128xf32>
    %511 = tpu.matmul %507, %3, %cst_122 {dimension_numbers = #tpu.dot_dimension_numbers<[1], [0], [0], [1], [0, 0, 1, 1], [], []>} : vector<8x8xf32>, vector<8x128xf32>, vector<8x128xf32> -> vector<8x128xf32>
    %cst_123 = arith.constant dense<0.000000e+00> : vector<8xf32>
    %512 = vector.multi_reduction <add>, %507, %cst_123 [1] : vector<8x8xf32> to vector<8xf32>
    %513 = vector.shape_cast %512 : vector<8xf32> to vector<8x1xf32>
    %514 = tpu.reciprocal %513 {approx = true} : vector<8x1xf32> -> vector<8x1xf32>
    %515 = arith.mulf %513, %514 : vector<8x1xf32>
    %cst_124 = arith.constant 2.000000e+00 : f32
    %516 = vector.broadcast %cst_124 : f32 to vector<8x1xf32>
    %517 = arith.subf %516, %515 : vector<8x1xf32>
    %518 = arith.mulf %514, %517 : vector<8x1xf32>
    %519 = vector.broadcast %518 : vector<8x1xf32> to vector<8x8xf32>
    %520 = arith.mulf %507, %519 : vector<8x8xf32>
    %521 = vector.broadcast %518 : vector<8x1xf32> to vector<8x128xf32>
    %522 = arith.mulf %521, %511 : vector<8x128xf32>
    %523 = arith.addf %484, %522 : vector<8x128xf32>
    %524 = tpu.concatenate %501, %510 in 1 : vector<8x16xf32>, vector<8x16xf32> -> vector<8x32xf32>
    %cst_125 = arith.constant 5.000000e-01 : f32
    %525 = vector.broadcast %cst_125 : f32 to vector<8x128xf32>
    %526 = arith.mulf %525, %523 : vector<8x128xf32>
    %527 = math.tanh %526 : vector<8x128xf32>
    %528 = vector.extract_strided_slice %527 {offsets = [0, 0], sizes = [8, 96], strides = [1, 1]} : vector<8x128xf32> to vector<8x96xf32>
    %cst_126 = arith.constant 1.000000e+00 : f32
    %529 = vector.broadcast %cst_126 : f32 to vector<8x96xf32>
    %530 = arith.addf %528, %529 : vector<8x96xf32>
    %cst_127 = arith.constant 5.000000e-01 : f32
    %531 = vector.broadcast %cst_127 : f32 to vector<8x96xf32>
    %532 = arith.mulf %531, %530 : vector<8x96xf32>
    %533 = vector.extract_strided_slice %532 {offsets = [0, 0], sizes = [8, 32], strides = [1, 1]} : vector<8x96xf32> to vector<8x32xf32>
    %534 = vector.extract_strided_slice %532 {offsets = [0, 32], sizes = [8, 32], strides = [1, 1]} : vector<8x96xf32> to vector<8x32xf32>
    %535 = vector.extract_strided_slice %532 {offsets = [0, 64], sizes = [8, 32], strides = [1, 1]} : vector<8x96xf32> to vector<8x32xf32>
    %536 = vector.extract_strided_slice %527 {offsets = [0, 96], sizes = [8, 32], strides = [1, 1]} : vector<8x128xf32> to vector<8x32xf32>
    %537 = arith.mulf %534, %524 : vector<8x32xf32>
    %538 = arith.mulf %533, %536 : vector<8x32xf32>
    %539 = arith.addf %537, %538 : vector<8x32xf32>
    %540 = math.tanh %539 : vector<8x32xf32>
    %541 = arith.mulf %535, %540 : vector<8x32xf32>
    %cst_128 = arith.constant dense<0.000000e+00> : vector<8x8xf32>
    %542 = tpu.matmul %541, %4, %cst_128 {dimension_numbers = #tpu.dot_dimension_numbers<[1], [0], [0], [1], [0, 0, 1, 1], [], []>} : vector<8x32xf32>, vector<32x8xf32>, vector<8x8xf32> -> vector<8x8xf32>
    %543 = vector.broadcast %5 : vector<1x8xf32> to vector<8x8xf32>
    %544 = arith.addf %542, %543 : vector<8x8xf32>
    %545 = math.exp %544 : vector<8x8xf32>
    %cst_129 = arith.constant dense<0.000000e+00> : vector<8xf32>
    %546 = vector.multi_reduction <add>, %545, %cst_129 [1] : vector<8x8xf32> to vector<8xf32>
    %547 = vector.shape_cast %546 : vector<8xf32> to vector<8x1xf32>
    %548 = tpu.reciprocal %547 {approx = true} : vector<8x1xf32> -> vector<8x1xf32>
    %549 = arith.mulf %547, %548 : vector<8x1xf32>
    %cst_130 = arith.constant 2.000000e+00 : f32
    %550 = vector.broadcast %cst_130 : f32 to vector<8x1xf32>
    %551 = arith.subf %550, %549 : vector<8x1xf32>
    %552 = arith.mulf %548, %551 : vector<8x1xf32>
    %553 = vector.broadcast %552 : vector<8x1xf32> to vector<8x8xf32>
    %554 = arith.mulf %545, %553 : vector<8x8xf32>
    %555 = tpu.concatenate %520, %554 in 1 : vector<8x8xf32>, vector<8x8xf32> -> vector<8x16xf32>
    %c6 = arith.constant 6 : index
    %c0_131 = arith.constant 0 : index
    %c0_132 = arith.constant 0 : index
    %556 = vector.load %arg3[%c6, %c0_131, %c0_132] : memref<12x8x16xf32, #tpu.memory_space<vmem>>, vector<1x8x16xf32>
    %557 = vector.shape_cast %556 : vector<1x8x16xf32> to vector<8x16xf32>
    %558 = vector.shape_cast %555 : vector<8x16xf32> to vector<1x8x16xf32>
    tpu.vector_store %arg3[%c6, %c0_131, %c0_132], %558 {strides = array<i32>} : memref<12x8x16xf32, #tpu.memory_space<vmem>>, vector<1x8x16xf32>,
    %559 = tpu.concatenate %520, %501, %554, %539, %12 in 1 : vector<8x8xf32>, vector<8x16xf32>, vector<8x8xf32>, vector<8x32xf32>, vector<8x8xf32> -> vector<8x72xf32>
    %cst_133 = arith.constant dense<0.000000e+00> : vector<8x256xf32>
    %560 = tpu.matmul %559, %0, %cst_133 {dimension_numbers = #tpu.dot_dimension_numbers<[1], [0], [0], [1], [0, 0, 1, 1], [], []>} : vector<8x72xf32>, vector<72x256xf32>, vector<8x256xf32> -> vector<8x256xf32>
    %561 = vector.extract_strided_slice %560 {offsets = [0, 0], sizes = [8, 64], strides = [1, 1]} : vector<8x256xf32> to vector<8x64xf32>
    %562 = vector.extract_strided_slice %560 {offsets = [0, 128], sizes = [8, 128], strides = [1, 1]} : vector<8x256xf32> to vector<8x128xf32>
    %cst_134 = arith.constant 5.000000e-01 : f32
    %563 = vector.broadcast %cst_134 : f32 to vector<8x64xf32>
    %564 = arith.mulf %563, %561 : vector<8x64xf32>
    %565 = math.tanh %564 : vector<8x64xf32>
    %566 = vector.extract_strided_slice %565 {offsets = [0, 0], sizes = [8, 48], strides = [1, 1]} : vector<8x64xf32> to vector<8x48xf32>
    %cst_135 = arith.constant 1.000000e+00 : f32
    %567 = vector.broadcast %cst_135 : f32 to vector<8x48xf32>
    %568 = arith.addf %566, %567 : vector<8x48xf32>
    %cst_136 = arith.constant 5.000000e-01 : f32
    %569 = vector.broadcast %cst_136 : f32 to vector<8x48xf32>
    %570 = arith.mulf %569, %568 : vector<8x48xf32>
    %571 = vector.extract_strided_slice %570 {offsets = [0, 0], sizes = [8, 16], strides = [1, 1]} : vector<8x48xf32> to vector<8x16xf32>
    %572 = vector.extract_strided_slice %570 {offsets = [0, 16], sizes = [8, 16], strides = [1, 1]} : vector<8x48xf32> to vector<8x16xf32>
    %573 = vector.extract_strided_slice %570 {offsets = [0, 32], sizes = [8, 16], strides = [1, 1]} : vector<8x48xf32> to vector<8x16xf32>
    %574 = vector.extract_strided_slice %565 {offsets = [0, 48], sizes = [8, 16], strides = [1, 1]} : vector<8x64xf32> to vector<8x16xf32>
    %575 = arith.mulf %572, %499 : vector<8x16xf32>
    %576 = arith.mulf %571, %574 : vector<8x16xf32>
    %577 = arith.addf %575, %576 : vector<8x16xf32>
    %578 = math.tanh %577 : vector<8x16xf32>
    %579 = arith.mulf %573, %578 : vector<8x16xf32>
    %580 = tpu.concatenate %579, %541 in 1 : vector<8x16xf32>, vector<8x32xf32> -> vector<8x48xf32>
    %cst_137 = arith.constant dense<0.000000e+00> : vector<8x24xf32>
    %581 = tpu.matmul %580, %1, %cst_137 {dimension_numbers = #tpu.dot_dimension_numbers<[1], [0], [0], [1], [0, 0, 1, 1], [], []>} : vector<8x48xf32>, vector<48x24xf32>, vector<8x24xf32> -> vector<8x24xf32>
    %582 = vector.broadcast %2 : vector<1x24xf32> to vector<8x24xf32>
    %583 = arith.addf %581, %582 : vector<8x24xf32>
    %584 = vector.extract_strided_slice %583 {offsets = [0, 0], sizes = [8, 8], strides = [1, 1]} : vector<8x24xf32> to vector<8x8xf32>
    %585 = math.exp %584 : vector<8x8xf32>
    %586 = vector.extract_strided_slice %583 {offsets = [0, 8], sizes = [8, 16], strides = [1, 1]} : vector<8x24xf32> to vector<8x16xf32>
    %cst_138 = arith.constant 0.000000e+00 : f32
    %587 = vector.broadcast %cst_138 : f32 to vector<8x16xf32>
    %588 = arith.maximumf %586, %587 : vector<8x16xf32>
    %cst_139 = arith.constant dense<0.000000e+00> : vector<8x128xf32>
    %589 = tpu.matmul %585, %3, %cst_139 {dimension_numbers = #tpu.dot_dimension_numbers<[1], [0], [0], [1], [0, 0, 1, 1], [], []>} : vector<8x8xf32>, vector<8x128xf32>, vector<8x128xf32> -> vector<8x128xf32>
    %cst_140 = arith.constant dense<0.000000e+00> : vector<8xf32>
    %590 = vector.multi_reduction <add>, %585, %cst_140 [1] : vector<8x8xf32> to vector<8xf32>
    %591 = vector.shape_cast %590 : vector<8xf32> to vector<8x1xf32>
    %592 = tpu.reciprocal %591 {approx = true} : vector<8x1xf32> -> vector<8x1xf32>
    %593 = arith.mulf %591, %592 : vector<8x1xf32>
    %cst_141 = arith.constant 2.000000e+00 : f32
    %594 = vector.broadcast %cst_141 : f32 to vector<8x1xf32>
    %595 = arith.subf %594, %593 : vector<8x1xf32>
    %596 = arith.mulf %592, %595 : vector<8x1xf32>
    %597 = vector.broadcast %596 : vector<8x1xf32> to vector<8x8xf32>
    %598 = arith.mulf %585, %597 : vector<8x8xf32>
    %599 = vector.broadcast %596 : vector<8x1xf32> to vector<8x128xf32>
    %600 = arith.mulf %599, %589 : vector<8x128xf32>
    %601 = arith.addf %562, %600 : vector<8x128xf32>
    %602 = tpu.concatenate %579, %588 in 1 : vector<8x16xf32>, vector<8x16xf32> -> vector<8x32xf32>
    %cst_142 = arith.constant 5.000000e-01 : f32
    %603 = vector.broadcast %cst_142 : f32 to vector<8x128xf32>
    %604 = arith.mulf %603, %601 : vector<8x128xf32>
    %605 = math.tanh %604 : vector<8x128xf32>
    %606 = vector.extract_strided_slice %605 {offsets = [0, 0], sizes = [8, 96], strides = [1, 1]} : vector<8x128xf32> to vector<8x96xf32>
    %cst_143 = arith.constant 1.000000e+00 : f32
    %607 = vector.broadcast %cst_143 : f32 to vector<8x96xf32>
    %608 = arith.addf %606, %607 : vector<8x96xf32>
    %cst_144 = arith.constant 5.000000e-01 : f32
    %609 = vector.broadcast %cst_144 : f32 to vector<8x96xf32>
    %610 = arith.mulf %609, %608 : vector<8x96xf32>
    %611 = vector.extract_strided_slice %610 {offsets = [0, 0], sizes = [8, 32], strides = [1, 1]} : vector<8x96xf32> to vector<8x32xf32>
    %612 = vector.extract_strided_slice %610 {offsets = [0, 32], sizes = [8, 32], strides = [1, 1]} : vector<8x96xf32> to vector<8x32xf32>
    %613 = vector.extract_strided_slice %610 {offsets = [0, 64], sizes = [8, 32], strides = [1, 1]} : vector<8x96xf32> to vector<8x32xf32>
    %614 = vector.extract_strided_slice %605 {offsets = [0, 96], sizes = [8, 32], strides = [1, 1]} : vector<8x128xf32> to vector<8x32xf32>
    %615 = arith.mulf %612, %602 : vector<8x32xf32>
    %616 = arith.mulf %611, %614 : vector<8x32xf32>
    %617 = arith.addf %615, %616 : vector<8x32xf32>
    %618 = math.tanh %617 : vector<8x32xf32>
    %619 = arith.mulf %613, %618 : vector<8x32xf32>
    %cst_145 = arith.constant dense<0.000000e+00> : vector<8x8xf32>
    %620 = tpu.matmul %619, %4, %cst_145 {dimension_numbers = #tpu.dot_dimension_numbers<[1], [0], [0], [1], [0, 0, 1, 1], [], []>} : vector<8x32xf32>, vector<32x8xf32>, vector<8x8xf32> -> vector<8x8xf32>
    %621 = vector.broadcast %5 : vector<1x8xf32> to vector<8x8xf32>
    %622 = arith.addf %620, %621 : vector<8x8xf32>
    %623 = math.exp %622 : vector<8x8xf32>
    %cst_146 = arith.constant dense<0.000000e+00> : vector<8xf32>
    %624 = vector.multi_reduction <add>, %623, %cst_146 [1] : vector<8x8xf32> to vector<8xf32>
    %625 = vector.shape_cast %624 : vector<8xf32> to vector<8x1xf32>
    %626 = tpu.reciprocal %625 {approx = true} : vector<8x1xf32> -> vector<8x1xf32>
    %627 = arith.mulf %625, %626 : vector<8x1xf32>
    %cst_147 = arith.constant 2.000000e+00 : f32
    %628 = vector.broadcast %cst_147 : f32 to vector<8x1xf32>
    %629 = arith.subf %628, %627 : vector<8x1xf32>
    %630 = arith.mulf %626, %629 : vector<8x1xf32>
    %631 = vector.broadcast %630 : vector<8x1xf32> to vector<8x8xf32>
    %632 = arith.mulf %623, %631 : vector<8x8xf32>
    %633 = tpu.concatenate %598, %632 in 1 : vector<8x8xf32>, vector<8x8xf32> -> vector<8x16xf32>
    %c7 = arith.constant 7 : index
    %c0_148 = arith.constant 0 : index
    %c0_149 = arith.constant 0 : index
    %634 = vector.load %arg3[%c7, %c0_148, %c0_149] : memref<12x8x16xf32, #tpu.memory_space<vmem>>, vector<1x8x16xf32>
    %635 = vector.shape_cast %634 : vector<1x8x16xf32> to vector<8x16xf32>
    %636 = vector.shape_cast %633 : vector<8x16xf32> to vector<1x8x16xf32>
    tpu.vector_store %arg3[%c7, %c0_148, %c0_149], %636 {strides = array<i32>} : memref<12x8x16xf32, #tpu.memory_space<vmem>>, vector<1x8x16xf32>,
    %637 = tpu.concatenate %598, %579, %632, %617, %12 in 1 : vector<8x8xf32>, vector<8x16xf32>, vector<8x8xf32>, vector<8x32xf32>, vector<8x8xf32> -> vector<8x72xf32>
    %cst_150 = arith.constant dense<0.000000e+00> : vector<8x256xf32>
    %638 = tpu.matmul %637, %0, %cst_150 {dimension_numbers = #tpu.dot_dimension_numbers<[1], [0], [0], [1], [0, 0, 1, 1], [], []>} : vector<8x72xf32>, vector<72x256xf32>, vector<8x256xf32> -> vector<8x256xf32>
    %639 = vector.extract_strided_slice %638 {offsets = [0, 0], sizes = [8, 64], strides = [1, 1]} : vector<8x256xf32> to vector<8x64xf32>
    %640 = vector.extract_strided_slice %638 {offsets = [0, 128], sizes = [8, 128], strides = [1, 1]} : vector<8x256xf32> to vector<8x128xf32>
    %cst_151 = arith.constant 5.000000e-01 : f32
    %641 = vector.broadcast %cst_151 : f32 to vector<8x64xf32>
    %642 = arith.mulf %641, %639 : vector<8x64xf32>
    %643 = math.tanh %642 : vector<8x64xf32>
    %644 = vector.extract_strided_slice %643 {offsets = [0, 0], sizes = [8, 48], strides = [1, 1]} : vector<8x64xf32> to vector<8x48xf32>
    %cst_152 = arith.constant 1.000000e+00 : f32
    %645 = vector.broadcast %cst_152 : f32 to vector<8x48xf32>
    %646 = arith.addf %644, %645 : vector<8x48xf32>
    %cst_153 = arith.constant 5.000000e-01 : f32
    %647 = vector.broadcast %cst_153 : f32 to vector<8x48xf32>
    %648 = arith.mulf %647, %646 : vector<8x48xf32>
    %649 = vector.extract_strided_slice %648 {offsets = [0, 0], sizes = [8, 16], strides = [1, 1]} : vector<8x48xf32> to vector<8x16xf32>
    %650 = vector.extract_strided_slice %648 {offsets = [0, 16], sizes = [8, 16], strides = [1, 1]} : vector<8x48xf32> to vector<8x16xf32>
    %651 = vector.extract_strided_slice %648 {offsets = [0, 32], sizes = [8, 16], strides = [1, 1]} : vector<8x48xf32> to vector<8x16xf32>
    %652 = vector.extract_strided_slice %643 {offsets = [0, 48], sizes = [8, 16], strides = [1, 1]} : vector<8x64xf32> to vector<8x16xf32>
    %653 = arith.mulf %650, %577 : vector<8x16xf32>
    %654 = arith.mulf %649, %652 : vector<8x16xf32>
    %655 = arith.addf %653, %654 : vector<8x16xf32>
    %656 = math.tanh %655 : vector<8x16xf32>
    %657 = arith.mulf %651, %656 : vector<8x16xf32>
    %658 = tpu.concatenate %657, %619 in 1 : vector<8x16xf32>, vector<8x32xf32> -> vector<8x48xf32>
    %cst_154 = arith.constant dense<0.000000e+00> : vector<8x24xf32>
    %659 = tpu.matmul %658, %1, %cst_154 {dimension_numbers = #tpu.dot_dimension_numbers<[1], [0], [0], [1], [0, 0, 1, 1], [], []>} : vector<8x48xf32>, vector<48x24xf32>, vector<8x24xf32> -> vector<8x24xf32>
    %660 = vector.broadcast %2 : vector<1x24xf32> to vector<8x24xf32>
    %661 = arith.addf %659, %660 : vector<8x24xf32>
    %662 = vector.extract_strided_slice %661 {offsets = [0, 0], sizes = [8, 8], strides = [1, 1]} : vector<8x24xf32> to vector<8x8xf32>
    %663 = math.exp %662 : vector<8x8xf32>
    %664 = vector.extract_strided_slice %661 {offsets = [0, 8], sizes = [8, 16], strides = [1, 1]} : vector<8x24xf32> to vector<8x16xf32>
    %cst_155 = arith.constant 0.000000e+00 : f32
    %665 = vector.broadcast %cst_155 : f32 to vector<8x16xf32>
    %666 = arith.maximumf %664, %665 : vector<8x16xf32>
    %cst_156 = arith.constant dense<0.000000e+00> : vector<8x128xf32>
    %667 = tpu.matmul %663, %3, %cst_156 {dimension_numbers = #tpu.dot_dimension_numbers<[1], [0], [0], [1], [0, 0, 1, 1], [], []>} : vector<8x8xf32>, vector<8x128xf32>, vector<8x128xf32> -> vector<8x128xf32>
    %cst_157 = arith.constant dense<0.000000e+00> : vector<8xf32>
    %668 = vector.multi_reduction <add>, %663, %cst_157 [1] : vector<8x8xf32> to vector<8xf32>
    %669 = vector.shape_cast %668 : vector<8xf32> to vector<8x1xf32>
    %670 = tpu.reciprocal %669 {approx = true} : vector<8x1xf32> -> vector<8x1xf32>
    %671 = arith.mulf %669, %670 : vector<8x1xf32>
    %cst_158 = arith.constant 2.000000e+00 : f32
    %672 = vector.broadcast %cst_158 : f32 to vector<8x1xf32>
    %673 = arith.subf %672, %671 : vector<8x1xf32>
    %674 = arith.mulf %670, %673 : vector<8x1xf32>
    %675 = vector.broadcast %674 : vector<8x1xf32> to vector<8x8xf32>
    %676 = arith.mulf %663, %675 : vector<8x8xf32>
    %677 = vector.broadcast %674 : vector<8x1xf32> to vector<8x128xf32>
    %678 = arith.mulf %677, %667 : vector<8x128xf32>
    %679 = arith.addf %640, %678 : vector<8x128xf32>
    %680 = tpu.concatenate %657, %666 in 1 : vector<8x16xf32>, vector<8x16xf32> -> vector<8x32xf32>
    %cst_159 = arith.constant 5.000000e-01 : f32
    %681 = vector.broadcast %cst_159 : f32 to vector<8x128xf32>
    %682 = arith.mulf %681, %679 : vector<8x128xf32>
    %683 = math.tanh %682 : vector<8x128xf32>
    %684 = vector.extract_strided_slice %683 {offsets = [0, 0], sizes = [8, 96], strides = [1, 1]} : vector<8x128xf32> to vector<8x96xf32>
    %cst_160 = arith.constant 1.000000e+00 : f32
    %685 = vector.broadcast %cst_160 : f32 to vector<8x96xf32>
    %686 = arith.addf %684, %685 : vector<8x96xf32>
    %cst_161 = arith.constant 5.000000e-01 : f32
    %687 = vector.broadcast %cst_161 : f32 to vector<8x96xf32>
    %688 = arith.mulf %687, %686 : vector<8x96xf32>
    %689 = vector.extract_strided_slice %688 {offsets = [0, 0], sizes = [8, 32], strides = [1, 1]} : vector<8x96xf32> to vector<8x32xf32>
    %690 = vector.extract_strided_slice %688 {offsets = [0, 32], sizes = [8, 32], strides = [1, 1]} : vector<8x96xf32> to vector<8x32xf32>
    %691 = vector.extract_strided_slice %688 {offsets = [0, 64], sizes = [8, 32], strides = [1, 1]} : vector<8x96xf32> to vector<8x32xf32>
    %692 = vector.extract_strided_slice %683 {offsets = [0, 96], sizes = [8, 32], strides = [1, 1]} : vector<8x128xf32> to vector<8x32xf32>
    %693 = arith.mulf %690, %680 : vector<8x32xf32>
    %694 = arith.mulf %689, %692 : vector<8x32xf32>
    %695 = arith.addf %693, %694 : vector<8x32xf32>
    %696 = math.tanh %695 : vector<8x32xf32>
    %697 = arith.mulf %691, %696 : vector<8x32xf32>
    %cst_162 = arith.constant dense<0.000000e+00> : vector<8x8xf32>
    %698 = tpu.matmul %697, %4, %cst_162 {dimension_numbers = #tpu.dot_dimension_numbers<[1], [0], [0], [1], [0, 0, 1, 1], [], []>} : vector<8x32xf32>, vector<32x8xf32>, vector<8x8xf32> -> vector<8x8xf32>
    %699 = vector.broadcast %5 : vector<1x8xf32> to vector<8x8xf32>
    %700 = arith.addf %698, %699 : vector<8x8xf32>
    %701 = math.exp %700 : vector<8x8xf32>
    %cst_163 = arith.constant dense<0.000000e+00> : vector<8xf32>
    %702 = vector.multi_reduction <add>, %701, %cst_163 [1] : vector<8x8xf32> to vector<8xf32>
    %703 = vector.shape_cast %702 : vector<8xf32> to vector<8x1xf32>
    %704 = tpu.reciprocal %703 {approx = true} : vector<8x1xf32> -> vector<8x1xf32>
    %705 = arith.mulf %703, %704 : vector<8x1xf32>
    %cst_164 = arith.constant 2.000000e+00 : f32
    %706 = vector.broadcast %cst_164 : f32 to vector<8x1xf32>
    %707 = arith.subf %706, %705 : vector<8x1xf32>
    %708 = arith.mulf %704, %707 : vector<8x1xf32>
    %709 = vector.broadcast %708 : vector<8x1xf32> to vector<8x8xf32>
    %710 = arith.mulf %701, %709 : vector<8x8xf32>
    %711 = tpu.concatenate %676, %710 in 1 : vector<8x8xf32>, vector<8x8xf32> -> vector<8x16xf32>
    %c8 = arith.constant 8 : index
    %c0_165 = arith.constant 0 : index
    %c0_166 = arith.constant 0 : index
    %712 = vector.load %arg3[%c8, %c0_165, %c0_166] : memref<12x8x16xf32, #tpu.memory_space<vmem>>, vector<1x8x16xf32>
    %713 = vector.shape_cast %712 : vector<1x8x16xf32> to vector<8x16xf32>
    %714 = vector.shape_cast %711 : vector<8x16xf32> to vector<1x8x16xf32>
    tpu.vector_store %arg3[%c8, %c0_165, %c0_166], %714 {strides = array<i32>} : memref<12x8x16xf32, #tpu.memory_space<vmem>>, vector<1x8x16xf32>,
    %715 = tpu.concatenate %676, %657, %710, %695, %12 in 1 : vector<8x8xf32>, vector<8x16xf32>, vector<8x8xf32>, vector<8x32xf32>, vector<8x8xf32> -> vector<8x72xf32>
    %cst_167 = arith.constant dense<0.000000e+00> : vector<8x256xf32>
    %716 = tpu.matmul %715, %0, %cst_167 {dimension_numbers = #tpu.dot_dimension_numbers<[1], [0], [0], [1], [0, 0, 1, 1], [], []>} : vector<8x72xf32>, vector<72x256xf32>, vector<8x256xf32> -> vector<8x256xf32>
    %717 = vector.extract_strided_slice %716 {offsets = [0, 0], sizes = [8, 64], strides = [1, 1]} : vector<8x256xf32> to vector<8x64xf32>
    %718 = vector.extract_strided_slice %716 {offsets = [0, 128], sizes = [8, 128], strides = [1, 1]} : vector<8x256xf32> to vector<8x128xf32>
    %cst_168 = arith.constant 5.000000e-01 : f32
    %719 = vector.broadcast %cst_168 : f32 to vector<8x64xf32>
    %720 = arith.mulf %719, %717 : vector<8x64xf32>
    %721 = math.tanh %720 : vector<8x64xf32>
    %722 = vector.extract_strided_slice %721 {offsets = [0, 0], sizes = [8, 48], strides = [1, 1]} : vector<8x64xf32> to vector<8x48xf32>
    %cst_169 = arith.constant 1.000000e+00 : f32
    %723 = vector.broadcast %cst_169 : f32 to vector<8x48xf32>
    %724 = arith.addf %722, %723 : vector<8x48xf32>
    %cst_170 = arith.constant 5.000000e-01 : f32
    %725 = vector.broadcast %cst_170 : f32 to vector<8x48xf32>
    %726 = arith.mulf %725, %724 : vector<8x48xf32>
    %727 = vector.extract_strided_slice %726 {offsets = [0, 0], sizes = [8, 16], strides = [1, 1]} : vector<8x48xf32> to vector<8x16xf32>
    %728 = vector.extract_strided_slice %726 {offsets = [0, 16], sizes = [8, 16], strides = [1, 1]} : vector<8x48xf32> to vector<8x16xf32>
    %729 = vector.extract_strided_slice %726 {offsets = [0, 32], sizes = [8, 16], strides = [1, 1]} : vector<8x48xf32> to vector<8x16xf32>
    %730 = vector.extract_strided_slice %721 {offsets = [0, 48], sizes = [8, 16], strides = [1, 1]} : vector<8x64xf32> to vector<8x16xf32>
    %731 = arith.mulf %728, %655 : vector<8x16xf32>
    %732 = arith.mulf %727, %730 : vector<8x16xf32>
    %733 = arith.addf %731, %732 : vector<8x16xf32>
    %734 = math.tanh %733 : vector<8x16xf32>
    %735 = arith.mulf %729, %734 : vector<8x16xf32>
    %736 = tpu.concatenate %735, %697 in 1 : vector<8x16xf32>, vector<8x32xf32> -> vector<8x48xf32>
    %cst_171 = arith.constant dense<0.000000e+00> : vector<8x24xf32>
    %737 = tpu.matmul %736, %1, %cst_171 {dimension_numbers = #tpu.dot_dimension_numbers<[1], [0], [0], [1], [0, 0, 1, 1], [], []>} : vector<8x48xf32>, vector<48x24xf32>, vector<8x24xf32> -> vector<8x24xf32>
    %738 = vector.broadcast %2 : vector<1x24xf32> to vector<8x24xf32>
    %739 = arith.addf %737, %738 : vector<8x24xf32>
    %740 = vector.extract_strided_slice %739 {offsets = [0, 0], sizes = [8, 8], strides = [1, 1]} : vector<8x24xf32> to vector<8x8xf32>
    %741 = math.exp %740 : vector<8x8xf32>
    %742 = vector.extract_strided_slice %739 {offsets = [0, 8], sizes = [8, 16], strides = [1, 1]} : vector<8x24xf32> to vector<8x16xf32>
    %cst_172 = arith.constant 0.000000e+00 : f32
    %743 = vector.broadcast %cst_172 : f32 to vector<8x16xf32>
    %744 = arith.maximumf %742, %743 : vector<8x16xf32>
    %cst_173 = arith.constant dense<0.000000e+00> : vector<8x128xf32>
    %745 = tpu.matmul %741, %3, %cst_173 {dimension_numbers = #tpu.dot_dimension_numbers<[1], [0], [0], [1], [0, 0, 1, 1], [], []>} : vector<8x8xf32>, vector<8x128xf32>, vector<8x128xf32> -> vector<8x128xf32>
    %cst_174 = arith.constant dense<0.000000e+00> : vector<8xf32>
    %746 = vector.multi_reduction <add>, %741, %cst_174 [1] : vector<8x8xf32> to vector<8xf32>
    %747 = vector.shape_cast %746 : vector<8xf32> to vector<8x1xf32>
    %748 = tpu.reciprocal %747 {approx = true} : vector<8x1xf32> -> vector<8x1xf32>
    %749 = arith.mulf %747, %748 : vector<8x1xf32>
    %cst_175 = arith.constant 2.000000e+00 : f32
    %750 = vector.broadcast %cst_175 : f32 to vector<8x1xf32>
    %751 = arith.subf %750, %749 : vector<8x1xf32>
    %752 = arith.mulf %748, %751 : vector<8x1xf32>
    %753 = vector.broadcast %752 : vector<8x1xf32> to vector<8x8xf32>
    %754 = arith.mulf %741, %753 : vector<8x8xf32>
    %755 = vector.broadcast %752 : vector<8x1xf32> to vector<8x128xf32>
    %756 = arith.mulf %755, %745 : vector<8x128xf32>
    %757 = arith.addf %718, %756 : vector<8x128xf32>
    %758 = tpu.concatenate %735, %744 in 1 : vector<8x16xf32>, vector<8x16xf32> -> vector<8x32xf32>
    %cst_176 = arith.constant 5.000000e-01 : f32
    %759 = vector.broadcast %cst_176 : f32 to vector<8x128xf32>
    %760 = arith.mulf %759, %757 : vector<8x128xf32>
    %761 = math.tanh %760 : vector<8x128xf32>
    %762 = vector.extract_strided_slice %761 {offsets = [0, 0], sizes = [8, 96], strides = [1, 1]} : vector<8x128xf32> to vector<8x96xf32>
    %cst_177 = arith.constant 1.000000e+00 : f32
    %763 = vector.broadcast %cst_177 : f32 to vector<8x96xf32>
    %764 = arith.addf %762, %763 : vector<8x96xf32>
    %cst_178 = arith.constant 5.000000e-01 : f32
    %765 = vector.broadcast %cst_178 : f32 to vector<8x96xf32>
    %766 = arith.mulf %765, %764 : vector<8x96xf32>
    %767 = vector.extract_strided_slice %766 {offsets = [0, 0], sizes = [8, 32], strides = [1, 1]} : vector<8x96xf32> to vector<8x32xf32>
    %768 = vector.extract_strided_slice %766 {offsets = [0, 32], sizes = [8, 32], strides = [1, 1]} : vector<8x96xf32> to vector<8x32xf32>
    %769 = vector.extract_strided_slice %766 {offsets = [0, 64], sizes = [8, 32], strides = [1, 1]} : vector<8x96xf32> to vector<8x32xf32>
    %770 = vector.extract_strided_slice %761 {offsets = [0, 96], sizes = [8, 32], strides = [1, 1]} : vector<8x128xf32> to vector<8x32xf32>
    %771 = arith.mulf %768, %758 : vector<8x32xf32>
    %772 = arith.mulf %767, %770 : vector<8x32xf32>
    %773 = arith.addf %771, %772 : vector<8x32xf32>
    %774 = math.tanh %773 : vector<8x32xf32>
    %775 = arith.mulf %769, %774 : vector<8x32xf32>
    %cst_179 = arith.constant dense<0.000000e+00> : vector<8x8xf32>
    %776 = tpu.matmul %775, %4, %cst_179 {dimension_numbers = #tpu.dot_dimension_numbers<[1], [0], [0], [1], [0, 0, 1, 1], [], []>} : vector<8x32xf32>, vector<32x8xf32>, vector<8x8xf32> -> vector<8x8xf32>
    %777 = vector.broadcast %5 : vector<1x8xf32> to vector<8x8xf32>
    %778 = arith.addf %776, %777 : vector<8x8xf32>
    %779 = math.exp %778 : vector<8x8xf32>
    %cst_180 = arith.constant dense<0.000000e+00> : vector<8xf32>
    %780 = vector.multi_reduction <add>, %779, %cst_180 [1] : vector<8x8xf32> to vector<8xf32>
    %781 = vector.shape_cast %780 : vector<8xf32> to vector<8x1xf32>
    %782 = tpu.reciprocal %781 {approx = true} : vector<8x1xf32> -> vector<8x1xf32>
    %783 = arith.mulf %781, %782 : vector<8x1xf32>
    %cst_181 = arith.constant 2.000000e+00 : f32
    %784 = vector.broadcast %cst_181 : f32 to vector<8x1xf32>
    %785 = arith.subf %784, %783 : vector<8x1xf32>
    %786 = arith.mulf %782, %785 : vector<8x1xf32>
    %787 = vector.broadcast %786 : vector<8x1xf32> to vector<8x8xf32>
    %788 = arith.mulf %779, %787 : vector<8x8xf32>
    %789 = tpu.concatenate %754, %788 in 1 : vector<8x8xf32>, vector<8x8xf32> -> vector<8x16xf32>
    %c9 = arith.constant 9 : index
    %c0_182 = arith.constant 0 : index
    %c0_183 = arith.constant 0 : index
    %790 = vector.load %arg3[%c9, %c0_182, %c0_183] : memref<12x8x16xf32, #tpu.memory_space<vmem>>, vector<1x8x16xf32>
    %791 = vector.shape_cast %790 : vector<1x8x16xf32> to vector<8x16xf32>
    %792 = vector.shape_cast %789 : vector<8x16xf32> to vector<1x8x16xf32>
    tpu.vector_store %arg3[%c9, %c0_182, %c0_183], %792 {strides = array<i32>} : memref<12x8x16xf32, #tpu.memory_space<vmem>>, vector<1x8x16xf32>,
    %793 = tpu.concatenate %754, %735, %788, %773, %12 in 1 : vector<8x8xf32>, vector<8x16xf32>, vector<8x8xf32>, vector<8x32xf32>, vector<8x8xf32> -> vector<8x72xf32>
    %cst_184 = arith.constant dense<0.000000e+00> : vector<8x256xf32>
    %794 = tpu.matmul %793, %0, %cst_184 {dimension_numbers = #tpu.dot_dimension_numbers<[1], [0], [0], [1], [0, 0, 1, 1], [], []>} : vector<8x72xf32>, vector<72x256xf32>, vector<8x256xf32> -> vector<8x256xf32>
    %795 = vector.extract_strided_slice %794 {offsets = [0, 0], sizes = [8, 64], strides = [1, 1]} : vector<8x256xf32> to vector<8x64xf32>
    %796 = vector.extract_strided_slice %794 {offsets = [0, 128], sizes = [8, 128], strides = [1, 1]} : vector<8x256xf32> to vector<8x128xf32>
    %cst_185 = arith.constant 5.000000e-01 : f32
    %797 = vector.broadcast %cst_185 : f32 to vector<8x64xf32>
    %798 = arith.mulf %797, %795 : vector<8x64xf32>
    %799 = math.tanh %798 : vector<8x64xf32>
    %800 = vector.extract_strided_slice %799 {offsets = [0, 0], sizes = [8, 48], strides = [1, 1]} : vector<8x64xf32> to vector<8x48xf32>
    %cst_186 = arith.constant 1.000000e+00 : f32
    %801 = vector.broadcast %cst_186 : f32 to vector<8x48xf32>
    %802 = arith.addf %800, %801 : vector<8x48xf32>
    %cst_187 = arith.constant 5.000000e-01 : f32
    %803 = vector.broadcast %cst_187 : f32 to vector<8x48xf32>
    %804 = arith.mulf %803, %802 : vector<8x48xf32>
    %805 = vector.extract_strided_slice %804 {offsets = [0, 0], sizes = [8, 16], strides = [1, 1]} : vector<8x48xf32> to vector<8x16xf32>
    %806 = vector.extract_strided_slice %804 {offsets = [0, 16], sizes = [8, 16], strides = [1, 1]} : vector<8x48xf32> to vector<8x16xf32>
    %807 = vector.extract_strided_slice %804 {offsets = [0, 32], sizes = [8, 16], strides = [1, 1]} : vector<8x48xf32> to vector<8x16xf32>
    %808 = vector.extract_strided_slice %799 {offsets = [0, 48], sizes = [8, 16], strides = [1, 1]} : vector<8x64xf32> to vector<8x16xf32>
    %809 = arith.mulf %806, %733 : vector<8x16xf32>
    %810 = arith.mulf %805, %808 : vector<8x16xf32>
    %811 = arith.addf %809, %810 : vector<8x16xf32>
    %812 = math.tanh %811 : vector<8x16xf32>
    %813 = arith.mulf %807, %812 : vector<8x16xf32>
    %814 = tpu.concatenate %813, %775 in 1 : vector<8x16xf32>, vector<8x32xf32> -> vector<8x48xf32>
    %cst_188 = arith.constant dense<0.000000e+00> : vector<8x24xf32>
    %815 = tpu.matmul %814, %1, %cst_188 {dimension_numbers = #tpu.dot_dimension_numbers<[1], [0], [0], [1], [0, 0, 1, 1], [], []>} : vector<8x48xf32>, vector<48x24xf32>, vector<8x24xf32> -> vector<8x24xf32>
    %816 = vector.broadcast %2 : vector<1x24xf32> to vector<8x24xf32>
    %817 = arith.addf %815, %816 : vector<8x24xf32>
    %818 = vector.extract_strided_slice %817 {offsets = [0, 0], sizes = [8, 8], strides = [1, 1]} : vector<8x24xf32> to vector<8x8xf32>
    %819 = math.exp %818 : vector<8x8xf32>
    %820 = vector.extract_strided_slice %817 {offsets = [0, 8], sizes = [8, 16], strides = [1, 1]} : vector<8x24xf32> to vector<8x16xf32>
    %cst_189 = arith.constant 0.000000e+00 : f32
    %821 = vector.broadcast %cst_189 : f32 to vector<8x16xf32>
    %822 = arith.maximumf %820, %821 : vector<8x16xf32>
    %cst_190 = arith.constant dense<0.000000e+00> : vector<8x128xf32>
    %823 = tpu.matmul %819, %3, %cst_190 {dimension_numbers = #tpu.dot_dimension_numbers<[1], [0], [0], [1], [0, 0, 1, 1], [], []>} : vector<8x8xf32>, vector<8x128xf32>, vector<8x128xf32> -> vector<8x128xf32>
    %cst_191 = arith.constant dense<0.000000e+00> : vector<8xf32>
    %824 = vector.multi_reduction <add>, %819, %cst_191 [1] : vector<8x8xf32> to vector<8xf32>
    %825 = vector.shape_cast %824 : vector<8xf32> to vector<8x1xf32>
    %826 = tpu.reciprocal %825 {approx = true} : vector<8x1xf32> -> vector<8x1xf32>
    %827 = arith.mulf %825, %826 : vector<8x1xf32>
    %cst_192 = arith.constant 2.000000e+00 : f32
    %828 = vector.broadcast %cst_192 : f32 to vector<8x1xf32>
    %829 = arith.subf %828, %827 : vector<8x1xf32>
    %830 = arith.mulf %826, %829 : vector<8x1xf32>
    %831 = vector.broadcast %830 : vector<8x1xf32> to vector<8x8xf32>
    %832 = arith.mulf %819, %831 : vector<8x8xf32>
    %833 = vector.broadcast %830 : vector<8x1xf32> to vector<8x128xf32>
    %834 = arith.mulf %833, %823 : vector<8x128xf32>
    %835 = arith.addf %796, %834 : vector<8x128xf32>
    %836 = tpu.concatenate %813, %822 in 1 : vector<8x16xf32>, vector<8x16xf32> -> vector<8x32xf32>
    %cst_193 = arith.constant 5.000000e-01 : f32
    %837 = vector.broadcast %cst_193 : f32 to vector<8x128xf32>
    %838 = arith.mulf %837, %835 : vector<8x128xf32>
    %839 = math.tanh %838 : vector<8x128xf32>
    %840 = vector.extract_strided_slice %839 {offsets = [0, 0], sizes = [8, 96], strides = [1, 1]} : vector<8x128xf32> to vector<8x96xf32>
    %cst_194 = arith.constant 1.000000e+00 : f32
    %841 = vector.broadcast %cst_194 : f32 to vector<8x96xf32>
    %842 = arith.addf %840, %841 : vector<8x96xf32>
    %cst_195 = arith.constant 5.000000e-01 : f32
    %843 = vector.broadcast %cst_195 : f32 to vector<8x96xf32>
    %844 = arith.mulf %843, %842 : vector<8x96xf32>
    %845 = vector.extract_strided_slice %844 {offsets = [0, 0], sizes = [8, 32], strides = [1, 1]} : vector<8x96xf32> to vector<8x32xf32>
    %846 = vector.extract_strided_slice %844 {offsets = [0, 32], sizes = [8, 32], strides = [1, 1]} : vector<8x96xf32> to vector<8x32xf32>
    %847 = vector.extract_strided_slice %844 {offsets = [0, 64], sizes = [8, 32], strides = [1, 1]} : vector<8x96xf32> to vector<8x32xf32>
    %848 = vector.extract_strided_slice %839 {offsets = [0, 96], sizes = [8, 32], strides = [1, 1]} : vector<8x128xf32> to vector<8x32xf32>
    %849 = arith.mulf %846, %836 : vector<8x32xf32>
    %850 = arith.mulf %845, %848 : vector<8x32xf32>
    %851 = arith.addf %849, %850 : vector<8x32xf32>
    %852 = math.tanh %851 : vector<8x32xf32>
    %853 = arith.mulf %847, %852 : vector<8x32xf32>
    %cst_196 = arith.constant dense<0.000000e+00> : vector<8x8xf32>
    %854 = tpu.matmul %853, %4, %cst_196 {dimension_numbers = #tpu.dot_dimension_numbers<[1], [0], [0], [1], [0, 0, 1, 1], [], []>} : vector<8x32xf32>, vector<32x8xf32>, vector<8x8xf32> -> vector<8x8xf32>
    %855 = vector.broadcast %5 : vector<1x8xf32> to vector<8x8xf32>
    %856 = arith.addf %854, %855 : vector<8x8xf32>
    %857 = math.exp %856 : vector<8x8xf32>
    %cst_197 = arith.constant dense<0.000000e+00> : vector<8xf32>
    %858 = vector.multi_reduction <add>, %857, %cst_197 [1] : vector<8x8xf32> to vector<8xf32>
    %859 = vector.shape_cast %858 : vector<8xf32> to vector<8x1xf32>
    %860 = tpu.reciprocal %859 {approx = true} : vector<8x1xf32> -> vector<8x1xf32>
    %861 = arith.mulf %859, %860 : vector<8x1xf32>
    %cst_198 = arith.constant 2.000000e+00 : f32
    %862 = vector.broadcast %cst_198 : f32 to vector<8x1xf32>
    %863 = arith.subf %862, %861 : vector<8x1xf32>
    %864 = arith.mulf %860, %863 : vector<8x1xf32>
    %865 = vector.broadcast %864 : vector<8x1xf32> to vector<8x8xf32>
    %866 = arith.mulf %857, %865 : vector<8x8xf32>
    %867 = tpu.concatenate %832, %866 in 1 : vector<8x8xf32>, vector<8x8xf32> -> vector<8x16xf32>
    %c10 = arith.constant 10 : index
    %c0_199 = arith.constant 0 : index
    %c0_200 = arith.constant 0 : index
    %868 = vector.load %arg3[%c10, %c0_199, %c0_200] : memref<12x8x16xf32, #tpu.memory_space<vmem>>, vector<1x8x16xf32>
    %869 = vector.shape_cast %868 : vector<1x8x16xf32> to vector<8x16xf32>
    %870 = vector.shape_cast %867 : vector<8x16xf32> to vector<1x8x16xf32>
    tpu.vector_store %arg3[%c10, %c0_199, %c0_200], %870 {strides = array<i32>} : memref<12x8x16xf32, #tpu.memory_space<vmem>>, vector<1x8x16xf32>,
    %871 = tpu.concatenate %832, %813, %866, %851, %12 in 1 : vector<8x8xf32>, vector<8x16xf32>, vector<8x8xf32>, vector<8x32xf32>, vector<8x8xf32> -> vector<8x72xf32>
    %cst_201 = arith.constant dense<0.000000e+00> : vector<8x256xf32>
    %872 = tpu.matmul %871, %0, %cst_201 {dimension_numbers = #tpu.dot_dimension_numbers<[1], [0], [0], [1], [0, 0, 1, 1], [], []>} : vector<8x72xf32>, vector<72x256xf32>, vector<8x256xf32> -> vector<8x256xf32>
    %873 = vector.extract_strided_slice %872 {offsets = [0, 0], sizes = [8, 64], strides = [1, 1]} : vector<8x256xf32> to vector<8x64xf32>
    %874 = vector.extract_strided_slice %872 {offsets = [0, 128], sizes = [8, 128], strides = [1, 1]} : vector<8x256xf32> to vector<8x128xf32>
    %cst_202 = arith.constant 5.000000e-01 : f32
    %875 = vector.broadcast %cst_202 : f32 to vector<8x64xf32>
    %876 = arith.mulf %875, %873 : vector<8x64xf32>
    %877 = math.tanh %876 : vector<8x64xf32>
    %878 = vector.extract_strided_slice %877 {offsets = [0, 0], sizes = [8, 48], strides = [1, 1]} : vector<8x64xf32> to vector<8x48xf32>
    %cst_203 = arith.constant 1.000000e+00 : f32
    %879 = vector.broadcast %cst_203 : f32 to vector<8x48xf32>
    %880 = arith.addf %878, %879 : vector<8x48xf32>
    %cst_204 = arith.constant 5.000000e-01 : f32
    %881 = vector.broadcast %cst_204 : f32 to vector<8x48xf32>
    %882 = arith.mulf %881, %880 : vector<8x48xf32>
    %883 = vector.extract_strided_slice %882 {offsets = [0, 0], sizes = [8, 16], strides = [1, 1]} : vector<8x48xf32> to vector<8x16xf32>
    %884 = vector.extract_strided_slice %882 {offsets = [0, 16], sizes = [8, 16], strides = [1, 1]} : vector<8x48xf32> to vector<8x16xf32>
    %885 = vector.extract_strided_slice %882 {offsets = [0, 32], sizes = [8, 16], strides = [1, 1]} : vector<8x48xf32> to vector<8x16xf32>
    %886 = vector.extract_strided_slice %877 {offsets = [0, 48], sizes = [8, 16], strides = [1, 1]} : vector<8x64xf32> to vector<8x16xf32>
    %887 = arith.mulf %884, %811 : vector<8x16xf32>
    %888 = arith.mulf %883, %886 : vector<8x16xf32>
    %889 = arith.addf %887, %888 : vector<8x16xf32>
    %890 = math.tanh %889 : vector<8x16xf32>
    %891 = arith.mulf %885, %890 : vector<8x16xf32>
    %892 = tpu.concatenate %891, %853 in 1 : vector<8x16xf32>, vector<8x32xf32> -> vector<8x48xf32>
    %cst_205 = arith.constant dense<0.000000e+00> : vector<8x24xf32>
    %893 = tpu.matmul %892, %1, %cst_205 {dimension_numbers = #tpu.dot_dimension_numbers<[1], [0], [0], [1], [0, 0, 1, 1], [], []>} : vector<8x48xf32>, vector<48x24xf32>, vector<8x24xf32> -> vector<8x24xf32>
    %894 = vector.broadcast %2 : vector<1x24xf32> to vector<8x24xf32>
    %895 = arith.addf %893, %894 : vector<8x24xf32>
    %896 = vector.extract_strided_slice %895 {offsets = [0, 0], sizes = [8, 8], strides = [1, 1]} : vector<8x24xf32> to vector<8x8xf32>
    %897 = math.exp %896 : vector<8x8xf32>
    %898 = vector.extract_strided_slice %895 {offsets = [0, 8], sizes = [8, 16], strides = [1, 1]} : vector<8x24xf32> to vector<8x16xf32>
    %cst_206 = arith.constant 0.000000e+00 : f32
    %899 = vector.broadcast %cst_206 : f32 to vector<8x16xf32>
    %900 = arith.maximumf %898, %899 : vector<8x16xf32>
    %cst_207 = arith.constant dense<0.000000e+00> : vector<8x128xf32>
    %901 = tpu.matmul %897, %3, %cst_207 {dimension_numbers = #tpu.dot_dimension_numbers<[1], [0], [0], [1], [0, 0, 1, 1], [], []>} : vector<8x8xf32>, vector<8x128xf32>, vector<8x128xf32> -> vector<8x128xf32>
    %cst_208 = arith.constant dense<0.000000e+00> : vector<8xf32>
    %902 = vector.multi_reduction <add>, %897, %cst_208 [1] : vector<8x8xf32> to vector<8xf32>
    %903 = vector.shape_cast %902 : vector<8xf32> to vector<8x1xf32>
    %904 = tpu.reciprocal %903 {approx = true} : vector<8x1xf32> -> vector<8x1xf32>
    %905 = arith.mulf %903, %904 : vector<8x1xf32>
    %cst_209 = arith.constant 2.000000e+00 : f32
    %906 = vector.broadcast %cst_209 : f32 to vector<8x1xf32>
    %907 = arith.subf %906, %905 : vector<8x1xf32>
    %908 = arith.mulf %904, %907 : vector<8x1xf32>
    %909 = vector.broadcast %908 : vector<8x1xf32> to vector<8x8xf32>
    %910 = arith.mulf %897, %909 : vector<8x8xf32>
    %911 = vector.broadcast %908 : vector<8x1xf32> to vector<8x128xf32>
    %912 = arith.mulf %911, %901 : vector<8x128xf32>
    %913 = arith.addf %874, %912 : vector<8x128xf32>
    %914 = tpu.concatenate %891, %900 in 1 : vector<8x16xf32>, vector<8x16xf32> -> vector<8x32xf32>
    %cst_210 = arith.constant 5.000000e-01 : f32
    %915 = vector.broadcast %cst_210 : f32 to vector<8x128xf32>
    %916 = arith.mulf %915, %913 : vector<8x128xf32>
    %917 = math.tanh %916 : vector<8x128xf32>
    %918 = vector.extract_strided_slice %917 {offsets = [0, 0], sizes = [8, 96], strides = [1, 1]} : vector<8x128xf32> to vector<8x96xf32>
    %cst_211 = arith.constant 1.000000e+00 : f32
    %919 = vector.broadcast %cst_211 : f32 to vector<8x96xf32>
    %920 = arith.addf %918, %919 : vector<8x96xf32>
    %cst_212 = arith.constant 5.000000e-01 : f32
    %921 = vector.broadcast %cst_212 : f32 to vector<8x96xf32>
    %922 = arith.mulf %921, %920 : vector<8x96xf32>
    %923 = vector.extract_strided_slice %922 {offsets = [0, 0], sizes = [8, 32], strides = [1, 1]} : vector<8x96xf32> to vector<8x32xf32>
    %924 = vector.extract_strided_slice %922 {offsets = [0, 32], sizes = [8, 32], strides = [1, 1]} : vector<8x96xf32> to vector<8x32xf32>
    %925 = vector.extract_strided_slice %922 {offsets = [0, 64], sizes = [8, 32], strides = [1, 1]} : vector<8x96xf32> to vector<8x32xf32>
    %926 = vector.extract_strided_slice %917 {offsets = [0, 96], sizes = [8, 32], strides = [1, 1]} : vector<8x128xf32> to vector<8x32xf32>
    %927 = arith.mulf %924, %914 : vector<8x32xf32>
    %928 = arith.mulf %923, %926 : vector<8x32xf32>
    %929 = arith.addf %927, %928 : vector<8x32xf32>
    %930 = math.tanh %929 : vector<8x32xf32>
    %931 = arith.mulf %925, %930 : vector<8x32xf32>
    %cst_213 = arith.constant dense<0.000000e+00> : vector<8x8xf32>
    %932 = tpu.matmul %931, %4, %cst_213 {dimension_numbers = #tpu.dot_dimension_numbers<[1], [0], [0], [1], [0, 0, 1, 1], [], []>} : vector<8x32xf32>, vector<32x8xf32>, vector<8x8xf32> -> vector<8x8xf32>
    %933 = vector.broadcast %5 : vector<1x8xf32> to vector<8x8xf32>
    %934 = arith.addf %932, %933 : vector<8x8xf32>
    %935 = math.exp %934 : vector<8x8xf32>
    %cst_214 = arith.constant dense<0.000000e+00> : vector<8xf32>
    %936 = vector.multi_reduction <add>, %935, %cst_214 [1] : vector<8x8xf32> to vector<8xf32>
    %937 = vector.shape_cast %936 : vector<8xf32> to vector<8x1xf32>
    %938 = tpu.reciprocal %937 {approx = true} : vector<8x1xf32> -> vector<8x1xf32>
    %939 = arith.mulf %937, %938 : vector<8x1xf32>
    %cst_215 = arith.constant 2.000000e+00 : f32
    %940 = vector.broadcast %cst_215 : f32 to vector<8x1xf32>
    %941 = arith.subf %940, %939 : vector<8x1xf32>
    %942 = arith.mulf %938, %941 : vector<8x1xf32>
    %943 = vector.broadcast %942 : vector<8x1xf32> to vector<8x8xf32>
    %944 = arith.mulf %935, %943 : vector<8x8xf32>
    %945 = tpu.concatenate %910, %944 in 1 : vector<8x8xf32>, vector<8x8xf32> -> vector<8x16xf32>
    %c11 = arith.constant 11 : index
    %c0_216 = arith.constant 0 : index
    %c0_217 = arith.constant 0 : index
    %946 = vector.load %arg3[%c11, %c0_216, %c0_217] : memref<12x8x16xf32, #tpu.memory_space<vmem>>, vector<1x8x16xf32>
    %947 = vector.shape_cast %946 : vector<1x8x16xf32> to vector<8x16xf32>
    %948 = vector.shape_cast %945 : vector<8x16xf32> to vector<1x8x16xf32>
    tpu.vector_store %arg3[%c11, %c0_216, %c0_217], %948 {strides = array<i32>} : memref<12x8x16xf32, #tpu.memory_space<vmem>>, vector<1x8x16xf32>,
    return
  }
  func.func @transform_0(%arg0: i32) -> (i32, i32) {
    %c0_i32 = arith.constant 0 : i32
    %c0_i32_0 = arith.constant 0 : i32
    return %arg0, %c0_i32 : i32, i32
  }
  func.func @transform_1(%arg0: i32) -> (i32, i32) {
    %c0_i32 = arith.constant 0 : i32
    %c0_i32_0 = arith.constant 0 : i32
    %c0_i32_1 = arith.constant 0 : i32
    return %c0_i32, %c0_i32_0 : i32, i32
  }
  func.func @transform_2(%arg0: i32) -> (i32, i32, i32) {
    %c0_i32 = arith.constant 0 : i32
    %c0_i32_0 = arith.constant 0 : i32
    %c0_i32_1 = arith.constant 0 : i32
    return %c0_i32, %arg0, %c0_i32_0 : i32, i32, i32
  }
}

</mosaic_0001>

<bundles_post_ra>
// kernel: tpu_custom_call.1
= control target key start
LH: loop header
LB: loop body
LE: loop exit
PB: predicated region body
PF: predicated region fallthrough
CT: control target
= control target key end

     0   :  { %7 = vsyncpa [#allocation3], 0  ;;  %s4625_s0 = inlined_call_operand.hbm [shape: f32[16,48], index: 0, kind: input, shape index: {}]   ;;  %s4626_s1 = inlined_call_operand.hbm [shape: f32[176,256], index: 1, kind: input, shape index: {}]   ;;  %s4627_s2 = inlined_call_operand.hbm [shape: f32[12,16,16], index: 2, kind: output, shape index: {}]  }
   0x1   :  { %9 = vsyncpa [#allocation3 + $0x1], 0 }
   0x2   :  { %10 = vsyncpa [#allocation6], 0 }
   0x3   :  { %11 = vsyncpa [#allocation4], 0 }
   0x4   :  { %13 = vsyncpa [#allocation4 + $0x1], 0  ;;  %s3432_s9 = smov 0   ;;  %s3434_s10 = smov 0  }
   0x5   :  { %s3436_s11 = smov 0   ;;  %s3438_s12 = smov 0  }
   0x6 LB: > { %s108_s15 = sshll.u32 %s4626_s1, 4  ;;  %s3456_s16 = sadd.s32 4294967295, %s3402_s12   ;;  %s3402_s12 = sphi %s3438_s12, %s4640_s12   ;;  %s3398_s11 = sphi %s3436_s11, %s4639_s11   ;;  %s3394_s10 = sphi %s3434_s10, %s4638_s10   ;;  %s3390_s9 = sphi %s3432_s9, %s4637_s9   ;;  %s109_s15 = int_to_ptr.hbm [resolvable:$true] %s108_s15 }
   0x7   : > { %p2866_p0 = scmp.ge.s32.totalorder %s3402_s12, 1  ;;  %p40_p1 = scmp.eq.s32.totalorder %s3456_s16, 0 }
   0x8   : > { %p97_p2 = scmp.lt.s32.totalorder %s3402_s12, 3  ;;  %s3404_s18 = smov [#allocation5]  }
   0x9   : > { %s110_s19 = sshll.u32 %s3404_s18, 4  ;;  %s3405_s20 = smov 256   ;;  %s111_s19 = int_to_ptr.vmem [resolvable:$true] %s110_s19 }
   0xa   : > { %p3461_p3 = pnand %p2866_p0, %p97_p2  ;;  %s3406_s21 = smov 16  }
   0xb   : > { %s2865_s22 = sadd.s32 4294967294, %s3402_s12   ;;  %s3472_s23 = sadd.s32 1, %s3402_s12  }
   0xc   : > { %p2957_p4 = pneg %p3461_p3  ;;  %s26_s24 = sadd.s32 1, %s3398_s11 }
   0xd   : > { %s23_s25 = ssub.s32 %s3402_s12, %s3472_s23  ;;  %p33_p7 = scmp.ne.s32.totalorder %s3398_s11, %s3394_s10 }
   0xe   : > { %p2958_p6 = pnand %p2957_p4, %p40_p1  ;;  %p24_p8 = scmp.eq.s32.totalorder %s23_s25, 0 }
   0xf   : > { %p34_p9 = scmp.eq.s32.totalorder %s3402_s12, 0  ;;  %p39_p10 = scmp.ne.s32.totalorder %s3394_s10, %s3390_s9 }
  0x10   : > { %2960 = dma.hbm_to_vmem [thread:$0]  (!%p2958_p6), %s109_s15, 5632, %s111_s19, [#allocation6], %s3405_s20, %s3405_s20, %s3406_s21  }
  0x11   : > { %p84_p11 = scmp.eq.s32.totalorder %s3456_s16, 1  ;;  %p3488_p12 = por %p40_p1, %p39_p10 }
  0x12   : > { %s3484_s26 = scalar_select %p24_p8, %s3398_s11, %s26_s24  }
  0x13   : > { %p3492_p13 = por %p84_p11, %p33_p7  ;;  %p90_p0 = scmp.eq.s32.totalorder %s2865_s22, 1 }
  0x14   : > { %p35_p2 = por %p34_p9, %p33_p7  ;;  %s124_s29 = sand.u32 1, %s3398_s11  }
  0x15   : > { %p3497_p4 = por %p90_p0, %p39_p10  ;;  %p2970_p6 = scmp.lt.s32.totalorder %s3402_s12, 2 }
  0x16   : > { %s2869_s3 = sshll.u32 %s124_s29, 3  ;;  %s2870_s4 = sshll.u32 %s3402_s12, 3 }
  0x17   : > { %s132_s7 = scalar_lea.hbm %s4625_s0, %s2870_s4  ;;  %s128_s13 = scalar_lea.vmem [#allocation2], %s2869_s3 }
  0x18   : > { %s134_s8 = sshll.u32 %s132_s7, 4  ;;  %s136_s14 = sshll.u32 %s128_s13, 4  ;;  %s135_s8 = int_to_ptr.hbm [resolvable:$true] %s134_s8  ;;  %s137_s14 = int_to_ptr.vmem [resolvable:$true] %s136_s14 }
  0x19   : > { %p3506_p8 = pnand %p2970_p6, %p35_p2  ;;  %s125_s18 = scalar_lea.sflag [#allocation3], %s124_s29 }
  0x1a   : > { %s3302_s19 = sshra.s32 %s135_s8, 4  ;;  %s3309_s24 = scalar_lea.hbm %s4625_s0, 16  ;;  %s3303_s19 = int_to_ptr.hbm [resolvable:$true] %s3302_s19 }
  0x1b   : > { %s3304_s20 = scalar_lea.hbm %s3303_s19, 8  ;;  %p3306_p9 = pneg %p3506_p8 }
  0x1c   : > { %p3305_p7 = scmp.ne.s32.totalorder %s3303_s19, %s3304_s20  ;;  %p3310_p0 = scmp.lt.s32.totalorder %s3303_s19, %s4625_s0 }
  0x1d   : > { %p3311_p2 = scmp.lt.s32.totalorder %s3309_s24, %s3304_s20 }
  0x1e   : > { %p3307_p10 = pnand %p3306_p9, %p3305_p7 }
  0x1f   : > { %p3312_p6 = por %p3311_p2, %p3310_p0 }
  0x20   : > { %p3308_p11 = pneg %p3307_p10 }
  0x22   : > { %p3313_p5 = pnand %p3312_p6, %p3308_p11 }
  0x24   : > { %3316 = shalt.err (!%p3313_p5)
}
  0x25   : > { %2964 = dma.hbm_to_vmem [thread:$0]  (!%p3506_p8), %s135_s8, 128, %s137_s14, %s125_s18  }
  0x26   : > { %145 = sbr.rel (%p3461_p3) target bundleno = 20279 (0x4f37), region = 28 }
  0x2b   : > { %s3523_s29 = sand.u32 1, %s3394_s10  }
  0x2c   : > { %s2872_s4 = sshll.u32 %s3523_s29, 3  ;;  %s148_s5 = scalar_lea.sflag [#allocation3], %s3523_s29 }
  0x2d   : > { %s151_s6 = scalar_lea.vmem [#allocation2], %s2872_s4 }
  0x2e   : > { %3377 = dma.done.wait (%p3488_p12), %s148_s5, 128  }
  0x2f   : > { %3379 = vsyncadd (%p3488_p12), %s148_s5, 4294967168 }
  0x30   : > { %3381 = dma.done.wait (%p40_p1), [#allocation6], 5632  }
  0x31   : > { %3383 = vsyncadd (%p40_p1), [#allocation6], 4294961664  ;;  %v3535_v0 = vld [vmem:[%s151_s6] sm:$0xff]  ;;  %v3537_v1 = vld [vmem:[#allocation5 + $0x80] sm:$0xff]  ;;  %s3407_s17 = smov 8   ;;  %vm214_vm0 = vcmask 64512  }
  0x32   : > { %v3539_v2 = vld [vmem:[#allocation5 + $0x88] sm:$0xff]  ;;  %211 = vrot.lane.b32.xlu0 %v3535_v0, %s3407_s17  ;;  %233 = vmatpush.msra.mxu0 %v3537_v1  ;;  %v3544_v3 = vld [vmem:[#allocation5 + $0x70] sm:$0xff]  ;;  %v3546_v4 = vld [vmem:[#allocation5 + $0x78] sm:$0xff]  ;;  %vm216_vm1 = vcmask 195584   ;;  %vm218_vm2 = vcmask 261120   ;;  %vm220_vm3 = vcmask 523264  }
  0x33   : > { %253 = vmatpush.msra.mxu1 %v3539_v2  ;;  %v3549_v5 = vld [vmem:[#allocation5 + $0x60] sm:$0xff]  ;;  %v3552_v6 = vld [vmem:[#allocation5 + $0x68] sm:$0xff]  ;;  %v3555_v7 = vld [vmem:[#allocation5 + $0x50] sm:$0xff]  ;;  %vm222_vm4 = vcmask 588800   ;;  %s3408_s27 = smov 80   ;;  %s3409_s7 = smov 16  }
  0x34   : > { %234 = vmatpush.msra.mxu0 %v3544_v3  ;;  %v3558_v8 = vld [vmem:[#allocation5 + $0x58] sm:$0xff]  ;;  %v3561_v9 = vld [vmem:[#allocation5 + $0x40] sm:$0xff]  ;;  %v3564_v10 = vld [vmem:[#allocation5 + $0x48] sm:$0xff]  ;;  %s3410_s8 = smov 96   ;;  %vm291_vm5 = vcmask 130048   ;;  %vm293_vm6 = vcmask 392192  }
  0x35   : > { %254 = vmatpush.msra.mxu1 %v3546_v4  ;;  %v3567_v11 = vld [vmem:[#allocation5 + $0x30] sm:$0xff]  ;;  %v3570_v12 = vld [vmem:[#allocation5 + $0x38] sm:$0xff]  ;;  %v3575_v13 = vld [vmem:[#allocation5 + $0x20] sm:$0xff]  ;;  %s3411_s13 = smov 32   ;;  %s3412_s14 = smov 64  }
  0x36   : > { %235 = vmatpush.msra.mxu0 %v3549_v5  ;;  %v3577_v14 = vld [vmem:[#allocation5 + $0x28] sm:$0xff]  ;;  %v3581_v15 = vld [vmem:[#allocation5 + $0x10] sm:$0xff]  ;;  %v3583_v16 = vld [vmem:[#allocation5 + $0x18] sm:$0xff]  ;;  %s3413_s15 = smov 104   ;;  %s3414_s18 = smov 24  }
  0x37   : > { %255 = vmatpush.msra.mxu1 %v3552_v6  ;;  %v3587_v17 = vld [vmem:[#allocation5] sm:$0xff]  ;;  %v3589_v18 = vld [vmem:[#allocation5 + $0x8] sm:$0xff]  ;;  %v3607_v36 = vld [vmem:[#allocation5 + $0xd0] sm:$0xff]  ;;  %s2948_s19 = smul.u32 96, %s3523_s29  ;;  %s2945_s21 = sshll.u32 %s3456_s16, 3 }
  0x38   : > { %236 = vmatpush.msra.mxu0 %v3555_v7  ;;  %v3605_v35 = vld [vmem:[#allocation5 + $0xe0] sm:$0xff]  ;;  %v3615_v38 = vld [vmem:[#allocation5 + $0xb0] sm:$0xff]  ;;  %s2778_s25 = scalar_lea.hbm %s4627_s2, %s2945_s21  ;;  %s2768_s5 = scalar_lea.sflag [#allocation4], %s3523_s29 }
  0x39   : > { %256 = vmatpush.msra.mxu1 %v3558_v8  ;;  %307 = vmatpush.msra.mxu2 %v3605_v35  ;;  %v3611_v37 = vld [vmem:[#allocation5 + $0xc0] sm:$0xff]  ;;  %v3629_v42 = vld [vmem:[#allocation5 + $0x90] sm:$0xff]  ;;  %s4522_s20 = scalar_lea.vmem [#allocation7], %s2948_s19  ;;  %s2781_s4 = sshll.u32 %s2778_s25, 4  ;;  %s2782_s4 = int_to_ptr.hbm [resolvable:$true] %s2781_s4 }
  0x3a   : > { %237 = vmatpush.msra.mxu0 %v3561_v9  ;;  %v3619_v39 = vld [vmem:[#allocation5 + $0xa0] sm:$0xff]  ;;  %v3664_v46 = vld [vmem:[#allocation5 + $0xf0] ss:$0 sm:$0xff]  ;;  %s2779_s3 = sshll.u32 %s4522_s20, 4  ;;  %s3346_s6 = sshra.s32 %s2782_s4, 4  ;;  %s2780_s3 = int_to_ptr.vmem [resolvable:$true] %s2779_s3  ;;  %s3347_s6 = int_to_ptr.hbm [resolvable:$true] %s3346_s6 }
  0x3b   : > { %257 = vmatpush.msra.mxu1 %v3564_v10  ;;  %308 = vmatpush.msra.mxu2 %v3607_v36  ;;  %v3660_v45 = vld [vmem:[#allocation5 + $0x100] sm:$0xff]  ;;  %s3348_s16 = scalar_lea.hbm %s3347_s6, 96  ;;  %p3353_p12 = scmp.lt.s32.totalorder %s3347_s6, %s4627_s2 }
  0x3c   : > { %238 = vmatpush.msra.mxu0 %v3567_v11  ;;  %338 = vmatpush.msra.mxu3 %v3660_v45  ;;  %p3349_p1 = scmp.ne.s32.totalorder %s3347_s6, %s3348_s16 }
  0x3d   : > { %258 = vmatpush.msra.mxu1 %v3570_v12  ;;  %309 = vmatpush.msra.mxu2 %v3611_v37 }
  0x3e   : > { %239 = vmatpush.msra.mxu0 %v3575_v13  ;;  %p3350_p3 = pnand %p3349_p1, %p3492_p13 }
  0x3f   : > { %259 = vmatpush.msra.mxu1 %v3577_v14  ;;  %310 = vmatpush.msra.mxu2 %v3615_v38 }
  0x40   : > { %240 = vmatpush.msra.mxu0 %v3581_v15  ;;  %p3351_p5 = pneg %p3350_p3 }
  0x41   : > { %260 = vmatpush.msra.mxu1 %v3583_v16  ;;  %311 = vmatpush.msra.mxu2 %v3619_v39 }
  0x42   : > { %241 = vmatpush.msra.mxu0 %v3587_v17 }
  0x43   : > { %261 = vmatpush.msra.mxu1 %v3589_v18  ;;  %312 = vmatpush.msra.mxu2 %v3629_v42 }
  0x44   : > { %519 = vmatpush.msrb.mxu0 %v3605_v35 }
  0x45   : > { %464 = vmatpush.msrb.mxu2 %v3539_v2  ;;  %550 = vmatpush.msrb.mxu1 %v3660_v45 }
  0x46   : > { %520 = vmatpush.msrb.mxu0 %v3607_v36 }
  0x47   : > { %465 = vmatpush.msrb.mxu2 %v3546_v4 }
  0x48   : > { %521 = vmatpush.msrb.mxu0 %v3611_v37 }
  0x49   : > { %466 = vmatpush.msrb.mxu2 %v3552_v6 }
  0x4a   : > { %522 = vmatpush.msrb.mxu0 %v3615_v38 }
  0x4b   : > { %467 = vmatpush.msrb.mxu2 %v3558_v8 }
  0x4c   : > { %523 = vmatpush.msrb.mxu0 %v3619_v39 }
  0x4d   : > { %468 = vmatpush.msrb.mxu2 %v3564_v10 }
  0x4e   : > { %524 = vmatpush.msrb.mxu0 %v3629_v42 }
  0x4f   : > { %469 = vmatpush.msrb.mxu2 %v3570_v12 }
  0x51   : > { %470 = vmatpush.msrb.mxu2 %v3577_v14 }
  0x53   : > { %471 = vmatpush.msrb.mxu2 %v3583_v16 }
  0x55   : > { %472 = vmatpush.msrb.mxu2 %v3589_v18 }
  0xa4   : > { %v212_v19 = vpop.permute.xlu0 %211 }
  0xa5   : > { %v215_v20 = vsel %vm214_vm0, 0.125, %v212_v19 }
  0xa6   : > { %v217_v21 = vsel %vm216_vm1, %v215_v20, 0.125 }
  0xa7   : > { %v219_v22 = vsel %vm218_vm2, %v217_v21, 0.0 }
  0xa8   : > { %v221_v23 = vsel %vm220_vm3, %v219_v22, 1.0 }
  0xa9   : > { %2874 = vmatmul.msk.f32.vlgmr.msra.gmra.mxu0 %vm222_vm4, %v221_v23  ;;  %2875 = vmatmul.msk.f32.vlgmr.msra.gmra.mxu1 %vm222_vm4, %v221_v23 }
  0xaa   : > { %677 = vmatpush.msra.mxu0 %v3539_v2 }
  0xac   : > { %678 = vmatpush.msra.mxu0 %v3546_v4 }
  0xae   : > { %679 = vmatpush.msra.mxu0 %v3552_v6 }
  0xb0   : > { %680 = vmatpush.msra.mxu0 %v3558_v8 }
  0xb2   : > { %681 = vmatpush.msra.mxu0 %v3564_v10 }
  0xb4   : > { %682 = vmatpush.msra.mxu0 %v3570_v12 }
  0xb6   : > { %683 = vmatpush.msra.mxu0 %v3577_v14 }
  0xb8   : > { %684 = vmatpush.msra.mxu0 %v3583_v16 }
  0xba   : > { %685 = vmatpush.msra.mxu0 %v3589_v18 }
 0x126   : > { %v243_v24 = vpop.f32.mrf.mxu0  ;;  %v263_v62 = vpop.f32.mrf.mxu1 }
 0x127   : > { %v266_v25 = vmul.f32 0.5, %v243_v24 }
 0x129   : > { %3018 = vtanh.f32 %v266_v25 }
 0x12f   : > { %v3019_v26 = vpop.eup %3018 }
 0x130   : > { %272 = vrot.lane.b32.xlu0 %v3019_v26, %s3408_s27  ;;  %v268_v27 = vadd.f32 1.0, %v3019_v26 }
 0x132   : > { %v269_v28 = vmul.f32 0.5, %v268_v27 }
 0x134   : > { %v270_v31 = vmul.f32 0.0, %v269_v28 }
 0x1a2   : > { %v273_v29 = vpop.permute.xlu0 %272 }
 0x1a3   : > { %v275_v30 = vmul.f32 %v273_v29, %v269_v28  ;;  %v3685_v29 = vld [vmem:[#allocation5 + $0x140] sm:$0xff] }
 0x1a4   : > { %400 = vmatpush.msrb.mxu3 %v3685_v29  ;;  %612 = vmatpush.msra.mxu1 %v3685_v29 }
 0x1a5   : > { %277 = vrot.lane.b32.xlu1 %v275_v30, %s3409_s7  ;;  %v3687_v30 = vld [vmem:[#allocation5 + $0x130] sm:$0xff] }
 0x1a6   : > { %401 = vmatpush.msrb.mxu3 %v3687_v30  ;;  %613 = vmatpush.msra.mxu1 %v3687_v30 }
 0x217   : > { %v278_v32 = vpop.permute.xlu1 %277 }
 0x218   : > { %v3601_v33 = vadd.f32 %v278_v32, %v270_v31  ;;  %v3691_v31 = vld [vmem:[#allocation5 + $0x120] sm:$0xff]  ;;  %v3695_v32 = vld [vmem:[#allocation5 + $0x110] sm:$0xff] }
 0x219   : > { %402 = vmatpush.msrb.mxu3 %v3691_v31  ;;  %614 = vmatpush.msra.mxu1 %v3691_v31 }
 0x21a   : > { %3020 = vtanh.f32 %v3601_v33 }
 0x21b   : > { %403 = vmatpush.msrb.mxu3 %v3695_v32  ;;  %615 = vmatpush.msra.mxu1 %v3695_v32 }
 0x220   : > { %v3021_v34 = vpop.eup %3020 }
 0x221   : > { %283 = vrot.lane.b32.xlu1 %v3021_v34, %s3409_s7 }
 0x293   : > { %v284_v40 = vpop.permute.xlu1 %283 }
 0x294   : > { %v3625_v41 = vmul.f32 %v284_v40, %v269_v28 }
 0x296   : > { %288 = vrot.lane.b32.xlu2 %v3625_v41, %s3410_s8 }
 0x2f0   : > { %v289_v43 = vpop.permute.xlu2 %288 }
 0x2f1   : > { %v292_v44 = vsel %vm291_vm5, %v289_v43, %v3535_v0 }
 0x2f2   : > { %2876 = vmatmul.msk.f32.vlgmr.msra.gmra.mxu2 %vm293_vm6, %v292_v44 }
 0x2f3   : > { %732 = vmatpush.msra.mxu2 %v3605_v35 }
 0x2f5   : > { %733 = vmatpush.msra.mxu2 %v3607_v36 }
 0x2f7   : > { %734 = vmatpush.msra.mxu2 %v3611_v37 }
 0x2f9   : > { %735 = vmatpush.msra.mxu2 %v3615_v38 }
 0x2fb   : > { %736 = vmatpush.msra.mxu2 %v3619_v39 }
 0x2fd   : > { %737 = vmatpush.msra.mxu2 %v3629_v42 }
 0x375   : > { %v314_v47 = vpop.f32.mrf.mxu2 }
 0x376   : > { %v315_v48 = vadd.f32 %v314_v47, %v3664_v46 }
 0x378   : > { %v317_v49 = vmul.f32 1.442695, %v315_v48  ;;  %v319_v50 = vmax.f32 %v315_v48, 0.0 }
 0x37a   : > { %3022 = vpow2.f32 %v317_v49  ;;  %354 = vrot.lane.b32.xlu0 %v319_v50, %s3407_s17 }
 0x380   : > { %v3668_v51 = vpop.eup %3022 }
 0x381   : > { %2877 = vmatmul.msk.f32.vlgmr.msra.gmra.mxu3 %vm214_vm0, %v3668_v51  ;;  %v343_v52 = vsel %vm214_vm0, %v3668_v51, 0.0 }
 0x382   : > { %344 = vadd.xlane.f32.xlu2 %v343_v52  ;;  %444 = vmatpush.msra.mxu3 %v3537_v1 }
 0x384   : > { %445 = vmatpush.msra.mxu3 %v3544_v3 }
 0x386   : > { %446 = vmatpush.msra.mxu3 %v3549_v5 }
 0x388   : > { %447 = vmatpush.msra.mxu3 %v3555_v7 }
 0x38a   : > { %448 = vmatpush.msra.mxu3 %v3561_v9 }
 0x38c   : > { %449 = vmatpush.msra.mxu3 %v3567_v11 }
 0x38e   : > { %450 = vmatpush.msra.mxu3 %v3575_v13 }
 0x390   : > { %451 = vmatpush.msra.mxu3 %v3581_v15 }
 0x392   : > { %452 = vmatpush.msra.mxu3 %v3587_v17 }
 0x3ec   : > { %v355_v53 = vpop.permute.xlu0 %354 }
 0x3ed   : > { %v357_v54 = vsel %vm291_vm5, %v289_v43, %v355_v53 }
 0x3ee   : > { %363 = vrot.lane.b32.xlu0 %v357_v54, %s3411_s13 }
 0x3f5   : > { %v345_v55 = vpop.xlane.xlu2 %344 }
 0x3f6   : > { %3024 = vrcp.f32 %v345_v55 }
 0x3fc   : > { %v3025_v56 = vpop.eup %3024 }
 0x3fd   : > { %v347_v57 = vmul.f32 %v3025_v56, %v345_v55 }
 0x3ff   : > { %v348_v58 = vsub.f32 2.0, %v347_v57 }
 0x401   : > { %v3676_v59 = vmul.f32 %v3025_v56, %v348_v58 }
 0x404   : > { %v340_v60 = vpop.f32.mrf.mxu3 }
 0x405   : > { %v351_v61 = vmul.f32 %v3676_v59, %v340_v60  ;;  %v3736_v60 = vmul.f32 %v3668_v51, %v3676_v59 }
 0x407   : > { %v352_v63 = vadd.f32 %v351_v61, %v263_v62 }
 0x409   : > { %v358_v0 = vmul.f32 0.5, %v352_v63 }
 0x40b   : > { %3026 = vtanh.f32 %v358_v0 }
 0x411   : > { %v3027_v19 = vpop.eup %3026 }
 0x412   : > { %368 = vrot.lane.b32.xlu1 %v3027_v19, %s3411_s13  ;;  %v360_v20 = vadd.f32 1.0, %v3027_v19 }
 0x414   : > { %v361_v21 = vmul.f32 0.5, %v360_v20 }
 0x460   : > { %v364_v24 = vpop.permute.xlu0 %363 }
 0x461   : > { %v366_v25 = vmul.f32 %v364_v24, %v361_v21 }
 0x484   : > { %v369_v22 = vpop.permute.xlu1 %368 }
 0x485   : > { %v371_v23 = vmul.f32 %v369_v22, %v361_v21 }
 0x487   : > { %373 = vrot.lane.b32.xlu1 %v371_v23, %s3411_s13 }
 0x4f9   : > { %v374_v26 = vpop.permute.xlu1 %373 }
 0x4fa   : > { %v3681_v27 = vadd.f32 %v374_v26, %v366_v25 }
 0x4fc   : > { %3028 = vtanh.f32 %v3681_v27 }
 0x502   : > { %v3029_v28 = vpop.eup %3028 }
 0x503   : > { %379 = vrot.lane.b32.xlu0 %v3029_v28, %s3411_s13 }
 0x575   : > { %v380_v34 = vpop.permute.xlu0 %379 }
 0x576   : > { %v3708_v40 = vmul.f32 %v380_v34, %v361_v21 }
 0x578   : > { %384 = vrot.lane.b32.xlu1 %v3708_v40, %s3412_s14 }
 0x580   : > { %424 = vrot.lane.b32.xlu1 %v3625_v41, %s3413_s15  ;;  %v3726_v41 = vld [vmem:[#allocation5 + $0x150] ss:$0 sm:$0xff] }
 0x5ea   : > { %v385_v43 = vpop.permute.xlu1 %384 }
 0x5eb   : > { %2878 = vmatmul.msk.f32.vlgmr.msrb.gmra.mxu3 %vm218_vm2, %v385_v43 }
 0x5ec   : > { %657 = vmatpush.msrb.mxu3 %v3537_v1 }
 0x5ee   : > { %658 = vmatpush.msrb.mxu3 %v3544_v3 }
 0x5f0   : > { %659 = vmatpush.msrb.mxu3 %v3549_v5 }
 0x5f2   : > { %660 = vmatpush.msrb.mxu3 %v3555_v7  ;;  %v425_v58 = vpop.permute.xlu1 %424 }
 0x5f3   : > { %v430_v61 = vsel %vm214_vm0, %v3736_v60, %v425_v58 }
 0x5f4   : > { %661 = vmatpush.msrb.mxu3 %v3561_v9 }
 0x5f6   : > { %662 = vmatpush.msrb.mxu3 %v3567_v11 }
 0x5f8   : > { %663 = vmatpush.msrb.mxu3 %v3575_v13 }
 0x5fa   : > { %664 = vmatpush.msrb.mxu3 %v3581_v15 }
 0x5fc   : > { %665 = vmatpush.msrb.mxu3 %v3587_v17 }
 0x66e   : > { %v405_v44 = vpop.f32.mrf.mxu3 }
 0x66f   : > { %v406_v47 = vadd.f32 %v405_v44, %v3726_v41 }
 0x671   : > { %v408_v48 = vmul.f32 1.442695, %v406_v47 }
 0x673   : > { %3030 = vpow2.f32 %v408_v48 }
 0x679   : > { %v3031_v49 = vpop.eup %3030 }
 0x67a   : > { %v410_v50 = vsel %vm214_vm0, %v3031_v49, 0.0 }
 0x67b   : > { %411 = vadd.xlane.f32.xlu0 %v410_v50 }
 0x6ee   : > { %v412_v52 = vpop.xlane.xlu0 %411 }
 0x6ef   : > { %3032 = vrcp.f32 %v412_v52 }
 0x6f5   : > { %v3033_v53 = vpop.eup %3032 }
 0x6f6   : > { %v414_v54 = vmul.f32 %v3033_v53, %v412_v52 }
 0x6f8   : > { %v415_v55 = vsub.f32 2.0, %v414_v54 }
 0x6fa   : > { %v416_v56 = vmul.f32 %v3033_v53, %v415_v55 }
 0x6fc   : > { %v3730_v57 = vmul.f32 %v3031_v49, %v416_v56 }
 0x6fe   : > { %427 = vrot.lane.b32.xlu1 %v3730_v57, %s3414_s18 }
 0x770   : > { %v428_v62 = vpop.permute.xlu1 %427 }
 0x771   : > { %v431_v63 = vsel %vm216_vm1, %v430_v61, %v428_v62 }
 0x772   : > { %v432_v0 = vsel %vm218_vm2, %v431_v63, %v3681_v27 }
 0x773   : > { %v433_v19 = vsel %vm220_vm3, %v432_v0, 1.0 }
 0x774   : > { %2879 = vmatmul.msk.f32.vlgmr.msra.gmra.mxu3 %vm222_vm4, %v433_v19  ;;  %2880 = vmatmul.msk.f32.vlgmr.msrb.gmra.mxu2 %vm222_vm4, %v433_v19 }
 0x775   : > { %870 = vmatpush.msrb.mxu2 %v3537_v1  ;;  %890 = vmatpush.msra.mxu3 %v3539_v2 }
 0x777   : > { %871 = vmatpush.msrb.mxu2 %v3544_v3  ;;  %891 = vmatpush.msra.mxu3 %v3546_v4 }
 0x779   : > { %872 = vmatpush.msrb.mxu2 %v3549_v5  ;;  %892 = vmatpush.msra.mxu3 %v3552_v6 }
 0x77b   : > { %873 = vmatpush.msrb.mxu2 %v3555_v7  ;;  %893 = vmatpush.msra.mxu3 %v3558_v8 }
 0x77d   : > { %874 = vmatpush.msrb.mxu2 %v3561_v9  ;;  %894 = vmatpush.msra.mxu3 %v3564_v10 }
 0x77f   : > { %875 = vmatpush.msrb.mxu2 %v3567_v11  ;;  %895 = vmatpush.msra.mxu3 %v3570_v12 }
 0x781   : > { %876 = vmatpush.msrb.mxu2 %v3575_v13  ;;  %896 = vmatpush.msra.mxu3 %v3577_v14 }
 0x783   : > { %877 = vmatpush.msrb.mxu2 %v3581_v15  ;;  %897 = vmatpush.msra.mxu3 %v3583_v16 }
 0x785   : > { %878 = vmatpush.msrb.mxu2 %v3587_v17  ;;  %898 = vmatpush.msra.mxu3 %v3589_v18 }
 0x7f7   : > { %v454_v51 = vpop.f32.mrf.mxu3 }
 0x7f8   : > { %v477_v59 = vmul.f32 0.5, %v454_v51  ;;  %v474_v51 = vpop.f32.mrf.mxu2 }
 0x7fa   : > { %3034 = vtanh.f32 %v477_v59 }
 0x800   : > { %v3035_v20 = vpop.eup %3034 }
 0x801   : > { %483 = vrot.lane.b32.xlu2 %v3035_v20, %s3408_s27  ;;  %v479_v21 = vadd.f32 1.0, %v3035_v20 }
 0x803   : > { %v480_v22 = vmul.f32 0.5, %v479_v21 }
 0x805   : > { %v481_v25 = vmul.f32 %v480_v22, %v3601_v33 }
 0x809   : > { %502 = vrot.lane.b32.xlu2 %v3708_v40, %s3408_s27 }
 0x85b   : > { %v484_v23 = vpop.permute.xlu2 %483 }
 0x85c   : > { %v486_v24 = vmul.f32 %v484_v23, %v480_v22 }
 0x85e   : > { %488 = vrot.lane.b32.xlu1 %v486_v24, %s3409_s7 }
 0x863   : > { %v503_v40 = vpop.permute.xlu2 %502 }
 0x8d0   : > { %v489_v26 = vpop.permute.xlu1 %488 }
 0x8d1   : > { %v3769_v27 = vadd.f32 %v489_v26, %v481_v25 }
 0x8d3   : > { %3036 = vtanh.f32 %v3769_v27 }
 0x8d9   : > { %v3037_v28 = vpop.eup %3036 }
 0x8da   : > { %494 = vrot.lane.b32.xlu1 %v3037_v28, %s3409_s7 }
 0x94c   : > { %v495_v34 = vpop.permute.xlu1 %494 }
 0x94d   : > { %v497_v43 = vmul.f32 %v495_v34, %v480_v22 }
 0x94f   : > { %499 = vrot.lane.b32.xlu1 %v497_v43, %s3410_s8 }
 0x9c1   : > { %v500_v44 = vpop.permute.xlu1 %499 }
 0x9c2   : > { %v505_v47 = vsel %vm291_vm5, %v500_v44, %v503_v40 }
 0x9c3   : > { %2881 = vmatmul.msk.f32.vlgmr.msrb.gmra.mxu0 %vm293_vm6, %v505_v47 }
 0x9c4   : > { %945 = vmatpush.msrb.mxu0 %v3605_v35 }
 0x9c6   : > { %946 = vmatpush.msrb.mxu0 %v3607_v36 }
 0x9c8   : > { %947 = vmatpush.msrb.mxu0 %v3611_v37 }
 0x9ca   : > { %948 = vmatpush.msrb.mxu0 %v3615_v38 }
 0x9cc   : > { %949 = vmatpush.msrb.mxu0 %v3619_v39 }
 0x9ce   : > { %950 = vmatpush.msrb.mxu0 %v3629_v42 }
 0xa40   : > { %v526_v33 = vpop.f32.mrf.mxu0 }
 0xa41   : > { %v527_v48 = vadd.f32 %v526_v33, %v3664_v46 }
 0xa43   : > { %v529_v49 = vmul.f32 1.442695, %v527_v48  ;;  %v531_v50 = vmax.f32 %v527_v48, 0.0 }
 0xa45   : > { %3038 = vpow2.f32 %v529_v49  ;;  %566 = vrot.lane.b32.xlu2 %v531_v50, %s3407_s17 }
 0xa4b   : > { %v3039_v52 = vpop.eup %3038 }
 0xa4c   : > { %2882 = vmatmul.msk.f32.vlgmr.msrb.gmra.mxu1 %vm214_vm0, %v3039_v52  ;;  %v555_v53 = vsel %vm214_vm0, %v3039_v52, 0.0 }
 0xa4d   : > { %556 = vadd.xlane.f32.xlu1 %v555_v53  ;;  %763 = vmatpush.msrb.mxu1 %v3660_v45 }
 0xa9f   : > { %v567_v54 = vpop.permute.xlu2 %566 }
 0xaa0   : > { %v569_v55 = vsel %vm291_vm5, %v500_v44, %v567_v54 }
 0xaa1   : > { %575 = vrot.lane.b32.xlu2 %v569_v55, %s3411_s13 }
 0xac0   : > { %v557_v56 = vpop.xlane.xlu1 %556 }
 0xac1   : > { %3040 = vrcp.f32 %v557_v56 }
 0xac7   : > { %v3041_v58 = vpop.eup %3040 }
 0xac8   : > { %v559_v61 = vmul.f32 %v3041_v58, %v557_v56 }
 0xac9   : > { %v552_v0 = vpop.f32.mrf.mxu1 }
 0xaca   : > { %v560_v62 = vsub.f32 2.0, %v559_v61 }
 0xacc   : > { %v561_v63 = vmul.f32 %v3041_v58, %v560_v62 }
 0xace   : > { %v563_v19 = vmul.f32 %v561_v63, %v552_v0 }
 0xad0   : > { %v564_v59 = vadd.f32 %v563_v19, %v474_v51  ;;  %v3805_v51 = vmul.f32 %v3039_v52, %v561_v63 }
 0xad2   : > { %v570_v20 = vmul.f32 0.5, %v564_v59 }
 0xad4   : > { %3042 = vtanh.f32 %v570_v20 }
 0xada   : > { %v3043_v21 = vpop.eup %3042 }
 0xadb   : > { %580 = vrot.lane.b32.xlu0 %v3043_v21, %s3411_s13  ;;  %v572_v22 = vadd.f32 1.0, %v3043_v21 }
 0xadd   : > { %v573_v23 = vmul.f32 0.5, %v572_v22 }
 0xafb   : > { %v576_v26 = vpop.permute.xlu2 %575 }
 0xafc   : > { %v578_v28 = vmul.f32 %v576_v26, %v573_v23 }
 0xb4d   : > { %v581_v24 = vpop.permute.xlu0 %580 }
 0xb4e   : > { %v583_v25 = vmul.f32 %v581_v24, %v573_v23 }
 0xb50   : > { %585 = vrot.lane.b32.xlu2 %v583_v25, %s3411_s13 }
 0xbaa   : > { %v586_v34 = vpop.permute.xlu2 %585 }
 0xbab   : > { %v588_v40 = vadd.f32 %v586_v34, %v578_v28 }
 0xbad   : > { %3044 = vtanh.f32 %v588_v40 }
 0xbb3   : > { %v3045_v44 = vpop.eup %3044 }
 0xbb4   : > { %591 = vrot.lane.b32.xlu0 %v3045_v44, %s3411_s13 }
 0xc26   : > { %v592_v47 = vpop.permute.xlu0 %591 }
 0xc27   : > { %v594_v33 = vmul.f32 %v592_v47, %v573_v23 }
 0xc29   : > { %596 = vrot.lane.b32.xlu2 %v594_v33, %s3412_s14 }
 0xc31   : > { %637 = vrot.lane.b32.xlu2 %v497_v43, %s3413_s15 }
 0xc83   : > { %v597_v48 = vpop.permute.xlu2 %596 }
 0xc84   : > { %2883 = vmatmul.msk.f32.vlgmr.msra.gmra.mxu1 %vm218_vm2, %v597_v48 }
 0xc85   : > { %825 = vmatpush.msra.mxu1 %v3685_v29 }
 0xc87   : > { %826 = vmatpush.msra.mxu1 %v3687_v30 }
 0xc89   : > { %827 = vmatpush.msra.mxu1 %v3691_v31 }
 0xc8b   : > { %828 = vmatpush.msra.mxu1 %v3695_v32  ;;  %v638_v19 = vpop.permute.xlu2 %637 }
 0xc8c   : > { %v643_v59 = vsel %vm214_vm0, %v3805_v51, %v638_v19 }
 0xd01   : > { %v617_v49 = vpop.f32.mrf.mxu1 }
 0xd02   : > { %v618_v50 = vadd.f32 %v617_v49, %v3726_v41 }
 0xd04   : > { %v620_v53 = vmul.f32 1.442695, %v618_v50 }
 0xd06   : > { %3046 = vpow2.f32 %v620_v53 }
 0xd0c   : > { %v3047_v54 = vpop.eup %3046 }
 0xd0d   : > { %v622_v55 = vsel %vm214_vm0, %v3047_v54, 0.0 }
 0xd0e   : > { %623 = vadd.xlane.f32.xlu0 %v622_v55 }
 0xd81   : > { %v624_v43 = vpop.xlane.xlu0 %623 }
 0xd82   : > { %3048 = vrcp.f32 %v624_v43 }
 0xd88   : > { %v3049_v56 = vpop.eup %3048 }
 0xd89   : > { %v626_v58 = vmul.f32 %v3049_v56, %v624_v43 }
 0xd8b   : > { %v627_v61 = vsub.f32 2.0, %v626_v58 }
 0xd8d   : > { %v628_v62 = vmul.f32 %v3049_v56, %v627_v61 }
 0xd8f   : > { %v3801_v0 = vmul.f32 %v3047_v54, %v628_v62 }
 0xd91   : > { %640 = vrot.lane.b32.xlu2 %v3801_v0, %s3414_s18 }
 0xdeb   : > { %v641_v20 = vpop.permute.xlu2 %640 }
 0xdec   : > { %v644_v21 = vsel %vm216_vm1, %v643_v59, %v641_v20 }
 0xded   : > { %v645_v22 = vsel %vm218_vm2, %v644_v21, %v588_v40 }
 0xdee   : > { %v646_v23 = vsel %vm220_vm3, %v645_v22, 1.0 }
 0xdef   : > { %2885 = vmatmul.msk.f32.vlgmr.msrb.gmra.mxu3 %vm222_vm4, %v646_v23  ;;  %2886 = vmatmul.msk.f32.vlgmr.msra.gmra.mxu0 %vm222_vm4, %v646_v23 }
 0xdf0   : > { %1083 = vmatpush.msra.mxu0 %v3537_v1  ;;  %1158 = vmatpush.msrb.mxu3 %v3605_v35 }
 0xdf2   : > { %1084 = vmatpush.msra.mxu0 %v3544_v3  ;;  %1159 = vmatpush.msrb.mxu3 %v3607_v36 }
 0xdf4   : > { %1085 = vmatpush.msra.mxu0 %v3549_v5  ;;  %1160 = vmatpush.msrb.mxu3 %v3611_v37 }
 0xdf6   : > { %1086 = vmatpush.msra.mxu0 %v3555_v7  ;;  %1161 = vmatpush.msrb.mxu3 %v3615_v38 }
 0xdf8   : > { %1087 = vmatpush.msra.mxu0 %v3561_v9  ;;  %1162 = vmatpush.msrb.mxu3 %v3619_v39 }
 0xdfa   : > { %1088 = vmatpush.msra.mxu0 %v3567_v11  ;;  %1163 = vmatpush.msrb.mxu3 %v3629_v42 }
 0xdfc   : > { %1089 = vmatpush.msra.mxu0 %v3575_v13 }
 0xdfe   : > { %1090 = vmatpush.msra.mxu0 %v3581_v15 }
 0xe00   : > { %1091 = vmatpush.msra.mxu0 %v3587_v17 }
 0xe72   : > { %v667_v52 = vpop.f32.mrf.mxu3 }
 0xe73   : > { %v690_v63 = vmul.f32 0.5, %v667_v52 }
 0xe75   : > { %3050 = vtanh.f32 %v690_v63 }
 0xe7b   : > { %v3051_v24 = vpop.eup %3050 }
 0xe7c   : > { %696 = vrot.lane.b32.xlu1 %v3051_v24, %s3408_s27  ;;  %v692_v25 = vadd.f32 1.0, %v3051_v24  ;;  %v687_v24 = vpop.f32.mrf.mxu0 }
 0xe7e   : > { %v693_v26 = vmul.f32 0.5, %v692_v25 }
 0xe80   : > { %v694_v40 = vmul.f32 %v693_v26, %v3769_v27 }
 0xe84   : > { %715 = vrot.lane.b32.xlu1 %v594_v33, %s3408_s27 }
 0xeee   : > { %v697_v28 = vpop.permute.xlu1 %696 }
 0xeef   : > { %v699_v34 = vmul.f32 %v697_v28, %v693_v26 }
 0xef1   : > { %701 = vrot.lane.b32.xlu2 %v699_v34, %s3409_s7 }
 0xef6   : > { %v716_v33 = vpop.permute.xlu1 %715 }
 0xf4b   : > { %v702_v44 = vpop.permute.xlu2 %701 }
 0xf4c   : > { %v3833_v47 = vadd.f32 %v702_v44, %v694_v40 }
 0xf4e   : > { %3052 = vtanh.f32 %v3833_v47 }
 0xf54   : > { %v3053_v48 = vpop.eup %3052 }
 0xf55   : > { %707 = vrot.lane.b32.xlu2 %v3053_v48, %s3409_s7 }
 0xfaf   : > { %v708_v49 = vpop.permute.xlu2 %707 }
 0xfb0   : > { %v710_v50 = vmul.f32 %v708_v49, %v693_v26 }
 0xfb2   : > { %712 = vrot.lane.b32.xlu2 %v710_v50, %s3410_s8 }
0x100c   : > { %v713_v53 = vpop.permute.xlu2 %712 }
0x100d   : > { %v718_v54 = vsel %vm291_vm5, %v713_v53, %v716_v33 }
0x100e   : > { %2887 = vmatmul.msk.f32.vlgmr.msra.gmra.mxu2 %vm293_vm6, %v718_v54 }
0x100f   : > { %1103 = vmatpush.msra.mxu2 %v3539_v2 }
0x1011   : > { %1104 = vmatpush.msra.mxu2 %v3546_v4 }
0x1013   : > { %1105 = vmatpush.msra.mxu2 %v3552_v6 }
0x1015   : > { %1106 = vmatpush.msra.mxu2 %v3558_v8 }
0x1017   : > { %1107 = vmatpush.msra.mxu2 %v3564_v10 }
0x1019   : > { %1108 = vmatpush.msra.mxu2 %v3570_v12 }
0x101b   : > { %1109 = vmatpush.msra.mxu2 %v3577_v14 }
0x101d   : > { %1110 = vmatpush.msra.mxu2 %v3583_v16 }
0x101f   : > { %1111 = vmatpush.msra.mxu2 %v3589_v18 }
0x1091   : > { %v739_v27 = vpop.f32.mrf.mxu2 }
0x1092   : > { %v740_v55 = vadd.f32 %v739_v27, %v3664_v46 }
0x1094   : > { %v742_v43 = vmul.f32 1.442695, %v740_v55  ;;  %v744_v56 = vmax.f32 %v740_v55, 0.0 }
0x1096   : > { %3054 = vpow2.f32 %v742_v43  ;;  %779 = vrot.lane.b32.xlu2 %v744_v56, %s3407_s17 }
0x109c   : > { %v3055_v58 = vpop.eup %3054 }
0x109d   : > { %2888 = vmatmul.msk.f32.vlgmr.msrb.gmra.mxu1 %vm214_vm0, %v3055_v58  ;;  %v768_v61 = vsel %vm214_vm0, %v3055_v58, 0.0 }
0x109e   : > { %769 = vadd.xlane.f32.xlu0 %v768_v61  ;;  %976 = vmatpush.msrb.mxu1 %v3660_v45 }
0x10f0   : > { %v780_v62 = vpop.permute.xlu2 %779 }
0x10f1   : > { %v782_v19 = vsel %vm291_vm5, %v713_v53, %v780_v62 }
0x10f2   : > { %788 = vrot.lane.b32.xlu0 %v782_v19, %s3411_s13 }
0x1111   : > { %v770_v59 = vpop.xlane.xlu0 %769 }
0x1112   : > { %3056 = vrcp.f32 %v770_v59 }
0x1118   : > { %v3057_v20 = vpop.eup %3056 }
0x1119   : > { %v772_v21 = vmul.f32 %v3057_v20, %v770_v59 }
0x111a   : > { %v765_v52 = vpop.f32.mrf.mxu1 }
0x111b   : > { %v773_v22 = vsub.f32 2.0, %v772_v21 }
0x111d   : > { %v774_v23 = vmul.f32 %v3057_v20, %v773_v22 }
0x111f   : > { %v776_v63 = vmul.f32 %v774_v23, %v765_v52 }
0x1121   : > { %v777_v25 = vadd.f32 %v776_v63, %v687_v24 }
0x1123   : > { %v783_v26 = vmul.f32 0.5, %v777_v25 }
0x1125   : > { %3058 = vtanh.f32 %v783_v26  ;;  %v3875_v26 = vmul.f32 %v3055_v58, %v774_v23 }
0x112b   : > { %v3059_v28 = vpop.eup %3058 }
0x112c   : > { %793 = vrot.lane.b32.xlu1 %v3059_v28, %s3411_s13  ;;  %v785_v34 = vadd.f32 1.0, %v3059_v28 }
0x112e   : > { %v786_v40 = vmul.f32 0.5, %v785_v34 }
0x1164   : > { %v789_v49 = vpop.permute.xlu0 %788 }
0x1165   : > { %v791_v33 = vmul.f32 %v789_v49, %v786_v40 }
0x119e   : > { %v794_v44 = vpop.permute.xlu1 %793 }
0x119f   : > { %v796_v48 = vmul.f32 %v794_v44, %v786_v40 }
0x11a1   : > { %798 = vrot.lane.b32.xlu2 %v796_v48, %s3411_s13 }
0x11fb   : > { %v799_v53 = vpop.permute.xlu2 %798 }
0x11fc   : > { %v801_v54 = vadd.f32 %v799_v53, %v791_v33 }
0x11fe   : > { %3060 = vtanh.f32 %v801_v54 }
0x1204   : > { %v3061_v27 = vpop.eup %3060 }
0x1205   : > { %804 = vrot.lane.b32.xlu1 %v3061_v27, %s3411_s13 }
0x1277   : > { %v805_v55 = vpop.permute.xlu1 %804 }
0x1278   : > { %v3859_v43 = vmul.f32 %v805_v55, %v786_v40 }
0x127a   : > { %809 = vrot.lane.b32.xlu2 %v3859_v43, %s3412_s14 }
0x1282   : > { %850 = vrot.lane.b32.xlu2 %v710_v50, %s3413_s15 }
0x12d4   : > { %v810_v56 = vpop.permute.xlu2 %809 }
0x12d5   : > { %2889 = vmatmul.msk.f32.vlgmr.msra.gmra.mxu1 %vm218_vm2, %v810_v56 }
0x12d6   : > { %1038 = vmatpush.msra.mxu1 %v3685_v29 }
0x12d8   : > { %1039 = vmatpush.msra.mxu1 %v3687_v30 }
0x12da   : > { %1040 = vmatpush.msra.mxu1 %v3691_v31 }
0x12dc   : > { %1041 = vmatpush.msra.mxu1 %v3695_v32  ;;  %v851_v25 = vpop.permute.xlu2 %850 }
0x12dd   : > { %v856_v28 = vsel %vm214_vm0, %v3875_v26, %v851_v25 }
0x1352   : > { %v830_v61 = vpop.f32.mrf.mxu1 }
0x1353   : > { %v831_v62 = vadd.f32 %v830_v61, %v3726_v41 }
0x1355   : > { %v833_v19 = vmul.f32 1.442695, %v831_v62 }
0x1357   : > { %3062 = vpow2.f32 %v833_v19 }
0x135d   : > { %v3063_v59 = vpop.eup %3062 }
0x135e   : > { %v835_v20 = vsel %vm214_vm0, %v3063_v59, 0.0 }
0x135f   : > { %836 = vadd.xlane.f32.xlu1 %v835_v20 }
0x13d2   : > { %v837_v50 = vpop.xlane.xlu1 %836 }
0x13d3   : > { %3064 = vrcp.f32 %v837_v50 }
0x13d9   : > { %v3065_v21 = vpop.eup %3064 }
0x13da   : > { %v839_v22 = vmul.f32 %v3065_v21, %v837_v50 }
0x13dc   : > { %v840_v52 = vsub.f32 2.0, %v839_v22 }
0x13de   : > { %v841_v63 = vmul.f32 %v3065_v21, %v840_v52 }
0x13e0   : > { %v3871_v24 = vmul.f32 %v3063_v59, %v841_v63 }
0x13e2   : > { %853 = vrot.lane.b32.xlu0 %v3871_v24, %s3414_s18 }
0x1454   : > { %v854_v34 = vpop.permute.xlu0 %853 }
0x1455   : > { %v857_v40 = vsel %vm216_vm1, %v856_v28, %v854_v34 }
0x1456   : > { %v858_v44 = vsel %vm218_vm2, %v857_v40, %v801_v54 }
0x1457   : > { %v859_v48 = vsel %vm220_vm3, %v858_v44, 1.0 }
0x1458   : > { %2891 = vmatmul.msk.f32.vlgmr.msrb.gmra.mxu2 %vm222_vm4, %v859_v48  ;;  %2892 = vmatmul.msk.f32.vlgmr.msra.gmra.mxu3 %vm222_vm4, %v859_v48 }
0x1459   : > { %1296 = vmatpush.msra.mxu3 %v3537_v1  ;;  %1371 = vmatpush.msrb.mxu2 %v3605_v35 }
0x145b   : > { %1297 = vmatpush.msra.mxu3 %v3544_v3  ;;  %1372 = vmatpush.msrb.mxu2 %v3607_v36 }
0x145d   : > { %1298 = vmatpush.msra.mxu3 %v3549_v5  ;;  %1373 = vmatpush.msrb.mxu2 %v3611_v37 }
0x145f   : > { %1299 = vmatpush.msra.mxu3 %v3555_v7  ;;  %1374 = vmatpush.msrb.mxu2 %v3615_v38 }
0x1461   : > { %1300 = vmatpush.msra.mxu3 %v3561_v9  ;;  %1375 = vmatpush.msrb.mxu2 %v3619_v39 }
0x1463   : > { %1301 = vmatpush.msra.mxu3 %v3567_v11  ;;  %1376 = vmatpush.msrb.mxu2 %v3629_v42 }
0x1465   : > { %1302 = vmatpush.msra.mxu3 %v3575_v13 }
0x1467   : > { %1303 = vmatpush.msra.mxu3 %v3581_v15 }
0x1469   : > { %1304 = vmatpush.msra.mxu3 %v3587_v17 }
0x14db   : > { %v880_v1 = vpop.f32.mrf.mxu2  ;;  %v900_v54 = vpop.f32.mrf.mxu3 }
0x14dc   : > { %v903_v3 = vmul.f32 0.5, %v880_v1 }
0x14de   : > { %3066 = vtanh.f32 %v903_v3 }
0x14e4   : > { %v3067_v5 = vpop.eup %3066 }
0x14e5   : > { %909 = vrot.lane.b32.xlu2 %v3067_v5, %s3408_s27  ;;  %v905_v7 = vadd.f32 1.0, %v3067_v5 }
0x14e7   : > { %v906_v9 = vmul.f32 0.5, %v905_v7 }
0x14e9   : > { %v907_v11 = vmul.f32 %v906_v9, %v3833_v47 }
0x153f   : > { %v910_v35 = vpop.permute.xlu2 %909 }
0x1540   : > { %v912_v36 = vmul.f32 %v910_v35, %v906_v9 }
0x1542   : > { %914 = vrot.lane.b32.xlu0 %v912_v36, %s3409_s7 }
0x15b4   : > { %v915_v37 = vpop.permute.xlu0 %914 }
0x15b5   : > { %v3902_v13 = vadd.f32 %v915_v37, %v907_v11  ;;  %v3955_v37 = vld [vmem:[#allocation5 + $0x80] sm:$0xff] }
0x15b7   : > { %3068 = vtanh.f32 %v3902_v13 }
0x15bd   : > { %v3069_v15 = vpop.eup %3068 }
0x15be   : > { %920 = vrot.lane.b32.xlu2 %v3069_v15, %s3409_s7  ;;  %v3958_v15 = vld [vmem:[#allocation5 + $0xe0] sm:$0xff] }
0x15c6   : > { %928 = vrot.lane.b32.xlu2 %v3859_v43, %s3408_s27 }
0x1618   : > { %v921_v17 = vpop.permute.xlu2 %920 }
0x1619   : > { %v923_v38 = vmul.f32 %v921_v17, %v906_v9  ;;  %v3961_v17 = vld [vmem:[#allocation5 + $0x70] sm:$0xff] }
0x161b   : > { %925 = vrot.lane.b32.xlu0 %v923_v38, %s3410_s8 }
0x1620   : > { %v929_v39 = vpop.permute.xlu2 %928 }
0x168d   : > { %v926_v42 = vpop.permute.xlu0 %925 }
0x168e   : > { %v931_v58 = vsel %vm291_vm5, %v926_v42, %v929_v39  ;;  %v3967_v39 = vld [vmem:[#allocation5 + $0x60] sm:$0xff] }
0x168f   : > { %2893 = vmatmul.msk.f32.vlgmr.msrb.gmra.mxu0 %vm293_vm6, %v931_v58  ;;  %v3973_v58 = vld [vmem:[#allocation5 + $0x50] sm:$0xff] }
0x1690   : > { %1316 = vmatpush.msrb.mxu0 %v3539_v2 }
0x1692   : > { %1317 = vmatpush.msrb.mxu0 %v3546_v4 }
0x1694   : > { %1318 = vmatpush.msrb.mxu0 %v3552_v6 }
0x1696   : > { %1319 = vmatpush.msrb.mxu0 %v3558_v8 }
0x1698   : > { %1320 = vmatpush.msrb.mxu0 %v3564_v10 }
0x169a   : > { %1321 = vmatpush.msrb.mxu0 %v3570_v12 }
0x169c   : > { %1322 = vmatpush.msrb.mxu0 %v3577_v14 }
0x169e   : > { %1323 = vmatpush.msrb.mxu0 %v3583_v16 }
0x16a0   : > { %1324 = vmatpush.msrb.mxu0 %v3589_v18 }
0x170c   : > { %v952_v47 = vpop.f32.mrf.mxu0 }
0x170d   : > { %v953_v23 = vadd.f32 %v952_v47, %v3664_v46  ;;  %v3976_v47 = vld [vmem:[#allocation5 + $0xb0] sm:$0xff] }
0x170f   : > { %v955_v2 = vmul.f32 1.442695, %v953_v23  ;;  %v957_v49 = vmax.f32 %v953_v23, 0.0  ;;  %v3979_v23 = vld [vmem:[#allocation5 + $0x40] sm:$0xff] }
0x1711   : > { %3070 = vpow2.f32 %v955_v2  ;;  %992 = vrot.lane.b32.xlu2 %v957_v49, %s3407_s17  ;;  %v3982_v2 = vld [vmem:[#allocation5 + $0xa0] sm:$0xff]  ;;  %v3985_v49 = vld [vmem:[#allocation5 + $0x30] sm:$0xff] }
0x1717   : > { %v3071_v4 = vpop.eup %3070 }
0x1718   : > { %2894 = vmatmul.msk.f32.vlgmr.msrb.gmra.mxu1 %vm214_vm0, %v3071_v4  ;;  %v981_v6 = vsel %vm214_vm0, %v3071_v4, 0.0 }
0x1719   : > { %982 = vadd.xlane.f32.xlu0 %v981_v6  ;;  %1189 = vmatpush.msrb.mxu1 %v3660_v45  ;;  %v3991_v6 = vld [vmem:[#allocation5 + $0x20] sm:$0xff] }
0x172d   : > { %1063 = vrot.lane.b32.xlu0 %v923_v38, %s3413_s15  ;;  %v3964_v38 = vld [vmem:[#allocation5 + $0xd0] sm:$0xff] }
0x176b   : > { %v993_v8 = vpop.permute.xlu2 %992 }
0x176c   : > { %v995_v10 = vsel %vm291_vm5, %v926_v42, %v993_v8  ;;  %v3970_v42 = vld [vmem:[#allocation5 + $0xc0] sm:$0xff]  ;;  %v3994_v8 = vld [vmem:[#allocation5 + $0x10] sm:$0xff] }
0x176d   : > { %1001 = vrot.lane.b32.xlu2 %v995_v10, %s3411_s13  ;;  %v3997_v10 = vld [vmem:[#allocation5] sm:$0xff] }
0x178c   : > { %v983_v12 = vpop.xlane.xlu0 %982 }
0x178d   : > { %3072 = vrcp.f32 %v983_v12 }
0x1793   : > { %v3073_v14 = vpop.eup %3072 }
0x1794   : > { %v985_v16 = vmul.f32 %v3073_v14, %v983_v12 }
0x1795   : > { %v978_v33 = vpop.f32.mrf.mxu1 }
0x1796   : > { %v986_v18 = vsub.f32 2.0, %v985_v16 }
0x1798   : > { %v987_v46 = vmul.f32 %v3073_v14, %v986_v18 }
0x179a   : > { %v989_v53 = vmul.f32 %v987_v46, %v978_v33 }
0x179c   : > { %v990_v27 = vadd.f32 %v989_v53, %v900_v54 }
0x179e   : > { %v996_v55 = vmul.f32 0.5, %v990_v27 }
0x17a0   : > { %3074 = vtanh.f32 %v996_v55 }
0x17a6   : > { %v3075_v45 = vpop.eup %3074 }
0x17a7   : > { %1006 = vrot.lane.b32.xlu1 %v3075_v45, %s3411_s13  ;;  %v998_v43 = vadd.f32 1.0, %v3075_v45 }
0x17a9   : > { %v999_v56 = vmul.f32 0.5, %v998_v43 }
0x17c7   : > { %v1002_v19 = vpop.permute.xlu2 %1001 }
0x17c8   : > { %v1004_v59 = vmul.f32 %v1002_v19, %v999_v56  ;;  %v4015_v19 = vld [vmem:[#allocation5 + $0x88] sm:$0xff] }
0x1819   : > { %v1007_v61 = vpop.permute.xlu1 %1006 }
0x181a   : > { %v1009_v62 = vmul.f32 %v1007_v61, %v999_v56 }
0x181c   : > { %1011 = vrot.lane.b32.xlu2 %v1009_v62, %s3411_s13 }
0x1876   : > { %v1012_v20 = vpop.permute.xlu2 %1011 }
0x1877   : > { %v1014_v50 = vadd.f32 %v1012_v20, %v1004_v59  ;;  %v4018_v59 = vld [vmem:[#allocation5 + $0x78] sm:$0xff]  ;;  %v4021_v20 = vld [vmem:[#allocation5 + $0x68] sm:$0xff] }
0x1879   : > { %3076 = vtanh.f32 %v1014_v50 }
0x187f   : > { %v3077_v21 = vpop.eup %3076 }
0x1880   : > { %1017 = vrot.lane.b32.xlu2 %v3077_v21, %s3411_s13  ;;  %v4027_v21 = vld [vmem:[#allocation5 + $0x48] sm:$0xff] }
0x18da   : > { %v1018_v22 = vpop.permute.xlu2 %1017 }
0x18db   : > { %v3931_v52 = vmul.f32 %v1018_v22, %v999_v56  ;;  %v4030_v22 = vld [vmem:[#allocation5 + $0x38] sm:$0xff] }
0x18dd   : > { %1022 = vrot.lane.b32.xlu1 %v3931_v52, %s3412_s14 }
0x194f   : > { %v1023_v63 = vpop.permute.xlu1 %1022 }
0x1950   : > { %2895 = vmatmul.msk.f32.vlgmr.msra.gmra.mxu1 %vm218_vm2, %v1023_v63  ;;  %v4036_v63 = vld [vmem:[#allocation5 + $0x18] sm:$0xff] }
0x1951   : > { %1251 = vmatpush.msra.mxu1 %v3685_v29 }
0x1953   : > { %1252 = vmatpush.msra.mxu1 %v3687_v30 }
0x1955   : > { %1253 = vmatpush.msra.mxu1 %v3691_v31  ;;  %v1064_v31 = vpop.permute.xlu0 %1063 }
0x1957   : > { %1254 = vmatpush.msra.mxu1 %v3695_v32  ;;  %v3946_v32 = vmul.f32 %v3071_v4, %v987_v46  ;;  %v3988_v4 = vld [vmem:[#allocation5 + $0x90] sm:$0xff] }
0x1959   : > { %v1069_v7 = vsel %vm214_vm0, %v3946_v32, %v1064_v31 }
0x19cd   : > { %v1043_v25 = vpop.f32.mrf.mxu1 }
0x19ce   : > { %v1044_v28 = vadd.f32 %v1043_v25, %v3726_v41  ;;  %v4039_v25 = vld [vmem:[#allocation5 + $0x8] sm:$0xff] }
0x19d0   : > { %v1046_v34 = vmul.f32 1.442695, %v1044_v28 }
0x19d2   : > { %3078 = vpow2.f32 %v1046_v34  ;;  %v4042_v34 = vld [vmem:[#allocation5 + $0xf0] ss:$0 sm:$0xff] }
0x19d8   : > { %v3079_v40 = vpop.eup %3078 }
0x19d9   : > { %v1048_v44 = vsel %vm214_vm0, %v3079_v40, 0.0 }
0x19da   : > { %1049 = vadd.xlane.f32.xlu2 %v1048_v44 }
0x1a4d   : > { %v1050_v48 = vpop.xlane.xlu2 %1049 }
0x1a4e   : > { %3080 = vrcp.f32 %v1050_v48 }
0x1a54   : > { %v3081_v1 = vpop.eup %3080 }
0x1a55   : > { %v1052_v3 = vmul.f32 %v3081_v1, %v1050_v48 }
0x1a57   : > { %v1053_v29 = vsub.f32 2.0, %v1052_v3 }
0x1a59   : > { %v1054_v5 = vmul.f32 %v3081_v1, %v1053_v29  ;;  %v4052_v29 = vld [vmem:[#allocation5 + $0x100] sm:$0xff] }
0x1a5b   : > { %v3942_v30 = vmul.f32 %v3079_v40, %v1054_v5 }
0x1a5d   : > { %1066 = vrot.lane.b32.xlu1 %v3942_v30, %s3414_s18 }
0x1acf   : > { %v1067_v9 = vpop.permute.xlu1 %1066 }
0x1ad0   : > { %v1070_v35 = vsel %vm216_vm1, %v1069_v7, %v1067_v9 }
0x1ad1   : > { %v1071_v36 = vsel %vm218_vm2, %v1070_v35, %v1014_v50  ;;  %v4024_v50 = vld [vmem:[#allocation5 + $0x58] sm:$0xff] }
0x1ad2   : > { %v1072_v11 = vsel %vm220_vm3, %v1071_v36, 1.0 }
0x1ad3   : > { %2897 = vmatmul.msk.f32.vlgmr.msra.gmra.mxu0 %vm222_vm4, %v1072_v11  ;;  %2898 = vmatmul.msk.f32.vlgmr.msra.gmra.mxu2 %vm222_vm4, %v1072_v11 }
0x1ad4   : > { %1509 = vmatpush.msra.mxu2 %v3955_v37  ;;  %1584 = vmatpush.msra.mxu0 %v3958_v15 }
0x1ad6   : > { %1510 = vmatpush.msra.mxu2 %v3961_v17  ;;  %1585 = vmatpush.msra.mxu0 %v3964_v38 }
0x1ad8   : > { %1511 = vmatpush.msra.mxu2 %v3967_v39  ;;  %1586 = vmatpush.msra.mxu0 %v3970_v42 }
0x1ada   : > { %1512 = vmatpush.msra.mxu2 %v3973_v58  ;;  %1587 = vmatpush.msra.mxu0 %v3976_v47 }
0x1adc   : > { %1513 = vmatpush.msra.mxu2 %v3979_v23  ;;  %1588 = vmatpush.msra.mxu0 %v3982_v2 }
0x1ade   : > { %1514 = vmatpush.msra.mxu2 %v3985_v49  ;;  %1589 = vmatpush.msra.mxu0 %v3988_v4 }
0x1ae0   : > { %1515 = vmatpush.msra.mxu2 %v3991_v6 }
0x1ae2   : > { %1516 = vmatpush.msra.mxu2 %v3994_v8 }
0x1ae4   : > { %1517 = vmatpush.msra.mxu2 %v3997_v10 }
0x1b50   : > { %v1093_v12 = vpop.f32.mrf.mxu0 }
0x1b51   : > { %v1116_v14 = vmul.f32 0.5, %v1093_v12 }
0x1b53   : > { %3082 = vtanh.f32 %v1116_v14 }
0x1b59   : > { %v3083_v16 = vpop.eup %3082 }
0x1b5a   : > { %1122 = vrot.lane.b32.xlu1 %v3083_v16, %s3408_s27  ;;  %v1118_v18 = vadd.f32 1.0, %v3083_v16  ;;  %v1113_v16 = vpop.f32.mrf.mxu2 }
0x1b5c   : > { %v1119_v46 = vmul.f32 0.5, %v1118_v18 }
0x1b5e   : > { %v1120_v54 = vmul.f32 %v1119_v46, %v3902_v13 }
0x1bcc   : > { %v1123_v33 = vpop.permute.xlu1 %1122 }
0x1bcd   : > { %v1125_v53 = vmul.f32 %v1123_v33, %v1119_v46 }
0x1bcf   : > { %1127 = vrot.lane.b32.xlu1 %v1125_v53, %s3409_s7 }
0x1c41   : > { %v1128_v27 = vpop.permute.xlu1 %1127 }
0x1c42   : > { %v4003_v55 = vadd.f32 %v1128_v27, %v1120_v54 }
0x1c44   : > { %3084 = vtanh.f32 %v4003_v55 }
0x1c4a   : > { %v3085_v45 = vpop.eup %3084 }
0x1c4b   : > { %1133 = vrot.lane.b32.xlu0 %v3085_v45, %s3409_s7 }
0x1c53   : > { %1141 = vrot.lane.b32.xlu0 %v3931_v52, %s3408_s27  ;;  %v4033_v52 = vld [vmem:[#allocation5 + $0x28] sm:$0xff] }
0x1cbd   : > { %v1134_v43 = vpop.permute.xlu0 %1133 }
0x1cbe   : > { %v4009_v56 = vmul.f32 %v1134_v43, %v1119_v46 }
0x1cc0   : > { %1138 = vrot.lane.b32.xlu1 %v4009_v56, %s3410_s8 }
0x1cc5   : > { %v1142_v61 = vpop.permute.xlu0 %1141 }
0x1d32   : > { %v1139_v62 = vpop.permute.xlu1 %1138 }
0x1d33   : > { %v1144_v13 = vsel %vm291_vm5, %v1139_v62, %v1142_v61 }
0x1d34   : > { %2899 = vmatmul.msk.f32.vlgmr.msrb.gmra.mxu3 %vm293_vm6, %v1144_v13 }
0x1d35   : > { %1529 = vmatpush.msrb.mxu3 %v4015_v19 }
0x1d37   : > { %1530 = vmatpush.msrb.mxu3 %v4018_v59 }
0x1d39   : > { %1531 = vmatpush.msrb.mxu3 %v4021_v20 }
0x1d3b   : > { %1532 = vmatpush.msrb.mxu3 %v4024_v50 }
0x1d3d   : > { %1533 = vmatpush.msrb.mxu3 %v4027_v21 }
0x1d3f   : > { %1534 = vmatpush.msrb.mxu3 %v4030_v22 }
0x1d41   : > { %1535 = vmatpush.msrb.mxu3 %v4033_v52 }
0x1d43   : > { %1536 = vmatpush.msrb.mxu3 %v4036_v63 }
0x1d45   : > { %1537 = vmatpush.msrb.mxu3 %v4039_v25 }
0x1db7   : > { %v1165_v28 = vpop.f32.mrf.mxu3 }
0x1db8   : > { %v1166_v40 = vadd.f32 %v4042_v34, %v1165_v28 }
0x1dba   : > { %v1168_v44 = vmul.f32 1.442695, %v1166_v40  ;;  %v1170_v48 = vmax.f32 %v1166_v40, 0.0 }
0x1dbc   : > { %3086 = vpow2.f32 %v1168_v44  ;;  %1205 = vrot.lane.b32.xlu0 %v1170_v48, %s3407_s17 }
0x1dc2   : > { %v4046_v1 = vpop.eup %3086 }
0x1dc3   : > { %2900 = vmatmul.msk.f32.vlgmr.msrb.gmra.mxu1 %vm214_vm0, %v4046_v1  ;;  %v1194_v3 = vsel %vm214_vm0, %v4046_v1, 0.0 }
0x1dc4   : > { %1195 = vadd.xlane.f32.xlu1 %v1194_v3  ;;  %1402 = vmatpush.msrb.mxu1 %v4052_v29  ;;  %v4067_v3 = vld [vmem:[#allocation5 + $0x140] sm:$0xff] }
0x1e2e   : > { %v1206_v5 = vpop.permute.xlu0 %1205 }
0x1e2f   : > { %v1208_v31 = vsel %vm291_vm5, %v1139_v62, %v1206_v5  ;;  %v4070_v5 = vld [vmem:[#allocation5 + $0x130] sm:$0xff] }
0x1e30   : > { %1214 = vrot.lane.b32.xlu0 %v1208_v31, %s3411_s13  ;;  %v4073_v31 = vld [vmem:[#allocation5 + $0x120] sm:$0xff] }
0x1e37   : > { %v1196_v7 = vpop.xlane.xlu1 %1195 }
0x1e38   : > { %3088 = vrcp.f32 %v1196_v7 }
0x1e3e   : > { %v3089_v9 = vpop.eup %3088 }
0x1e3f   : > { %v1198_v35 = vmul.f32 %v3089_v9, %v1196_v7  ;;  %v4076_v7 = vld [vmem:[#allocation5 + $0x110] sm:$0xff] }
0x1e40   : > { %v1191_v12 = vpop.f32.mrf.mxu1 }
0x1e41   : > { %v1199_v36 = vsub.f32 2.0, %v1198_v35 }
0x1e43   : > { %v1200_v11 = vmul.f32 %v3089_v9, %v1199_v36 }
0x1e45   : > { %v1202_v14 = vmul.f32 %v1200_v11, %v1191_v12 }
0x1e47   : > { %v1203_v18 = vadd.f32 %v1202_v14, %v1113_v16 }
0x1e49   : > { %v1209_v46 = vmul.f32 0.5, %v1203_v18 }
0x1e4b   : > { %3090 = vtanh.f32 %v1209_v46 }
0x1e51   : > { %v3091_v33 = vpop.eup %3090 }
0x1e52   : > { %1219 = vrot.lane.b32.xlu2 %v3091_v33, %s3411_s13  ;;  %v1211_v53 = vadd.f32 1.0, %v3091_v33 }
0x1e54   : > { %v1212_v54 = vmul.f32 0.5, %v1211_v53 }
0x1ea2   : > { %v1215_v43 = vpop.permute.xlu0 %1214 }
0x1ea3   : > { %v1217_v61 = vmul.f32 %v1215_v43, %v1212_v54 }
0x1eac   : > { %v1220_v27 = vpop.permute.xlu2 %1219 }
0x1ead   : > { %v1222_v45 = vmul.f32 %v1220_v27, %v1212_v54 }
0x1eaf   : > { %1224 = vrot.lane.b32.xlu0 %v1222_v45, %s3411_s13 }
0x1f21   : > { %v1225_v62 = vpop.permute.xlu0 %1224 }
0x1f22   : > { %v1227_v13 = vadd.f32 %v1225_v62, %v1217_v61 }
0x1f24   : > { %3092 = vtanh.f32 %v1227_v13 }
0x1f2a   : > { %v3093_v28 = vpop.eup %3092 }
0x1f2b   : > { %1230 = vrot.lane.b32.xlu0 %v3093_v28, %s3411_s13 }
0x1f9d   : > { %v1231_v40 = vpop.permute.xlu0 %1230 }
0x1f9e   : > { %v4060_v44 = vmul.f32 %v1231_v40, %v1212_v54 }
0x1fa0   : > { %1235 = vrot.lane.b32.xlu2 %v4060_v44, %s3412_s14 }
0x1fa8   : > { %1276 = vrot.lane.b32.xlu2 %v4009_v56, %s3413_s15 }
0x1ffa   : > { %v1236_v48 = vpop.permute.xlu2 %1235 }
0x1ffb   : > { %2901 = vmatmul.msk.f32.vlgmr.msra.gmra.mxu1 %vm218_vm2, %v1236_v48 }
0x1ffc   : > { %1464 = vmatpush.msra.mxu1 %v4067_v3 }
0x1ffe   : > { %1465 = vmatpush.msra.mxu1 %v4070_v5 }
0x2000   : > { %1466 = vmatpush.msra.mxu1 %v4073_v31 }
0x2002   : > { %1467 = vmatpush.msra.mxu1 %v4076_v7  ;;  %v1277_v54 = vpop.permute.xlu2 %1276 }
0x2078   : > { %v1256_v56 = vpop.f32.mrf.mxu1 }
0x2079   : > { %v1257_v9 = vadd.f32 %v1256_v56, %v3726_v41  ;;  %v4086_v41 = vmul.f32 %v4046_v1, %v1200_v11 }
0x207b   : > { %v1259_v35 = vmul.f32 1.442695, %v1257_v9  ;;  %v1282_v27 = vsel %vm214_vm0, %v4086_v41, %v1277_v54 }
0x207d   : > { %3094 = vpow2.f32 %v1259_v35 }
0x2083   : > { %v3095_v36 = vpop.eup %3094 }
0x2084   : > { %v1261_v12 = vsel %vm214_vm0, %v3095_v36, 0.0 }
0x2085   : > { %1262 = vadd.xlane.f32.xlu0 %v1261_v12 }
0x20f8   : > { %v1263_v14 = vpop.xlane.xlu0 %1262 }
0x20f9   : > { %3096 = vrcp.f32 %v1263_v14 }
0x20ff   : > { %v3097_v16 = vpop.eup %3096 }
0x2100   : > { %v1265_v18 = vmul.f32 %v3097_v16, %v1263_v14 }
0x2102   : > { %v1266_v46 = vsub.f32 2.0, %v1265_v18 }
0x2104   : > { %v1267_v33 = vmul.f32 %v3097_v16, %v1266_v46 }
0x2106   : > { %v4081_v53 = vmul.f32 %v3095_v36, %v1267_v33 }
0x2108   : > { %1279 = vrot.lane.b32.xlu1 %v4081_v53, %s3414_s18 }
0x217a   : > { %v1280_v45 = vpop.permute.xlu1 %1279 }
0x217b   : > { %v1283_v43 = vsel %vm216_vm1, %v1282_v27, %v1280_v45 }
0x217c   : > { %v1284_v61 = vsel %vm218_vm2, %v1283_v43, %v1227_v13 }
0x217d   : > { %v1285_v62 = vsel %vm220_vm3, %v1284_v61, 1.0 }
0x217e   : > { %2903 = vmatmul.msk.f32.vlgmr.msra.gmra.mxu3 %vm222_vm4, %v1285_v62  ;;  %2904 = vmatmul.msk.f32.vlgmr.msrb.gmra.mxu0 %vm222_vm4, %v1285_v62 }
0x217f   : > { %1722 = vmatpush.msrb.mxu0 %v3955_v37  ;;  %1797 = vmatpush.msra.mxu3 %v3958_v15 }
0x2181   : > { %1723 = vmatpush.msrb.mxu0 %v3961_v17  ;;  %1798 = vmatpush.msra.mxu3 %v3964_v38 }
0x2183   : > { %1724 = vmatpush.msrb.mxu0 %v3967_v39  ;;  %1799 = vmatpush.msra.mxu3 %v3970_v42 }
0x2185   : > { %1725 = vmatpush.msrb.mxu0 %v3973_v58  ;;  %1800 = vmatpush.msra.mxu3 %v3976_v47 }
0x2187   : > { %1726 = vmatpush.msrb.mxu0 %v3979_v23  ;;  %1801 = vmatpush.msra.mxu3 %v3982_v2 }
0x2189   : > { %1727 = vmatpush.msrb.mxu0 %v3985_v49  ;;  %1802 = vmatpush.msra.mxu3 %v3988_v4 }
0x218b   : > { %1728 = vmatpush.msrb.mxu0 %v3991_v6 }
0x218d   : > { %1729 = vmatpush.msrb.mxu0 %v3994_v8 }
0x218f   : > { %1730 = vmatpush.msrb.mxu0 %v3997_v10 }
0x2201   : > { %v1306_v1 = vpop.f32.mrf.mxu3 }
0x2202   : > { %v1329_v11 = vmul.f32 0.5, %v1306_v1 }
0x2204   : > { %3098 = vtanh.f32 %v1329_v11 }
0x220a   : > { %v3099_v13 = vpop.eup %3098 }
0x220b   : > { %1335 = vrot.lane.b32.xlu2 %v3099_v13, %s3408_s27  ;;  %v1331_v28 = vadd.f32 1.0, %v3099_v13 }
0x220d   : > { %v1332_v40 = vmul.f32 0.5, %v1331_v28 }
0x220f   : > { %v1333_v9 = vmul.f32 %v1332_v40, %v4003_v55 }
0x2265   : > { %v1336_v48 = vpop.permute.xlu2 %1335 }
0x2266   : > { %v1338_v56 = vmul.f32 %v1336_v48, %v1332_v40 }
0x2268   : > { %1340 = vrot.lane.b32.xlu2 %v1338_v56, %s3409_s7 }
0x22c2   : > { %v1341_v35 = vpop.permute.xlu2 %1340 }
0x22c3   : > { %v4113_v36 = vadd.f32 %v1341_v35, %v1333_v9  ;;  %v1326_v9 = vpop.f32.mrf.mxu0 }
0x22c5   : > { %3100 = vtanh.f32 %v4113_v36 }
0x22cb   : > { %v3101_v12 = vpop.eup %3100 }
0x22cc   : > { %1346 = vrot.lane.b32.xlu2 %v3101_v12, %s3409_s7 }
0x22d4   : > { %1354 = vrot.lane.b32.xlu2 %v4060_v44, %s3408_s27 }
0x2326   : > { %v1347_v14 = vpop.permute.xlu2 %1346 }
0x2327   : > { %v1349_v16 = vmul.f32 %v1347_v14, %v1332_v40 }
0x2329   : > { %1351 = vrot.lane.b32.xlu1 %v1349_v16, %s3410_s8 }
0x232e   : > { %v1355_v18 = vpop.permute.xlu2 %1354 }
0x239b   : > { %v1352_v46 = vpop.permute.xlu1 %1351 }
0x239c   : > { %v1357_v33 = vsel %vm291_vm5, %v1352_v46, %v1355_v18 }
0x239d   : > { %2905 = vmatmul.msk.f32.vlgmr.msrb.gmra.mxu2 %vm293_vm6, %v1357_v33 }
0x239e   : > { %1742 = vmatpush.msrb.mxu2 %v4015_v19 }
0x23a0   : > { %1743 = vmatpush.msrb.mxu2 %v4018_v59 }
0x23a2   : > { %1744 = vmatpush.msrb.mxu2 %v4021_v20 }
0x23a4   : > { %1745 = vmatpush.msrb.mxu2 %v4024_v50 }
0x23a6   : > { %1746 = vmatpush.msrb.mxu2 %v4027_v21 }
0x23a8   : > { %1747 = vmatpush.msrb.mxu2 %v4030_v22 }
0x23aa   : > { %1748 = vmatpush.msrb.mxu2 %v4033_v52 }
0x23ac   : > { %1749 = vmatpush.msrb.mxu2 %v4036_v63 }
0x23ae   : > { %1750 = vmatpush.msrb.mxu2 %v4039_v25 }
0x2420   : > { %v1378_v55 = vpop.f32.mrf.mxu2 }
0x2421   : > { %v1379_v44 = vadd.f32 %v4042_v34, %v1378_v55 }
0x2423   : > { %v1381_v54 = vmul.f32 1.442695, %v1379_v44  ;;  %v1383_v27 = vmax.f32 %v1379_v44, 0.0 }
0x2425   : > { %3102 = vpow2.f32 %v1381_v54  ;;  %1418 = vrot.lane.b32.xlu2 %v1383_v27, %s3407_s17 }
0x242b   : > { %v3103_v45 = vpop.eup %3102 }
0x242c   : > { %2906 = vmatmul.msk.f32.vlgmr.msrb.gmra.mxu1 %vm214_vm0, %v3103_v45  ;;  %v1407_v43 = vsel %vm214_vm0, %v3103_v45, 0.0 }
0x242d   : > { %1408 = vadd.xlane.f32.xlu1 %v1407_v43  ;;  %1615 = vmatpush.msrb.mxu1 %v4052_v29 }
0x247f   : > { %v1419_v61 = vpop.permute.xlu2 %1418 }
0x2480   : > { %v1421_v62 = vsel %vm291_vm5, %v1352_v46, %v1419_v61 }
0x2481   : > { %1427 = vrot.lane.b32.xlu2 %v1421_v62, %s3411_s13 }
0x24a0   : > { %v1409_v1 = vpop.xlane.xlu1 %1408 }
0x24a1   : > { %3104 = vrcp.f32 %v1409_v1 }
0x24a7   : > { %v3105_v11 = vpop.eup %3104 }
0x24a8   : > { %v1411_v13 = vmul.f32 %v3105_v11, %v1409_v1 }
0x24a9   : > { %v1404_v48 = vpop.f32.mrf.mxu1 }
0x24aa   : > { %v1412_v28 = vsub.f32 2.0, %v1411_v13 }
0x24ac   : > { %v1413_v40 = vmul.f32 %v3105_v11, %v1412_v28  ;;  %v4148_v28 = vld [vmem:[#allocation5 + $0x150] ss:$0 sm:$0xff] }
0x24ae   : > { %v1415_v56 = vmul.f32 %v1413_v40, %v1404_v48 }
0x24b0   : > { %v1416_v35 = vadd.f32 %v1415_v56, %v1326_v9 }
0x24b2   : > { %v1422_v12 = vmul.f32 0.5, %v1416_v35 }
0x24b4   : > { %3106 = vtanh.f32 %v1422_v12 }
0x24ba   : > { %v3107_v14 = vpop.eup %3106 }
0x24bb   : > { %1432 = vrot.lane.b32.xlu0 %v3107_v14, %s3411_s13  ;;  %v1424_v18 = vadd.f32 1.0, %v3107_v14 }
0x24bd   : > { %v1425_v33 = vmul.f32 0.5, %v1424_v18 }
0x24db   : > { %v1428_v44 = vpop.permute.xlu2 %1427 }
0x24dc   : > { %v1430_v54 = vmul.f32 %v1428_v44, %v1425_v33  ;;  %v4156_v44 = vmul.f32 %v3103_v45, %v1413_v40 }
0x252d   : > { %v1433_v46 = vpop.permute.xlu0 %1432 }
0x252e   : > { %v1435_v55 = vmul.f32 %v1433_v46, %v1425_v33 }
0x2530   : > { %1437 = vrot.lane.b32.xlu2 %v1435_v55, %s3411_s13 }
0x258a   : > { %v1438_v27 = vpop.permute.xlu2 %1437 }
0x258b   : > { %v1440_v43 = vadd.f32 %v1438_v27, %v1430_v54 }
0x258d   : > { %3108 = vtanh.f32 %v1440_v43 }
0x2593   : > { %v3109_v61 = vpop.eup %3108 }
0x2594   : > { %1443 = vrot.lane.b32.xlu0 %v3109_v61, %s3411_s13 }
0x2606   : > { %v1444_v62 = vpop.permute.xlu0 %1443 }
0x2607   : > { %v1446_v1 = vmul.f32 %v1444_v62, %v1425_v33 }
0x2609   : > { %1448 = vrot.lane.b32.xlu2 %v1446_v1, %s3412_s14 }
0x2611   : > { %1489 = vrot.lane.b32.xlu2 %v1349_v16, %s3413_s15 }
0x2663   : > { %v1449_v11 = vpop.permute.xlu2 %1448 }
0x2664   : > { %2907 = vmatmul.msk.f32.vlgmr.msra.gmra.mxu1 %vm218_vm2, %v1449_v11 }
0x2665   : > { %1677 = vmatpush.msra.mxu1 %v4067_v3 }
0x2667   : > { %1678 = vmatpush.msra.mxu1 %v4070_v5 }
0x2669   : > { %1679 = vmatpush.msra.mxu1 %v4073_v31 }
0x266b   : > { %1680 = vmatpush.msra.mxu1 %v4076_v7  ;;  %v1490_v55 = vpop.permute.xlu2 %1489 }
0x266c   : > { %v1495_v54 = vsel %vm214_vm0, %v4156_v44, %v1490_v55 }
0x26e1   : > { %v1469_v13 = vpop.f32.mrf.mxu1 }
0x26e2   : > { %v1470_v48 = vadd.f32 %v4148_v28, %v1469_v13 }
0x26e4   : > { %v1472_v56 = vmul.f32 1.442695, %v1470_v48 }
0x26e6   : > { %3110 = vpow2.f32 %v1472_v56 }
0x26ec   : > { %v3111_v9 = vpop.eup %3110 }
0x26ed   : > { %v1474_v16 = vsel %vm214_vm0, %v3111_v9, 0.0 }
0x26ee   : > { %1475 = vadd.xlane.f32.xlu0 %v1474_v16 }
0x2761   : > { %v1476_v35 = vpop.xlane.xlu0 %1475 }
0x2762   : > { %3112 = vrcp.f32 %v1476_v35 }
0x2768   : > { %v3113_v12 = vpop.eup %3112 }
0x2769   : > { %v1478_v14 = vmul.f32 %v3113_v12, %v1476_v35 }
0x276b   : > { %v1479_v18 = vsub.f32 2.0, %v1478_v14 }
0x276d   : > { %v1480_v33 = vmul.f32 %v3113_v12, %v1479_v18 }
0x276f   : > { %v4152_v46 = vmul.f32 %v3111_v9, %v1480_v33 }
0x2771   : > { %1492 = vrot.lane.b32.xlu2 %v4152_v46, %s3414_s18 }
0x27cb   : > { %v1493_v27 = vpop.permute.xlu2 %1492 }
0x27cc   : > { %v1496_v61 = vsel %vm216_vm1, %v1495_v54, %v1493_v27 }
0x27cd   : > { %v1497_v62 = vsel %vm218_vm2, %v1496_v61, %v1440_v43 }
0x27ce   : > { %v1498_v11 = vsel %vm220_vm3, %v1497_v62, 1.0 }
0x27cf   : > { %2909 = vmatmul.msk.f32.vlgmr.msra.gmra.mxu2 %vm222_vm4, %v1498_v11  ;;  %2910 = vmatmul.msk.f32.vlgmr.msrb.gmra.mxu3 %vm222_vm4, %v1498_v11 }
0x27d0   : > { %1935 = vmatpush.msrb.mxu3 %v3955_v37  ;;  %2010 = vmatpush.msra.mxu2 %v3958_v15 }
0x27d2   : > { %1936 = vmatpush.msrb.mxu3 %v3961_v17  ;;  %2011 = vmatpush.msra.mxu2 %v3964_v38 }
0x27d4   : > { %1937 = vmatpush.msrb.mxu3 %v3967_v39  ;;  %2012 = vmatpush.msra.mxu2 %v3970_v42 }
0x27d6   : > { %1938 = vmatpush.msrb.mxu3 %v3973_v58  ;;  %2013 = vmatpush.msra.mxu2 %v3976_v47 }
0x27d8   : > { %1939 = vmatpush.msrb.mxu3 %v3979_v23  ;;  %2014 = vmatpush.msra.mxu2 %v3982_v2 }
0x27da   : > { %1940 = vmatpush.msrb.mxu3 %v3985_v49  ;;  %2015 = vmatpush.msra.mxu2 %v3988_v4 }
0x27dc   : > { %1941 = vmatpush.msrb.mxu3 %v3991_v6 }
0x27de   : > { %1942 = vmatpush.msrb.mxu3 %v3994_v8 }
0x27e0   : > { %1943 = vmatpush.msrb.mxu3 %v3997_v10 }
0x2852   : > { %v1519_v45 = vpop.f32.mrf.mxu2 }
0x2853   : > { %v1542_v40 = vmul.f32 0.5, %v1519_v45 }
0x2855   : > { %3114 = vtanh.f32 %v1542_v40 }
0x285b   : > { %v3115_v43 = vpop.eup %3114 }
0x285c   : > { %1548 = vrot.lane.b32.xlu1 %v3115_v43, %s3408_s27  ;;  %v1544_v13 = vadd.f32 1.0, %v3115_v43 }
0x285e   : > { %v1545_v48 = vmul.f32 0.5, %v1544_v13 }
0x2860   : > { %v1546_v16 = vmul.f32 %v1545_v48, %v4113_v36 }
0x2864   : > { %1567 = vrot.lane.b32.xlu1 %v1446_v1, %s3408_s27 }
0x28ce   : > { %v1549_v56 = vpop.permute.xlu1 %1548 }
0x28cf   : > { %v1551_v9 = vmul.f32 %v1549_v56, %v1545_v48 }
0x28d1   : > { %1553 = vrot.lane.b32.xlu2 %v1551_v9, %s3409_s7 }
0x28d6   : > { %v1568_v1 = vpop.permute.xlu1 %1567 }
0x292b   : > { %v1554_v35 = vpop.permute.xlu2 %1553 }
0x292c   : > { %v4184_v12 = vadd.f32 %v1554_v35, %v1546_v16 }
0x292e   : > { %3116 = vtanh.f32 %v4184_v12 }
0x2934   : > { %v3117_v14 = vpop.eup %3116 }
0x2935   : > { %1559 = vrot.lane.b32.xlu2 %v3117_v14, %s3409_s7 }
0x298f   : > { %v1560_v18 = vpop.permute.xlu2 %1559 }
0x2990   : > { %v1562_v33 = vmul.f32 %v1560_v18, %v1545_v48  ;;  %v1539_v18 = vpop.f32.mrf.mxu3 }
0x2992   : > { %1564 = vrot.lane.b32.xlu2 %v1562_v33, %s3410_s8 }
0x29ec   : > { %v1565_v55 = vpop.permute.xlu2 %1564 }
0x29ed   : > { %v1570_v54 = vsel %vm291_vm5, %v1565_v55, %v1568_v1 }
0x29ee   : > { %2911 = vmatmul.msk.f32.vlgmr.msra.gmra.mxu0 %vm293_vm6, %v1570_v54 }
0x29ef   : > { %1955 = vmatpush.msra.mxu0 %v4015_v19 }
0x29f1   : > { %1956 = vmatpush.msra.mxu0 %v4018_v59 }
0x29f3   : > { %1957 = vmatpush.msra.mxu0 %v4021_v20 }
0x29f5   : > { %1958 = vmatpush.msra.mxu0 %v4024_v50 }
0x29f7   : > { %1959 = vmatpush.msra.mxu0 %v4027_v21 }
0x29f9   : > { %1960 = vmatpush.msra.mxu0 %v4030_v22 }
0x29fb   : > { %1961 = vmatpush.msra.mxu0 %v4033_v52 }
0x29fd   : > { %1962 = vmatpush.msra.mxu0 %v4036_v63 }
0x29ff   : > { %1963 = vmatpush.msra.mxu0 %v4039_v25 }
0x2a6b   : > { %v1591_v36 = vpop.f32.mrf.mxu0 }
0x2a6c   : > { %v1592_v27 = vadd.f32 %v4042_v34, %v1591_v36 }
0x2a6e   : > { %v1594_v61 = vmul.f32 1.442695, %v1592_v27  ;;  %v1596_v62 = vmax.f32 %v1592_v27, 0.0 }
0x2a70   : > { %3118 = vpow2.f32 %v1594_v61  ;;  %1631 = vrot.lane.b32.xlu2 %v1596_v62, %s3407_s17 }
0x2a76   : > { %v3119_v11 = vpop.eup %3118 }
0x2a77   : > { %2912 = vmatmul.msk.f32.vlgmr.msrb.gmra.mxu1 %vm214_vm0, %v3119_v11  ;;  %v1620_v45 = vsel %vm214_vm0, %v3119_v11, 0.0 }
0x2a78   : > { %1621 = vadd.xlane.f32.xlu0 %v1620_v45  ;;  %1828 = vmatpush.msrb.mxu1 %v4052_v29 }
0x2aca   : > { %v1632_v40 = vpop.permute.xlu2 %1631 }
0x2acb   : > { %v1634_v43 = vsel %vm291_vm5, %v1565_v55, %v1632_v40 }
0x2acc   : > { %1640 = vrot.lane.b32.xlu0 %v1634_v43, %s3411_s13 }
0x2aeb   : > { %v1622_v13 = vpop.xlane.xlu0 %1621 }
0x2aec   : > { %3120 = vrcp.f32 %v1622_v13 }
0x2af2   : > { %v3121_v48 = vpop.eup %3120 }
0x2af3   : > { %v1624_v56 = vmul.f32 %v3121_v48, %v1622_v13 }
0x2af4   : > { %v1617_v35 = vpop.f32.mrf.mxu1 }
0x2af5   : > { %v1625_v9 = vsub.f32 2.0, %v1624_v56 }
0x2af7   : > { %v1626_v16 = vmul.f32 %v3121_v48, %v1625_v9 }
0x2af9   : > { %v1628_v14 = vmul.f32 %v1626_v16, %v1617_v35 }
0x2afb   : > { %v1629_v1 = vadd.f32 %v1628_v14, %v1539_v18 }
0x2afd   : > { %v1635_v54 = vmul.f32 0.5, %v1629_v1 }
0x2aff   : > { %3122 = vtanh.f32 %v1635_v54 }
0x2b05   : > { %v3123_v36 = vpop.eup %3122 }
0x2b06   : > { %1645 = vrot.lane.b32.xlu1 %v3123_v36, %s3411_s13  ;;  %v1637_v27 = vadd.f32 1.0, %v3123_v36 }
0x2b08   : > { %v1638_v61 = vmul.f32 0.5, %v1637_v27 }
0x2b3e   : > { %v1641_v45 = vpop.permute.xlu0 %1640 }
0x2b3f   : > { %v1643_v40 = vmul.f32 %v1641_v45, %v1638_v61 }
0x2b78   : > { %v1646_v55 = vpop.permute.xlu1 %1645 }
0x2b79   : > { %v1648_v62 = vmul.f32 %v1646_v55, %v1638_v61 }
0x2b7b   : > { %1650 = vrot.lane.b32.xlu2 %v1648_v62, %s3411_s13 }
0x2bd5   : > { %v1651_v43 = vpop.permute.xlu2 %1650 }
0x2bd6   : > { %v1653_v13 = vadd.f32 %v1651_v43, %v1643_v40  ;;  %v4226_v43 = vmul.f32 %v3119_v11, %v1626_v16 }
0x2bd8   : > { %3124 = vtanh.f32 %v1653_v13  ;;  %4634 = vst [vmem:[#allocation11_spill] sm:$0xff] %v4226_v43 }
0x2bde   : > { %v3125_v48 = vpop.eup %3124 }
0x2bdf   : > { %1656 = vrot.lane.b32.xlu1 %v3125_v48, %s3411_s13 }
0x2c51   : > { %v1657_v56 = vpop.permute.xlu1 %1656 }
0x2c52   : > { %v4210_v9 = vmul.f32 %v1657_v56, %v1638_v61 }
0x2c54   : > { %1661 = vrot.lane.b32.xlu2 %v4210_v9, %s3412_s14 }
0x2c5c   : > { %1702 = vrot.lane.b32.xlu2 %v1562_v33, %s3413_s15 }
0x2cae   : > { %v1662_v35 = vpop.permute.xlu2 %1661 }
0x2caf   : > { %2913 = vmatmul.msk.f32.vlgmr.msra.gmra.mxu1 %vm218_vm2, %v1662_v35 }
0x2cb0   : > { %1890 = vmatpush.msra.mxu1 %v4067_v3 }
0x2cb2   : > { %1891 = vmatpush.msra.mxu1 %v4070_v5 }
0x2cb4   : > { %1892 = vmatpush.msra.mxu1 %v4073_v31 }
0x2cb6   : > { %1893 = vmatpush.msra.mxu1 %v4076_v7  ;;  %v1703_v40 = vpop.permute.xlu2 %1702 }
0x2cb7   : > { %v1708_v48 = vsel %vm214_vm0, %v4226_v43, %v1703_v40 }
0x2d2c   : > { %v1682_v14 = vpop.f32.mrf.mxu1 }
0x2d2d   : > { %v1683_v18 = vadd.f32 %v4148_v28, %v1682_v14 }
0x2d2f   : > { %v1685_v1 = vmul.f32 1.442695, %v1683_v18 }
0x2d31   : > { %3126 = vpow2.f32 %v1685_v1 }
0x2d37   : > { %v3127_v54 = vpop.eup %3126 }
0x2d38   : > { %v1687_v36 = vsel %vm214_vm0, %v3127_v54, 0.0 }
0x2d39   : > { %1688 = vadd.xlane.f32.xlu1 %v1687_v36 }
0x2dac   : > { %v1689_v33 = vpop.xlane.xlu1 %1688 }
0x2dad   : > { %3128 = vrcp.f32 %v1689_v33 }
0x2db3   : > { %v3129_v27 = vpop.eup %3128 }
0x2db4   : > { %v1691_v61 = vmul.f32 %v3129_v27, %v1689_v33 }
0x2db6   : > { %v1692_v55 = vsub.f32 2.0, %v1691_v61 }
0x2db8   : > { %v1693_v62 = vmul.f32 %v3129_v27, %v1692_v55 }
0x2dba   : > { %v4222_v45 = vmul.f32 %v3127_v54, %v1693_v62 }
0x2dbc   : > { %1705 = vrot.lane.b32.xlu0 %v4222_v45, %s3414_s18 }
0x2e2e   : > { %v1706_v56 = vpop.permute.xlu0 %1705 }
0x2e2f   : > { %v1709_v35 = vsel %vm216_vm1, %v1708_v48, %v1706_v56 }
0x2e30   : > { %v1710_v14 = vsel %vm218_vm2, %v1709_v35, %v1653_v13 }
0x2e31   : > { %v1711_v18 = vsel %vm220_vm3, %v1710_v14, 1.0 }
0x2e32   : > { %2915 = vmatmul.msk.f32.vlgmr.msrb.gmra.mxu0 %vm222_vm4, %v1711_v18  ;;  %2916 = vmatmul.msk.f32.vlgmr.msrb.gmra.mxu2 %vm222_vm4, %v1711_v18 }
0x2e33   : > { %2148 = vmatpush.msrb.mxu2 %v3955_v37  ;;  %2223 = vmatpush.msrb.mxu0 %v3958_v15 }
0x2e35   : > { %2149 = vmatpush.msrb.mxu2 %v3961_v17  ;;  %2224 = vmatpush.msrb.mxu0 %v3964_v38 }
0x2e37   : > { %2150 = vmatpush.msrb.mxu2 %v3967_v39  ;;  %2225 = vmatpush.msrb.mxu0 %v3970_v42 }
0x2e39   : > { %2151 = vmatpush.msrb.mxu2 %v3973_v58  ;;  %2226 = vmatpush.msrb.mxu0 %v3976_v47 }
0x2e3b   : > { %2152 = vmatpush.msrb.mxu2 %v3979_v23  ;;  %2227 = vmatpush.msrb.mxu0 %v3982_v2 }
0x2e3d   : > { %2153 = vmatpush.msrb.mxu2 %v3985_v49  ;;  %2228 = vmatpush.msrb.mxu0 %v3988_v4 }
0x2e3f   : > { %2154 = vmatpush.msrb.mxu2 %v3991_v6 }
0x2e41   : > { %2155 = vmatpush.msrb.mxu2 %v3994_v8 }
0x2e43   : > { %2156 = vmatpush.msrb.mxu2 %v3997_v10 }
0x2eaf   : > { %v1732_v11 = vpop.f32.mrf.mxu0 }
0x2eb0   : > { %v1755_v16 = vmul.f32 0.5, %v1732_v11 }
0x2eb2   : > { %3130 = vtanh.f32 %v1755_v16 }
0x2eb8   : > { %v3131_v13 = vpop.eup %3130 }
0x2eb9   : > { %1761 = vrot.lane.b32.xlu2 %v3131_v13, %s3408_s27  ;;  %v1757_v1 = vadd.f32 1.0, %v3131_v13 }
0x2ebb   : > { %v1758_v54 = vmul.f32 0.5, %v1757_v1 }
0x2ebd   : > { %v1759_v27 = vmul.f32 %v1758_v54, %v4184_v12 }
0x2f13   : > { %v1762_v36 = vpop.permute.xlu2 %1761 }
0x2f14   : > { %v1764_v33 = vmul.f32 %v1762_v36, %v1758_v54 }
0x2f16   : > { %1766 = vrot.lane.b32.xlu0 %v1764_v33, %s3409_s7 }
0x2f88   : > { %v1767_v61 = vpop.permute.xlu0 %1766 }
0x2f89   : > { %v4253_v55 = vadd.f32 %v1767_v61, %v1759_v27 }
0x2f8b   : > { %3132 = vtanh.f32 %v4253_v55 }
0x2f91   : > { %v3133_v62 = vpop.eup %3132 }
0x2f92   : > { %1772 = vrot.lane.b32.xlu2 %v3133_v62, %s3409_s7 }
0x2f9a   : > { %1780 = vrot.lane.b32.xlu2 %v4210_v9, %s3408_s27 }
0x2fec   : > { %v1773_v40 = vpop.permute.xlu2 %1772 }
0x2fed   : > { %v1775_v48 = vmul.f32 %v1773_v40, %v1758_v54 }
0x2fef   : > { %1777 = vrot.lane.b32.xlu0 %v1775_v48, %s3410_s8 }
0x2ff4   : > { %v1781_v56 = vpop.permute.xlu2 %1780 }
0x3061   : > { %v1778_v35 = vpop.permute.xlu0 %1777 }
0x3062   : > { %v1783_v14 = vsel %vm291_vm5, %v1778_v35, %v1781_v56 }
0x3063   : > { %2917 = vmatmul.msk.f32.vlgmr.msra.gmra.mxu3 %vm293_vm6, %v1783_v14  ;;  %v1752_v14 = vpop.f32.mrf.mxu2 }
0x3064   : > { %2168 = vmatpush.msra.mxu3 %v4015_v19 }
0x3066   : > { %2169 = vmatpush.msra.mxu3 %v4018_v59 }
0x3068   : > { %2170 = vmatpush.msra.mxu3 %v4021_v20 }
0x306a   : > { %2171 = vmatpush.msra.mxu3 %v4024_v50 }
0x306c   : > { %2172 = vmatpush.msra.mxu3 %v4027_v21 }
0x306e   : > { %2173 = vmatpush.msra.mxu3 %v4030_v22 }
0x3070   : > { %2174 = vmatpush.msra.mxu3 %v4033_v52 }
0x3072   : > { %2175 = vmatpush.msra.mxu3 %v4036_v63 }
0x3074   : > { %2176 = vmatpush.msra.mxu3 %v4039_v25 }
0x30e6   : > { %v1804_v12 = vpop.f32.mrf.mxu3 }
0x30e7   : > { %v1805_v9 = vadd.f32 %v4042_v34, %v1804_v12 }
0x30e9   : > { %v1807_v18 = vmul.f32 1.442695, %v1805_v9  ;;  %v1809_v11 = vmax.f32 %v1805_v9, 0.0 }
0x30eb   : > { %3134 = vpow2.f32 %v1807_v18  ;;  %1844 = vrot.lane.b32.xlu2 %v1809_v11, %s3407_s17 }
0x30f1   : > { %v3135_v16 = vpop.eup %3134 }
0x30f2   : > { %2918 = vmatmul.msk.f32.vlgmr.msrb.gmra.mxu1 %vm214_vm0, %v3135_v16  ;;  %v1833_v13 = vsel %vm214_vm0, %v3135_v16, 0.0 }
0x30f3   : > { %1834 = vadd.xlane.f32.xlu0 %v1833_v13  ;;  %2041 = vmatpush.msrb.mxu1 %v4052_v29 }
0x3145   : > { %v1845_v1 = vpop.permute.xlu2 %1844 }
0x3146   : > { %v1847_v54 = vsel %vm291_vm5, %v1778_v35, %v1845_v1 }
0x3147   : > { %1853 = vrot.lane.b32.xlu2 %v1847_v54, %s3411_s13 }
0x3166   : > { %v1835_v36 = vpop.xlane.xlu0 %1834 }
0x3167   : > { %3136 = vrcp.f32 %v1835_v36 }
0x316d   : > { %v3137_v33 = vpop.eup %3136 }
0x316e   : > { %v1837_v27 = vmul.f32 %v3137_v33, %v1835_v36 }
0x316f   : > { %v1830_v40 = vpop.f32.mrf.mxu1 }
0x3170   : > { %v1838_v61 = vsub.f32 2.0, %v1837_v27 }
0x3172   : > { %v1839_v62 = vmul.f32 %v3137_v33, %v1838_v61 }
0x3174   : > { %v1841_v56 = vmul.f32 %v1839_v62, %v1830_v40 }
0x3176   : > { %v1842_v12 = vadd.f32 %v1841_v56, %v1752_v14 }
0x3178   : > { %v1848_v9 = vmul.f32 0.5, %v1842_v12 }
0x317a   : > { %3138 = vtanh.f32 %v1848_v9 }
0x3180   : > { %v3139_v18 = vpop.eup %3138 }
0x3181   : > { %1858 = vrot.lane.b32.xlu1 %v3139_v18, %s3411_s13  ;;  %v1850_v11 = vadd.f32 1.0, %v3139_v18 }
0x3183   : > { %v1851_v13 = vmul.f32 0.5, %v1850_v11 }
0x31a1   : > { %v1854_v54 = vpop.permute.xlu2 %1853 }
0x31a2   : > { %v1856_v43 = vmul.f32 %v1854_v54, %v1851_v13 }
0x31f3   : > { %v1859_v35 = vpop.permute.xlu1 %1858 }
0x31f4   : > { %v1861_v1 = vmul.f32 %v1859_v35, %v1851_v13 }
0x31f6   : > { %1863 = vrot.lane.b32.xlu2 %v1861_v1, %s3411_s13 }
0x3250   : > { %v1864_v36 = vpop.permute.xlu2 %1863 }
0x3251   : > { %v1866_v27 = vadd.f32 %v1864_v36, %v1856_v43 }
0x3253   : > { %3140 = vtanh.f32 %v1866_v27 }
0x3259   : > { %v3141_v33 = vpop.eup %3140 }
0x325a   : > { %1869 = vrot.lane.b32.xlu2 %v3141_v33, %s3411_s13  ;;  %v4297_v33 = vmul.f32 %v3135_v16, %v1839_v62 }
0x32b4   : > { %v1870_v61 = vpop.permute.xlu2 %1869 }
0x32b5   : > { %v4281_v40 = vmul.f32 %v1870_v61, %v1851_v13 }
0x32b7   : > { %1874 = vrot.lane.b32.xlu1 %v4281_v40, %s3412_s14 }
0x32bf   : > { %1915 = vrot.lane.b32.xlu1 %v1775_v48, %s3413_s15 }
0x3329   : > { %v1875_v56 = vpop.permute.xlu1 %1874 }
0x332a   : > { %2919 = vmatmul.msk.f32.vlgmr.msra.gmra.mxu1 %vm218_vm2, %v1875_v56 }
0x332b   : > { %2103 = vmatpush.msra.mxu1 %v4067_v3 }
0x332d   : > { %2104 = vmatpush.msra.mxu1 %v4070_v5 }
0x332f   : > { %2105 = vmatpush.msra.mxu1 %v4073_v31 }
0x3331   : > { %2106 = vmatpush.msra.mxu1 %v4076_v7  ;;  %v1916_v36 = vpop.permute.xlu1 %1915 }
0x3332   : > { %v1921_v61 = vsel %vm214_vm0, %v4297_v33, %v1916_v36 }
0x33a7   : > { %v1895_v43 = vpop.f32.mrf.mxu1 }
0x33a8   : > { %v1896_v14 = vadd.f32 %v4148_v28, %v1895_v43 }
0x33aa   : > { %v1898_v12 = vmul.f32 1.442695, %v1896_v14 }
0x33ac   : > { %3142 = vpow2.f32 %v1898_v12 }
0x33b2   : > { %v3143_v9 = vpop.eup %3142 }
0x33b3   : > { %v1900_v18 = vsel %vm214_vm0, %v3143_v9, 0.0 }
0x33b4   : > { %1901 = vadd.xlane.f32.xlu2 %v1900_v18 }
0x3427   : > { %v1902_v48 = vpop.xlane.xlu2 %1901 }
0x3428   : > { %3144 = vrcp.f32 %v1902_v48 }
0x342e   : > { %v3145_v11 = vpop.eup %3144 }
0x342f   : > { %v1904_v13 = vmul.f32 %v3145_v11, %v1902_v48 }
0x3431   : > { %v1905_v35 = vsub.f32 2.0, %v1904_v13 }
0x3433   : > { %v1906_v1 = vmul.f32 %v3145_v11, %v1905_v35 }
0x3435   : > { %v4293_v54 = vmul.f32 %v3143_v9, %v1906_v1 }
0x3437   : > { %1918 = vrot.lane.b32.xlu0 %v4293_v54, %s3414_s18 }
0x34a9   : > { %v1919_v56 = vpop.permute.xlu0 %1918 }
0x34aa   : > { %v1922_v43 = vsel %vm216_vm1, %v1921_v61, %v1919_v56 }
0x34ab   : > { %v1923_v14 = vsel %vm218_vm2, %v1922_v43, %v1866_v27 }
0x34ac   : > { %v1924_v12 = vsel %vm220_vm3, %v1923_v14, 1.0 }
0x34ad   : > { %2921 = vmatmul.msk.f32.vlgmr.msrb.gmra.mxu3 %vm222_vm4, %v1924_v12  ;;  %2922 = vmatmul.msk.f32.vlgmr.msra.gmra.mxu0 %vm222_vm4, %v1924_v12 }
0x34ae   : > { %2361 = vmatpush.msra.mxu0 %v3955_v37  ;;  %2436 = vmatpush.msrb.mxu3 %v3958_v15 }
0x34b0   : > { %2362 = vmatpush.msra.mxu0 %v3961_v17  ;;  %2437 = vmatpush.msrb.mxu3 %v3964_v38 }
0x34b2   : > { %2363 = vmatpush.msra.mxu0 %v3967_v39  ;;  %2438 = vmatpush.msrb.mxu3 %v3970_v42 }
0x34b4   : > { %2364 = vmatpush.msra.mxu0 %v3973_v58  ;;  %2439 = vmatpush.msrb.mxu3 %v3976_v47 }
0x34b6   : > { %2365 = vmatpush.msra.mxu0 %v3979_v23  ;;  %2440 = vmatpush.msrb.mxu3 %v3982_v2 }
0x34b8   : > { %2366 = vmatpush.msra.mxu0 %v3985_v49  ;;  %2441 = vmatpush.msrb.mxu3 %v3988_v4 }
0x34ba   : > { %2367 = vmatpush.msra.mxu0 %v3991_v6 }
0x34bc   : > { %2368 = vmatpush.msra.mxu0 %v3994_v8 }
0x34be   : > { %2369 = vmatpush.msra.mxu0 %v3997_v10 }
0x3530   : > { %v1945_v37 = vpop.f32.mrf.mxu3 }
0x3531   : > { %v1968_v15 = vmul.f32 0.5, %v1945_v37 }
0x3533   : > { %3146 = vtanh.f32 %v1968_v15 }
0x3539   : > { %v3147_v17 = vpop.eup %3146 }
0x353a   : > { %1974 = vrot.lane.b32.xlu1 %v3147_v17, %s3408_s27  ;;  %v1970_v38 = vadd.f32 1.0, %v3147_v17 }
0x353c   : > { %v1971_v39 = vmul.f32 0.5, %v1970_v38 }
0x353e   : > { %v1972_v47 = vmul.f32 %v1971_v39, %v4253_v55 }
0x35ac   : > { %v1975_v42 = vpop.permute.xlu1 %1974 }
0x35ad   : > { %v1977_v58 = vmul.f32 %v1975_v42, %v1971_v39 }
0x35af   : > { %1979 = vrot.lane.b32.xlu1 %v1977_v58, %s3409_s7 }
0x3621   : > { %v1980_v23 = vpop.permute.xlu1 %1979 }
0x3622   : > { %v4324_v2 = vadd.f32 %v1980_v23, %v1972_v47 }
0x3624   : > { %3148 = vtanh.f32 %v4324_v2 }
0x362a   : > { %v3149_v49 = vpop.eup %3148 }
0x362b   : > { %1985 = vrot.lane.b32.xlu0 %v3149_v49, %s3409_s7 }
0x3633   : > { %1993 = vrot.lane.b32.xlu0 %v4281_v40, %s3408_s27  ;;  %v1965_v40 = vpop.f32.mrf.mxu0 }
0x369d   : > { %v1986_v4 = vpop.permute.xlu0 %1985 }
0x369e   : > { %v1988_v6 = vmul.f32 %v1986_v4, %v1971_v39 }
0x36a0   : > { %1990 = vrot.lane.b32.xlu1 %v1988_v6, %s3410_s8 }
0x36a5   : > { %v1994_v8 = vpop.permute.xlu0 %1993 }
0x3712   : > { %v1991_v10 = vpop.permute.xlu1 %1990 }
0x3713   : > { %v1996_v16 = vsel %vm291_vm5, %v1991_v10, %v1994_v8 }
0x3714   : > { %2923 = vmatmul.msk.f32.vlgmr.msra.gmra.mxu2 %vm293_vm6, %v1996_v16 }
0x3715   : > { %2381 = vmatpush.msra.mxu2 %v4015_v19 }
0x3717   : > { %2382 = vmatpush.msra.mxu2 %v4018_v59 }
0x3719   : > { %2383 = vmatpush.msra.mxu2 %v4021_v20 }
0x371b   : > { %2384 = vmatpush.msra.mxu2 %v4024_v50 }
0x371d   : > { %2385 = vmatpush.msra.mxu2 %v4027_v21 }
0x371f   : > { %2386 = vmatpush.msra.mxu2 %v4030_v22 }
0x3721   : > { %2387 = vmatpush.msra.mxu2 %v4033_v52 }
0x3723   : > { %2388 = vmatpush.msra.mxu2 %v4036_v63 }
0x3725   : > { %2389 = vmatpush.msra.mxu2 %v4039_v25 }
0x3797   : > { %v2017_v55 = vpop.f32.mrf.mxu2 }
0x3798   : > { %v2018_v62 = vadd.f32 %v4042_v34, %v2017_v55 }
0x379a   : > { %v2020_v19 = vmul.f32 1.442695, %v2018_v62  ;;  %v2022_v27 = vmax.f32 %v2018_v62, 0.0 }
0x379c   : > { %3150 = vpow2.f32 %v2020_v19  ;;  %2057 = vrot.lane.b32.xlu2 %v2022_v27, %s3407_s17  ;;  %v3241_v19 = vld [vmem:[#allocation5 + $0x80] sm:$0xff] }
0x379d   : > { %v3242_v27 = vld [vmem:[#allocation5 + $0xe0] sm:$0xff] }
0x37a2   : > { %v3151_v59 = vpop.eup %3150 }
0x37a3   : > { %2924 = vmatmul.msk.f32.vlgmr.msrb.gmra.mxu1 %vm214_vm0, %v3151_v59  ;;  %v2046_v20 = vsel %vm214_vm0, %v3151_v59, 0.0 }
0x37a4   : > { %2047 = vadd.xlane.f32.xlu1 %v2046_v20  ;;  %2254 = vmatpush.msrb.mxu1 %v4052_v29  ;;  %v3244_v20 = vld [vmem:[#allocation5 + $0xd0] sm:$0xff] }
0x37f6   : > { %v2058_v11 = vpop.permute.xlu2 %2057 }
0x37f7   : > { %v2060_v13 = vsel %vm291_vm5, %v1991_v10, %v2058_v11 }
0x3817   : > { %v2048_v50 = vpop.xlane.xlu1 %2047 }
0x3818   : > { %3152 = vrcp.f32 %v2048_v50 }
0x381e   : > { %v3153_v21 = vpop.eup %3152 }
0x381f   : > { %v2050_v22 = vmul.f32 %v3153_v21, %v2048_v50  ;;  %v3245_v50 = vld [vmem:[#allocation5 + $0x60] sm:$0xff] }
0x3820   : > { %v2043_v25 = vpop.f32.mrf.mxu1 }
0x3821   : > { %v2051_v52 = vsub.f32 2.0, %v2050_v22  ;;  %v3247_v22 = vld [vmem:[#allocation5 + $0x50] sm:$0xff] }
0x3823   : > { %v2052_v63 = vmul.f32 %v3153_v21, %v2051_v52  ;;  %v3246_v21 = vld [vmem:[#allocation5 + $0xc0] sm:$0xff]  ;;  %v3248_v52 = vld [vmem:[#allocation5 + $0xb0] sm:$0xff] }
0x3825   : > { %v2054_v34 = vmul.f32 %v2052_v63, %v2043_v25  ;;  %v3250_v25 = vld [vmem:[#allocation5 + $0xa0] sm:$0xff] }
0x3827   : > { %v2055_v9 = vadd.f32 %v2054_v34, %v1965_v40  ;;  %v3251_v34 = vld [vmem:[#allocation5 + $0x30] sm:$0xff] }
0x3828   : > { %v3252_v40 = vld [vmem:[#allocation5 + $0x90] sm:$0xff] }
0x3829   : > { %v2061_v18 = vmul.f32 0.5, %v2055_v9  ;;  %v3253_v9 = vld [vmem:[#allocation5 + $0x20] sm:$0xff] }
0x382b   : > { %3154 = vtanh.f32 %v2061_v18  ;;  %v3254_v18 = vld [vmem:[#allocation5 + $0x10] sm:$0xff] }
0x3831   : > { %v3155_v48 = vpop.eup %3154 }
0x3832   : > { %2071 = vrot.lane.b32.xlu0 %v3155_v48, %s3411_s13  ;;  %v2063_v29 = vadd.f32 1.0, %v3155_v48  ;;  %v3255_v48 = vld [vmem:[#allocation5] sm:$0xff] }
0x3834   : > { %v2064_v35 = vmul.f32 0.5, %v2063_v29 }
0x383a   : > { %2066 = vrot.lane.b32.xlu0 %v2060_v13, %s3411_s13 }
0x38a4   : > { %v2072_v1 = vpop.permute.xlu0 %2071 }
0x38a5   : > { %v2074_v36 = vmul.f32 %v2072_v1, %v2064_v35 }
0x38a7   : > { %2076 = vrot.lane.b32.xlu0 %v2074_v36, %s3411_s13 }
0x38ac   : > { %v2067_v61 = vpop.permute.xlu0 %2066 }
0x38ad   : > { %v2069_v56 = vmul.f32 %v2067_v61, %v2064_v35 }
0x3919   : > { %v2077_v43 = vpop.permute.xlu0 %2076 }
0x391a   : > { %v2079_v14 = vadd.f32 %v2077_v43, %v2069_v56 }
0x391c   : > { %3156 = vtanh.f32 %v2079_v14 }
0x3922   : > { %v3157_v12 = vpop.eup %3156 }
0x3923   : > { %2082 = vrot.lane.b32.xlu2 %v3157_v12, %s3411_s13 }
0x397d   : > { %v2083_v37 = vpop.permute.xlu2 %2082 }
0x397e   : > { %v4352_v15 = vmul.f32 %v2083_v37, %v2064_v35 }
0x3980   : > { %2087 = vrot.lane.b32.xlu0 %v4352_v15, %s3412_s14 }
0x3988   : > { %2128 = vrot.lane.b32.xlu0 %v1988_v6, %s3413_s15 }
0x39f2   : > { %v2088_v17 = vpop.permute.xlu0 %2087 }
0x39f3   : > { %2925 = vmatmul.msk.f32.vlgmr.msra.gmra.mxu1 %vm218_vm2, %v2088_v17 }
0x39f4   : > { %2316 = vmatpush.msra.mxu1 %v4067_v3 }
0x39f6   : > { %2317 = vmatpush.msra.mxu1 %v4070_v5 }
0x39f8   : > { %2318 = vmatpush.msra.mxu1 %v4073_v31 }
0x39fa   : > { %2319 = vmatpush.msra.mxu1 %v4076_v7  ;;  %v2129_v31 = vpop.permute.xlu0 %2128  ;;  %v4368_v7 = vmul.f32 %v3151_v59, %v2052_v63  ;;  %v3243_v59 = vld [vmem:[#allocation5 + $0x70] sm:$0xff]  ;;  %v3249_v63 = vld [vmem:[#allocation5 + $0x40] sm:$0xff] }
0x39fc   : > { %v2134_v8 = vsel %vm214_vm0, %v4368_v7, %v2129_v31 }
0x3a70   : > { %v2108_v38 = vpop.f32.mrf.mxu1 }
0x3a71   : > { %v2109_v39 = vadd.f32 %v4148_v28, %v2108_v38 }
0x3a73   : > { %v2111_v42 = vmul.f32 1.442695, %v2109_v39 }
0x3a75   : > { %3158 = vpow2.f32 %v2111_v42  ;;  %v3256_v42 = vld [vmem:[#allocation5 + $0x88] sm:$0xff] }
0x3a7b   : > { %v3159_v58 = vpop.eup %3158 }
0x3a7c   : > { %v2113_v47 = vsel %vm214_vm0, %v3159_v58, 0.0 }
0x3a7d   : > { %2114 = vadd.xlane.f32.xlu2 %v2113_v47  ;;  %v3258_v47 = vld [vmem:[#allocation5 + $0x68] sm:$0xff] }
0x3af0   : > { %v2115_v23 = vpop.xlane.xlu2 %2114 }
0x3af1   : > { %3160 = vrcp.f32 %v2115_v23 }
0x3af7   : > { %v3161_v49 = vpop.eup %3160 }
0x3af8   : > { %v2117_v4 = vmul.f32 %v3161_v49, %v2115_v23  ;;  %v3259_v23 = vld [vmem:[#allocation5 + $0x58] sm:$0xff] }
0x3afa   : > { %v2118_v3 = vsub.f32 2.0, %v2117_v4  ;;  %v3262_v4 = vld [vmem:[#allocation5 + $0x28] sm:$0xff] }
0x3afc   : > { %v2119_v6 = vmul.f32 %v3161_v49, %v2118_v3  ;;  %v3261_v49 = vld [vmem:[#allocation5 + $0x38] sm:$0xff] }
0x3afd   : > { %v3263_v3 = vld [vmem:[#allocation5 + $0x18] sm:$0xff] }
0x3afe   : > { %v4364_v5 = vmul.f32 %v3159_v58, %v2119_v6  ;;  %v3257_v58 = vld [vmem:[#allocation5 + $0x78] sm:$0xff]  ;;  %v3264_v6 = vld [vmem:[#allocation5 + $0x8] sm:$0xff] }
0x3b00   : > { %2131 = vrot.lane.b32.xlu1 %v4364_v5, %s3414_s18 }
0x3b72   : > { %v2132_v10 = vpop.permute.xlu1 %2131 }
0x3b73   : > { %v2135_v16 = vsel %vm216_vm1, %v2134_v8, %v2132_v10  ;;  %v4392_v8 = vld [vmem:[#allocation5 + $0xf0] ss:$0 sm:$0xff] }
0x3b74   : > { %v2136_v55 = vsel %vm218_vm2, %v2135_v16, %v2079_v14 }
0x3b75   : > { %v2137_v62 = vsel %vm220_vm3, %v2136_v55, 1.0 }
0x3b76   : > { %2927 = vmatmul.msk.f32.vlgmr.msrb.gmra.mxu2 %vm222_vm4, %v2137_v62  ;;  %2928 = vmatmul.msk.f32.vlgmr.msra.gmra.mxu3 %vm222_vm4, %v2137_v62 }
0x3b77   : > { %2574 = vmatpush.msra.mxu3 %v3241_v19  ;;  %2649 = vmatpush.msrb.mxu2 %v3242_v27  ;;  %v4402_v27 = vld [vmem:[#allocation5 + $0x100] sm:$0xff] }
0x3b79   : > { %2575 = vmatpush.msra.mxu3 %v3243_v59  ;;  %2650 = vmatpush.msrb.mxu2 %v3244_v20 }
0x3b7b   : > { %2576 = vmatpush.msra.mxu3 %v3245_v50  ;;  %2651 = vmatpush.msrb.mxu2 %v3246_v21 }
0x3b7d   : > { %2577 = vmatpush.msra.mxu3 %v3247_v22  ;;  %2652 = vmatpush.msrb.mxu2 %v3248_v52 }
0x3b7f   : > { %2578 = vmatpush.msra.mxu3 %v3249_v63  ;;  %2653 = vmatpush.msrb.mxu2 %v3250_v25 }
0x3b81   : > { %2579 = vmatpush.msra.mxu3 %v3251_v34  ;;  %2654 = vmatpush.msrb.mxu2 %v3252_v40 }
0x3b83   : > { %2580 = vmatpush.msra.mxu3 %v3253_v9 }
0x3b85   : > { %2581 = vmatpush.msra.mxu3 %v3254_v18 }
0x3b87   : > { %2582 = vmatpush.msra.mxu3 %v3255_v48 }
0x3bf9   : > { %v2158_v11 = vpop.f32.mrf.mxu2  ;;  %v2178_v40 = vpop.f32.mrf.mxu3 }
0x3bfa   : > { %v2181_v13 = vmul.f32 0.5, %v2158_v11 }
0x3bfc   : > { %3162 = vtanh.f32 %v2181_v13 }
0x3c02   : > { %v3163_v29 = vpop.eup %3162 }
0x3c03   : > { %2187 = vrot.lane.b32.xlu0 %v3163_v29, %s3408_s27  ;;  %v2183_v35 = vadd.f32 1.0, %v3163_v29 }
0x3c05   : > { %v2184_v1 = vmul.f32 0.5, %v2183_v35 }
0x3c07   : > { %v2185_v56 = vmul.f32 %v2184_v1, %v4324_v2 }
0x3c75   : > { %v2188_v36 = vpop.permute.xlu0 %2187 }
0x3c76   : > { %v2190_v61 = vmul.f32 %v2188_v36, %v2184_v1 }
0x3c78   : > { %2192 = vrot.lane.b32.xlu0 %v2190_v61, %s3409_s7 }
0x3cea   : > { %v2193_v43 = vpop.permute.xlu0 %2192 }
0x3ceb   : > { %v4380_v14 = vadd.f32 %v2193_v43, %v2185_v56 }
0x3ced   : > { %3164 = vtanh.f32 %v4380_v14 }
0x3cf3   : > { %v3165_v12 = vpop.eup %3164 }
0x3cf4   : > { %2198 = vrot.lane.b32.xlu0 %v3165_v12, %s3409_s7 }
0x3cfc   : > { %2206 = vrot.lane.b32.xlu0 %v4352_v15, %s3408_s27  ;;  %v3260_v15 = vld [vmem:[#allocation5 + $0x48] sm:$0xff] }
0x3d66   : > { %v2199_v37 = vpop.permute.xlu0 %2198 }
0x3d67   : > { %v4386_v17 = vmul.f32 %v2199_v37, %v2184_v1 }
0x3d69   : > { %2203 = vrot.lane.b32.xlu1 %v4386_v17, %s3410_s8 }
0x3d6e   : > { %v2207_v38 = vpop.permute.xlu0 %2206 }
0x3ddb   : > { %v2204_v39 = vpop.permute.xlu1 %2203 }
0x3ddc   : > { %v2209_v2 = vsel %vm291_vm5, %v2204_v39, %v2207_v38 }
0x3ddd   : > { %2929 = vmatmul.msk.f32.vlgmr.msrb.gmra.mxu0 %vm293_vm6, %v2209_v2  ;;  %v4417_v2 = vld [vmem:[#allocation5 + $0x130] sm:$0xff] }
0x3dde   : > { %2594 = vmatpush.msrb.mxu0 %v3256_v42  ;;  %v4420_v42 = vld [vmem:[#allocation5 + $0x120] sm:$0xff] }
0x3de0   : > { %2595 = vmatpush.msrb.mxu0 %v3257_v58  ;;  %v4423_v58 = vld [vmem:[#allocation5 + $0x110] sm:$0xff] }
0x3de2   : > { %2596 = vmatpush.msrb.mxu0 %v3258_v47 }
0x3de4   : > { %2597 = vmatpush.msrb.mxu0 %v3259_v23 }
0x3de6   : > { %2598 = vmatpush.msrb.mxu0 %v3260_v15 }
0x3de8   : > { %2599 = vmatpush.msrb.mxu0 %v3261_v49 }
0x3dea   : > { %2600 = vmatpush.msrb.mxu0 %v3262_v4 }
0x3dec   : > { %2601 = vmatpush.msrb.mxu0 %v3263_v3 }
0x3dee   : > { %2602 = vmatpush.msrb.mxu0 %v3264_v6 }
0x3e5a   : > { %v2230_v31 = vpop.f32.mrf.mxu0 }
0x3e5b   : > { %v2231_v10 = vadd.f32 %v4392_v8, %v2230_v31 }
0x3e5d   : > { %v2233_v16 = vmul.f32 1.442695, %v2231_v10  ;;  %v2235_v55 = vmax.f32 %v2231_v10, 0.0 }
0x3e5f   : > { %3166 = vpow2.f32 %v2233_v16  ;;  %2270 = vrot.lane.b32.xlu0 %v2235_v55, %s3407_s17 }
0x3e65   : > { %v4396_v62 = vpop.eup %3166 }
0x3e66   : > { %2930 = vmatmul.msk.f32.vlgmr.msrb.gmra.mxu1 %vm214_vm0, %v4396_v62  ;;  %v2259_v19 = vsel %vm214_vm0, %v4396_v62, 0.0 }
0x3e67   : > { %2260 = vadd.xlane.f32.xlu1 %v2259_v19  ;;  %2467 = vmatpush.msrb.mxu1 %v4402_v27 }
0x3ed1   : > { %v2271_v59 = vpop.permute.xlu0 %2270 }
0x3ed2   : > { %v2273_v20 = vsel %vm291_vm5, %v2204_v39, %v2271_v59  ;;  %v4414_v39 = vld [vmem:[#allocation5 + $0x140] sm:$0xff] }
0x3ed3   : > { %2279 = vrot.lane.b32.xlu0 %v2273_v20, %s3411_s13 }
0x3eda   : > { %v2261_v50 = vpop.xlane.xlu1 %2260 }
0x3edb   : > { %3168 = vrcp.f32 %v2261_v50 }
0x3ee1   : > { %v3169_v21 = vpop.eup %3168 }
0x3ee2   : > { %v2263_v22 = vmul.f32 %v3169_v21, %v2261_v50 }
0x3ee3   : > { %v2256_v25 = vpop.f32.mrf.mxu1 }
0x3ee4   : > { %v2264_v52 = vsub.f32 2.0, %v2263_v22 }
0x3ee6   : > { %v2265_v63 = vmul.f32 %v3169_v21, %v2264_v52 }
0x3ee8   : > { %v2267_v34 = vmul.f32 %v2265_v63, %v2256_v25  ;;  %v4434_v55 = vmul.f32 %v4396_v62, %v2265_v63 }
0x3eea   : > { %v2268_v9 = vadd.f32 %v2267_v34, %v2178_v40 }
0x3eec   : > { %v2274_v18 = vmul.f32 0.5, %v2268_v9 }
0x3eee   : > { %3170 = vtanh.f32 %v2274_v18 }
0x3ef4   : > { %v3171_v48 = vpop.eup %3170 }
0x3ef5   : > { %2284 = vrot.lane.b32.xlu2 %v3171_v48, %s3411_s13  ;;  %v2276_v11 = vadd.f32 1.0, %v3171_v48 }
0x3ef7   : > { %v2277_v13 = vmul.f32 0.5, %v2276_v11 }
0x3f45   : > { %v2280_v1 = vpop.permute.xlu0 %2279 }
0x3f46   : > { %v2282_v36 = vmul.f32 %v2280_v1, %v2277_v13 }
0x3f4f   : > { %v2285_v29 = vpop.permute.xlu2 %2284 }
0x3f50   : > { %v2287_v35 = vmul.f32 %v2285_v29, %v2277_v13 }
0x3f52   : > { %2289 = vrot.lane.b32.xlu0 %v2287_v35, %s3411_s13 }
0x3fc4   : > { %v2290_v61 = vpop.permute.xlu0 %2289 }
0x3fc5   : > { %v2292_v56 = vadd.f32 %v2290_v61, %v2282_v36 }
0x3fc7   : > { %3172 = vtanh.f32 %v2292_v56 }
0x3fcd   : > { %v3173_v43 = vpop.eup %3172 }
0x3fce   : > { %2295 = vrot.lane.b32.xlu0 %v3173_v43, %s3411_s13 }
0x4040   : > { %v2296_v12 = vpop.permute.xlu0 %2295 }
0x4041   : > { %v2298_v37 = vmul.f32 %v2296_v12, %v2277_v13 }
0x4043   : > { %2300 = vrot.lane.b32.xlu2 %v2298_v37, %s3412_s14 }
0x404b   : > { %2341 = vrot.lane.b32.xlu2 %v4386_v17, %s3413_s15 }
0x409d   : > { %v2301_v38 = vpop.permute.xlu2 %2300 }
0x409e   : > { %2931 = vmatmul.msk.f32.vlgmr.msra.gmra.mxu1 %vm218_vm2, %v2301_v38 }
0x409f   : > { %2529 = vmatpush.msra.mxu1 %v4414_v39 }
0x40a1   : > { %2530 = vmatpush.msra.mxu1 %v4417_v2 }
0x40a3   : > { %2531 = vmatpush.msra.mxu1 %v4420_v42 }
0x40a5   : > { %2532 = vmatpush.msra.mxu1 %v4423_v58 }
0x411b   : > { %v2321_v17 = vpop.f32.mrf.mxu1 }
0x411c   : > { %v2322_v47 = vadd.f32 %v4148_v28, %v2321_v17  ;;  %v2342_v28 = vpop.permute.xlu2 %2341 }
0x411d   : > { %v2347_v19 = vsel %vm214_vm0, %v4434_v55, %v2342_v28 }
0x411e   : > { %v2324_v23 = vmul.f32 1.442695, %v2322_v47 }
0x4120   : > { %3174 = vpow2.f32 %v2324_v23 }
0x4126   : > { %v3175_v15 = vpop.eup %3174 }
0x4127   : > { %v2326_v49 = vsel %vm214_vm0, %v3175_v15, 0.0 }
0x4128   : > { %2327 = vadd.xlane.f32.xlu0 %v2326_v49 }
0x419b   : > { %v2328_v4 = vpop.xlane.xlu0 %2327 }
0x419c   : > { %3176 = vrcp.f32 %v2328_v4 }
0x41a2   : > { %v3177_v3 = vpop.eup %3176 }
0x41a3   : > { %v2330_v6 = vmul.f32 %v3177_v3, %v2328_v4 }
0x41a5   : > { %v2331_v31 = vsub.f32 2.0, %v2330_v6 }
0x41a7   : > { %v2332_v10 = vmul.f32 %v3177_v3, %v2331_v31 }
0x41a9   : > { %v4428_v16 = vmul.f32 %v3175_v15, %v2332_v10 }
0x41ab   : > { %2344 = vrot.lane.b32.xlu1 %v4428_v16, %s3414_s18 }
0x41b3   : > { %2419 = vrot.lane.b32.xlu1 %v2298_v37, %s3408_s27 }
0x421d   : > { %v2345_v59 = vpop.permute.xlu1 %2344 }
0x421e   : > { %v2348_v20 = vsel %vm216_vm1, %v2347_v19, %v2345_v59 }
0x421f   : > { %v2349_v50 = vsel %vm218_vm2, %v2348_v20, %v2292_v56 }
0x4220   : > { %v2350_v21 = vsel %vm220_vm3, %v2349_v50, 1.0 }
0x4221   : > { %2933 = vmatmul.msk.f32.vlgmr.msra.gmra.mxu0 %vm222_vm4, %v2350_v21  ;;  %2934 = vmatmul.msk.f32.vlgmr.msra.gmra.mxu2 %vm222_vm4, %v2350_v21 }
0x4225   : > { %v2420_v35 = vpop.permute.xlu1 %2419 }
0x429e   : > { %v2371_v22 = vpop.f32.mrf.mxu0 }
0x429f   : > { %v2394_v52 = vmul.f32 0.5, %v2371_v22 }
0x42a1   : > { %3178 = vtanh.f32 %v2394_v52 }
0x42a4   : > { %v2391_v31 = vpop.f32.mrf.mxu2 }
0x42a7   : > { %v3179_v25 = vpop.eup %3178 }
0x42a8   : > { %2400 = vrot.lane.b32.xlu2 %v3179_v25, %s3408_s27  ;;  %v2396_v62 = vadd.f32 1.0, %v3179_v25 }
0x42aa   : > { %v2397_v63 = vmul.f32 0.5, %v2396_v62 }
0x42ac   : > { %v2398_v9 = vmul.f32 %v2397_v63, %v4380_v14 }
0x4302   : > { %v2401_v34 = vpop.permute.xlu2 %2400 }
0x4303   : > { %v2403_v40 = vmul.f32 %v2401_v34, %v2397_v63 }
0x4305   : > { %2405 = vrot.lane.b32.xlu2 %v2403_v40, %s3409_s7 }
0x435f   : > { %v2406_v18 = vpop.permute.xlu2 %2405 }
0x4360   : > { %v4446_v48 = vadd.f32 %v2406_v18, %v2398_v9  ;;  %v4470_v18 = vld [vmem:[#allocation5 + $0x150] ss:$0 sm:$0xff] }
0x4362   : > { %3180 = vtanh.f32 %v4446_v48 }
0x4368   : > { %v3181_v11 = vpop.eup %3180 }
0x4369   : > { %2411 = vrot.lane.b32.xlu2 %v3181_v11, %s3409_s7 }
0x43c3   : > { %v2412_v13 = vpop.permute.xlu2 %2411 }
0x43c4   : > { %v2414_v29 = vmul.f32 %v2412_v13, %v2397_v63 }
0x43c6   : > { %2416 = vrot.lane.b32.xlu2 %v2414_v29, %s3410_s8 }
0x4420   : > { %v2417_v1 = vpop.permute.xlu2 %2416 }
0x4421   : > { %v2422_v36 = vsel %vm291_vm5, %v2417_v1, %v2420_v35 }
0x4422   : > { %2935 = vmatmul.msk.f32.vlgmr.msrb.gmra.mxu3 %vm293_vm6, %v2422_v36 }
0x44a5   : > { %v2443_v61 = vpop.f32.mrf.mxu3 }
0x44a6   : > { %v2444_v14 = vadd.f32 %v4392_v8, %v2443_v61 }
0x44a8   : > { %v2446_v56 = vmul.f32 1.442695, %v2444_v14  ;;  %v2448_v43 = vmax.f32 %v2444_v14, 0.0 }
0x44aa   : > { %3182 = vpow2.f32 %v2446_v56  ;;  %2483 = vrot.lane.b32.xlu1 %v2448_v43, %s3407_s17 }
0x44b0   : > { %v3183_v12 = vpop.eup %3182 }
0x44b1   : > { %2936 = vmatmul.msk.f32.vlgmr.msrb.gmra.mxu1 %vm214_vm0, %v3183_v12  ;;  %v2472_v37 = vsel %vm214_vm0, %v3183_v12, 0.0 }
0x44b2   : > { %2473 = vadd.xlane.f32.xlu2 %v2472_v37  ;;  %2680 = vmatpush.msrb.mxu1 %v4402_v27 }
0x451c   : > { %v2484_v38 = vpop.permute.xlu1 %2483 }
0x451d   : > { %v2486_v17 = vsel %vm291_vm5, %v2417_v1, %v2484_v38 }
0x451e   : > { %2492 = vrot.lane.b32.xlu1 %v2486_v17, %s3411_s13 }
0x4525   : > { %v2474_v47 = vpop.xlane.xlu2 %2473 }
0x4526   : > { %3184 = vrcp.f32 %v2474_v47 }
0x452c   : > { %v3185_v23 = vpop.eup %3184 }
0x452d   : > { %v2476_v15 = vmul.f32 %v3185_v23, %v2474_v47 }
0x452e   : > { %v2469_v3 = vpop.f32.mrf.mxu1 }
0x452f   : > { %v2477_v49 = vsub.f32 2.0, %v2476_v15 }
0x4531   : > { %v2478_v4 = vmul.f32 %v3185_v23, %v2477_v49 }
0x4533   : > { %v2480_v6 = vmul.f32 %v2478_v4, %v2469_v3  ;;  %v4478_v14 = vmul.f32 %v3183_v12, %v2478_v4 }
0x4535   : > { %v2481_v10 = vadd.f32 %v2480_v6, %v2391_v31 }
0x4537   : > { %v2487_v28 = vmul.f32 0.5, %v2481_v10 }
0x4539   : > { %3186 = vtanh.f32 %v2487_v28 }
0x453f   : > { %v3187_v19 = vpop.eup %3186 }
0x4540   : > { %2497 = vrot.lane.b32.xlu0 %v3187_v19, %s3411_s13  ;;  %v2489_v27 = vadd.f32 1.0, %v3187_v19 }
0x4542   : > { %v2490_v59 = vmul.f32 0.5, %v2489_v27 }
0x4590   : > { %v2493_v21 = vpop.permute.xlu1 %2492 }
0x4591   : > { %v2495_v22 = vmul.f32 %v2493_v21, %v2490_v59 }
0x45b2   : > { %v2498_v20 = vpop.permute.xlu0 %2497 }
0x45b3   : > { %v2500_v50 = vmul.f32 %v2498_v20, %v2490_v59 }
0x45b5   : > { %2502 = vrot.lane.b32.xlu1 %v2500_v50, %s3411_s13 }
0x4627   : > { %v2503_v52 = vpop.permute.xlu1 %2502 }
0x4628   : > { %v2505_v25 = vadd.f32 %v2503_v52, %v2495_v22 }
0x462a   : > { %3188 = vtanh.f32 %v2505_v25 }
0x4630   : > { %v3189_v62 = vpop.eup %3188 }
0x4631   : > { %2508 = vrot.lane.b32.xlu0 %v3189_v62, %s3411_s13 }
0x46a3   : > { %v2509_v63 = vpop.permute.xlu0 %2508 }
0x46a4   : > { %v2511_v34 = vmul.f32 %v2509_v63, %v2490_v59 }
0x46a6   : > { %2513 = vrot.lane.b32.xlu1 %v2511_v34, %s3412_s14 }
0x46ae   : > { %2554 = vrot.lane.b32.xlu1 %v2414_v29, %s3413_s15 }
0x4718   : > { %v2514_v40 = vpop.permute.xlu1 %2513 }
0x4719   : > { %2937 = vmatmul.msk.f32.vlgmr.msra.gmra.mxu1 %vm218_vm2, %v2514_v40 }
0x471a   : > { %2742 = vmatpush.msra.mxu1 %v4414_v39 }
0x471c   : > { %2743 = vmatpush.msra.mxu1 %v4417_v2 }
0x471e   : > { %2744 = vmatpush.msra.mxu1 %v4420_v42 }
0x4720   : > { %2745 = vmatpush.msra.mxu1 %v4423_v58  ;;  %v2555_v58 = vpop.permute.xlu1 %2554 }
0x4721   : > { %v2560_v56 = vsel %vm214_vm0, %v4478_v14, %v2555_v58 }
0x4796   : > { %v2534_v9 = vpop.f32.mrf.mxu1 }
0x4797   : > { %v2535_v11 = vadd.f32 %v4470_v18, %v2534_v9 }
0x4799   : > { %v2537_v13 = vmul.f32 1.442695, %v2535_v11 }
0x479b   : > { %3190 = vpow2.f32 %v2537_v13 }
0x47a1   : > { %v3191_v35 = vpop.eup %3190 }
0x47a2   : > { %v2539_v29 = vsel %vm214_vm0, %v3191_v35, 0.0 }
0x47a3   : > { %2540 = vadd.xlane.f32.xlu0 %v2539_v29 }
0x4816   : > { %v2541_v1 = vpop.xlane.xlu0 %2540 }
0x4817   : > { %3192 = vrcp.f32 %v2541_v1 }
0x481d   : > { %v3193_v39 = vpop.eup %3192 }
0x481e   : > { %v2543_v36 = vmul.f32 %v3193_v39, %v2541_v1 }
0x4820   : > { %v2544_v2 = vsub.f32 2.0, %v2543_v36 }
0x4822   : > { %v2545_v61 = vmul.f32 %v3193_v39, %v2544_v2 }
0x4824   : > { %v4474_v42 = vmul.f32 %v3191_v35, %v2545_v61 }
0x4826   : > { %2557 = vrot.lane.b32.xlu1 %v4474_v42, %s3414_s18 }
0x4898   : > { %v2558_v43 = vpop.permute.xlu1 %2557 }
0x4899   : > { %v2561_v37 = vsel %vm216_vm1, %v2560_v56, %v2558_v43 }
0x489a   : > { %v2562_v38 = vsel %vm218_vm2, %v2561_v37, %v2505_v25 }
0x489b   : > { %v2563_v17 = vsel %vm220_vm3, %v2562_v38, 1.0 }
0x489c   : > { %2939 = vmatmul.msk.f32.vlgmr.msra.gmra.mxu3 %vm222_vm4, %v2563_v17  ;;  %2940 = vmatmul.msk.f32.vlgmr.msrb.gmra.mxu0 %vm222_vm4, %v2563_v17 }
0x4919   : > { %v2604_v1 = vpop.f32.mrf.mxu0 }
0x491f   : > { %v2584_v47 = vpop.f32.mrf.mxu3 }
0x4920   : > { %v2607_v23 = vmul.f32 0.5, %v2584_v47 }
0x4922   : > { %3194 = vtanh.f32 %v2607_v23 }
0x4928   : > { %v3195_v15 = vpop.eup %3194 }
0x4929   : > { %2613 = vrot.lane.b32.xlu2 %v3195_v15, %s3408_s27  ;;  %v2609_v12 = vadd.f32 1.0, %v3195_v15 }
0x492b   : > { %v2610_v49 = vmul.f32 0.5, %v2609_v12 }
0x492d   : > { %v2611_v6 = vmul.f32 %v2610_v49, %v4446_v48 }
0x4931   : > { %2632 = vrot.lane.b32.xlu2 %v2511_v34, %s3408_s27 }
0x4983   : > { %v2614_v4 = vpop.permute.xlu2 %2613 }
0x4984   : > { %v2616_v3 = vmul.f32 %v2614_v4, %v2610_v49 }
0x4986   : > { %2618 = vrot.lane.b32.xlu1 %v2616_v3, %s3409_s7 }
0x498b   : > { %v2633_v59 = vpop.permute.xlu2 %2632 }
0x49f8   : > { %v2619_v31 = vpop.permute.xlu1 %2618 }
0x49f9   : > { %v2621_v10 = vadd.f32 %v2619_v31, %v2611_v6  ;;  %v4635_v6 = vld [vmem:[#allocation11_spill] sm:$0xff] }
0x49fb   : > { %3196 = vtanh.f32 %v2621_v10 }
0x4a01   : > { %v3197_v28 = vpop.eup %3196 }
0x4a02   : > { %2624 = vrot.lane.b32.xlu1 %v3197_v28, %s3409_s7 }
0x4a74   : > { %v2625_v19 = vpop.permute.xlu1 %2624 }
0x4a75   : > { %v2627_v27 = vmul.f32 %v2625_v19, %v2610_v49 }
0x4a77   : > { %2629 = vrot.lane.b32.xlu1 %v2627_v27, %s3410_s8  ;;  %s3352_s8 = scalar_lea.hbm %s4627_s2, 192 }
0x4a78   : > { %p3354_p8 = scmp.lt.s32.totalorder %s3352_s8, %s3348_s16 }
0x4a7a   : > { %p3355_p7 = por %p3354_p8, %p3353_p12 }
0x4a7c   : > { %p3356_p9 = pnand %p3355_p7, %p3351_p5 }
0x4ae9   : > { %v2630_v20 = vpop.permute.xlu1 %2629 }
0x4aea   : > { %v2635_v50 = vsel %vm291_vm5, %v2630_v20, %v2633_v59 }
0x4aeb   : > { %2941 = vmatmul.msk.f32.vlgmr.msrb.gmra.mxu2 %vm293_vm6, %v2635_v50 }
0x4b6e   : > { %v2656_v21 = vpop.f32.mrf.mxu2 }
0x4b6f   : > { %v2657_v22 = vadd.f32 %v4392_v8, %v2656_v21 }
0x4b71   : > { %v2659_v48 = vmul.f32 1.442695, %v2657_v22  ;;  %v2661_v52 = vmax.f32 %v2657_v22, 0.0 }
0x4b73   : > { %3198 = vpow2.f32 %v2659_v48  ;;  %2696 = vrot.lane.b32.xlu1 %v2661_v52, %s3407_s17 }
0x4b79   : > { %v4497_v25 = vpop.eup %3198 }
0x4b7a   : > { %2942 = vmatmul.msk.f32.vlgmr.msrb.gmra.mxu1 %vm214_vm0, %v4497_v25  ;;  %v2685_v62 = vsel %vm214_vm0, %v4497_v25, 0.0 }
0x4b7b   : > { %2686 = vadd.xlane.f32.xlu0 %v2685_v62 }
0x4be5   : > { %v2697_v63 = vpop.permute.xlu1 %2696 }
0x4be6   : > { %v2699_v34 = vsel %vm291_vm5, %v2630_v20, %v2697_v63 }
0x4be7   : > { %2705 = vrot.lane.b32.xlu0 %v2699_v34, %s3411_s13 }
0x4bee   : > { %v2687_v8 = vpop.xlane.xlu0 %2686 }
0x4bef   : > { %3200 = vrcp.f32 %v2687_v8  ;;  %631 = vrot.lane.b32.xlu0 %v3801_v0, %s3407_s17 }
0x4bf5   : > { %v3201_v40 = vpop.eup %3200 }
0x4bf6   : > { %v2689_v9 = vmul.f32 %v3201_v40, %v2687_v8 }
0x4bf7   : > { %1057 = vrot.lane.b32.xlu0 %v3942_v30, %s3407_s17  ;;  %v2682_v35 = vpop.f32.mrf.mxu1 }
0x4bf8   : > { %v2690_v11 = vsub.f32 2.0, %v2689_v9 }
0x4bfa   : > { %v4509_v13 = vmul.f32 %v3201_v40, %v2690_v11 }
0x4bfc   : > { %v2693_v29 = vmul.f32 %v4509_v13, %v2682_v35 }
0x4bfe   : > { %v2694_v39 = vadd.f32 %v2693_v29, %v2604_v1 }
0x4bff   : > { %1483 = vrot.lane.b32.xlu0 %v4152_v46, %s3407_s17 }
0x4c00   : > { %v2700_v36 = vmul.f32 0.5, %v2694_v39 }
0x4c02   : > { %3202 = vtanh.f32 %v2700_v36 }
0x4c07   : > { %1909 = vrot.lane.b32.xlu0 %v4293_v54, %s3407_s17 }
0x4c08   : > { %v3203_v0 = vpop.eup %3202 }
0x4c09   : > { %2710 = vrot.lane.b32.xlu2 %v3203_v0, %s3411_s13  ;;  %v2702_v2 = vadd.f32 1.0, %v3203_v0 }
0x4c0b   : > { %v2703_v58 = vmul.f32 0.5, %v2702_v2 }
0x4c0f   : > { %2548 = vrot.lane.b32.xlu0 %v4474_v42, %s3407_s17 }
0x4c59   : > { %v2706_v30 = vpop.permute.xlu0 %2705 }
0x4c61   : > { %v632_v61 = vpop.permute.xlu0 %631 }
0x4c62   : > { %v634_v56 = vsel %vm214_vm0, %v3805_v51, %v632_v61 }
0x4c63   : > { %2884 = vst.msk [vmem:[%s4522_s20 + $0x8] sm:$0xff] %vm291_vm5, %v634_v56  ;;  %v2711_v46 = vpop.permute.xlu2 %2710 }
0x4c64   : > { %v2713_v54 = vmul.f32 %v2711_v46, %v2703_v58 }
0x4c66   : > { %2715 = vrot.lane.b32.xlu1 %v2713_v54, %s3411_s13 }
0x4c69   : > { %v1058_v42 = vpop.permute.xlu0 %1057 }
0x4c6a   : > { %v1060_v43 = vsel %vm214_vm0, %v3946_v32, %v1058_v42  ;;  %v2708_v32 = vmul.f32 %v2706_v30, %v2703_v58 }
0x4c6b   : > { %2896 = vst.msk [vmem:[%s4522_s20 + $0x18] sm:$0xff] %vm291_vm5, %v1060_v43 }
0x4c71   : > { %v1484_v51 = vpop.permute.xlu0 %1483 }
0x4c72   : > { %v1486_v37 = vsel %vm214_vm0, %v4156_v44, %v1484_v51 }
0x4c73   : > { %2908 = vst.msk [vmem:[%s4522_s20 + $0x28] sm:$0xff] %vm291_vm5, %v1486_v37 }
0x4c79   : > { %v1910_v38 = vpop.permute.xlu0 %1909 }
0x4c7a   : > { %v1912_v17 = vsel %vm214_vm0, %v4297_v33, %v1910_v38 }
0x4c7b   : > { %2920 = vst.msk [vmem:[%s4522_s20 + $0x38] sm:$0xff] %vm291_vm5, %v1912_v17 }
0x4c81   : > { %v2549_v47 = vpop.permute.xlu0 %2548 }
0x4c82   : > { %v2551_v23 = vsel %vm214_vm0, %v4478_v14, %v2549_v47 }
0x4c83   : > { %2938 = vst.msk [vmem:[%s4522_s20 + $0x50] sm:$0xff] %vm291_vm5, %v2551_v23 }
0x4cd8   : > { %v2716_v15 = vpop.permute.xlu1 %2715 }
0x4cd9   : > { %v2718_v12 = vadd.f32 %v2716_v15, %v2708_v32 }
0x4cdb   : > { %3204 = vtanh.f32 %v2718_v12 }
0x4ce1   : > { %v3205_v44 = vpop.eup %3204 }
0x4ce2   : > { %2721 = vrot.lane.b32.xlu2 %v3205_v44, %s3411_s13 }
0x4d3c   : > { %v2722_v49 = vpop.permute.xlu2 %2721 }
0x4d3d   : > { %v2724_v4 = vmul.f32 %v2722_v49, %v2703_v58 }
0x4d3f   : > { %2726 = vrot.lane.b32.xlu1 %v2724_v4, %s3412_s14 }
0x4d47   : > { %419 = vrot.lane.b32.xlu1 %v3730_v57, %s3407_s17 }
0x4d4f   : > { %844 = vrot.lane.b32.xlu1 %v3871_v24, %s3407_s17 }
0x4d57   : > { %1270 = vrot.lane.b32.xlu1 %v4081_v53, %s3407_s17 }
0x4d5f   : > { %1696 = vrot.lane.b32.xlu1 %v4222_v45, %s3407_s17 }
0x4d67   : > { %2122 = vrot.lane.b32.xlu1 %v4364_v5, %s3407_s17 }
0x4db1   : > { %v2727_v33 = vpop.permute.xlu1 %2726 }
0x4db2   : > { %2943 = vmatmul.msk.f32.vlgmr.msra.gmra.mxu1 %vm218_vm2, %v2727_v33 }
0x4db9   : > { %v420_v14 = vpop.permute.xlu1 %419 }
0x4dba   : > { %v422_v57 = vsel %vm214_vm0, %v3736_v60, %v420_v14 }
0x4dbb   : > { %423 = vst.msk [vmem:[%s4522_s20] sm:$0xff] %vm291_vm5, %v422_v57 }
0x4dc1   : > { %v845_v24 = vpop.permute.xlu1 %844 }
0x4dc2   : > { %v847_v53 = vsel %vm214_vm0, %v3875_v26, %v845_v24 }
0x4dc3   : > { %2890 = vst.msk [vmem:[%s4522_s20 + $0x10] sm:$0xff] %vm291_vm5, %v847_v53 }
0x4dc9   : > { %v1271_v45 = vpop.permute.xlu1 %1270 }
0x4dca   : > { %v1273_v5 = vsel %vm214_vm0, %v4086_v41, %v1271_v45 }
0x4dcb   : > { %2902 = vst.msk [vmem:[%s4522_s20 + $0x20] sm:$0xff] %vm291_vm5, %v1273_v5 }
0x4dd1   : > { %v1697_v3 = vpop.permute.xlu1 %1696 }
0x4dd2   : > { %v1699_v31 = vsel %vm214_vm0, %v4635_v6, %v1697_v3 }
0x4dd3   : > { %2914 = vst.msk [vmem:[%s4522_s20 + $0x30] sm:$0xff] %vm291_vm5, %v1699_v31 }
0x4dd9   : > { %v2123_v60 = vpop.permute.xlu1 %2122 }
0x4dda   : > { %v2125_v10 = vsel %vm214_vm0, %v4368_v7, %v2123_v60 }
0x4ddb   : > { %2926 = vst.msk [vmem:[%s4522_s20 + $0x40] sm:$0xff] %vm291_vm5, %v2125_v10 }
0x4e2f   : > { %v2747_v26 = vpop.f32.mrf.mxu1 }
0x4e30   : > { %v2748_v28 = vadd.f32 %v4470_v18, %v2747_v26 }
0x4e32   : > { %v2750_v19 = vmul.f32 1.442695, %v2748_v28 }
0x4e34   : > { %3206 = vpow2.f32 %v2750_v19 }
0x4e3a   : > { %v3207_v41 = vpop.eup %3206 }
0x4e3b   : > { %v2752_v27 = vsel %vm214_vm0, %v3207_v41, 0.0 }
0x4e3c   : > { %2753 = vadd.xlane.f32.xlu2 %v2752_v27 }
0x4e54   : > { %2335 = vrot.lane.b32.xlu2 %v4428_v16, %s3407_s17  ;;  %v2692_v16 = vmul.f32 %v4497_v25, %v4509_v13 }
0x4eaf   : > { %v2754_v59 = vpop.xlane.xlu2 %2753 }
0x4eb0   : > { %3208 = vrcp.f32 %v2754_v59 }
0x4eb6   : > { %v3209_v7 = vpop.eup %3208 }
0x4eb7   : > { %v2756_v20 = vmul.f32 %v3209_v7, %v2754_v59  ;;  %v2336_v50 = vpop.permute.xlu2 %2335 }
0x4eb8   : > { %v2338_v18 = vsel %vm214_vm0, %v4434_v55, %v2336_v50 }
0x4eb9   : > { %v2757_v21 = vsub.f32 2.0, %v2756_v20  ;;  %2932 = vst.msk [vmem:[%s4522_s20 + $0x48] sm:$0xff] %vm291_vm5, %v2338_v18 }
0x4ebb   : > { %v2758_v22 = vmul.f32 %v3209_v7, %v2757_v21 }
0x4ebd   : > { %v2759_v48 = vmul.f32 %v3207_v41, %v2758_v22 }
0x4ebf   : > { %2761 = vrot.lane.b32.xlu1 %v2759_v48, %s3407_s17 }
0x4f31   : > { %v2762_v55 = vpop.permute.xlu1 %2761 }
0x4f32   : > { %v2764_v52 = vsel %vm214_vm0, %v2692_v16, %v2762_v55 }
0x4f33   : > { %2944 = vst.msk [vmem:[%s4522_s20 + $0x58] sm:$0xff] %vm291_vm5, %v2764_v52 }
0x4f34   : > { %3359 = shalt.err (!%p3356_p9)
}
0x4f35   : > { %s3415_s29 = smov 128   ;;  %s3416_s15 = smov 256  }
0x4f36   : > { %2955 = dma.vmem_to_hbm [thread:$0]  (%p3492_p13), %s2780_s3, 1536, %s2782_s4, %s2768_s5, %s3415_s29, %s3416_s15, %s3407_s17  }
0x4f37 PF: > { %s2796_s18 = sand.u32 1, %s3390_s9   ;;  %p4636_p10 = scmp.ge.s32.totalorder %s3402_s12, 2 }
0x4f38   : > { %s2797_s19 = scalar_lea.sflag [#allocation4], %s2796_s18 }
0x4f39   : > { %p2966_p11 = pnand %p4636_p10, %p3497_p4 }
0x4f3b   : > { %p2967_p0 = pneg %p2966_p11 }
0x4f3d   : > { %3385 = dma.done.wait (%p2967_p0), %s2797_s19, 1536  }
0x4f3e   : > { %3387 = vsyncadd (%p2967_p0), %s2797_s19, 4294965760  ;;  %p16_p2 = scmp.ge.s32.totalorder %s3472_s23, 4   ;;  %s4637_s9 = smov %s3394_s10 }
0x4f3f   : > { %s4638_s10 = smov %s3398_s11  ;;  %s4639_s11 = smov %s3484_s26 }
0x4f40   : > { %s4640_s12 = smov %s3472_s23  ;;  %18 = sbr.rel (!%p16_p2) target bundleno = 6 (0x6), region = 88 }
0x4f45   :  { %2803 = vsyncpa [#allocation3], 1 }
0x4f46   :  { %2805 = vsyncpa [#allocation3 + $0x1], 1 }
0x4f47   :  { %2806 = vsyncpa [#allocation6], 1 }
0x4f48   :  { %2807 = vsyncpa [#allocation4], 1 }
0x4f49   :  { %2809 = vsyncpa [#allocation4 + $0x1], 1 }

</bundles_post_ra>
